<compile_context>
chip_gen: v7x
topology: tpu7x:2x2x1
jax: 0.10.0
libtpu: 0.0.40
codegen_flags: <defaults>
</compile_context>

<pallas_src>
import math

import jax
import jax.numpy as jnp
from jax.experimental import pallas as pl
from jax.experimental.pallas import tpu as pltpu

BATCH = 2
N_DIM = 16
N_CLASSES = 10
IN_FEATS = N_DIM * N_CLASSES     # 160
FC1 = 512
FC2 = 1024
OUT = 784                        # 28*28 reconstruction
OUT_PAD = 896                    # 7*128: lane-dense fc3 columns / output store


# ----------------------------- fused Pallas kernel ---------------------------
def _recon_kernel(target_ref,            # (B, 1)        int32  VMEM
                  x_ref,                 # (B, IN_FEATS) f32    VMEM
                  w1_ref, b1_ref,        # (IN_FEATS, FC1) bf16, (1, FC1) f32
                  w2_hbm, b2_ref,        # (FC1, FC2) bf16 HBM,  (1, FC2) f32
                  w3_hbm, b3_ref,        # (FC2, OUT_PAD) bf16 HBM, (1, OUT_PAD) f32
                  out_ref,               # (B, OUT_PAD) f32 VMEM
                  w2_vmem, w3_vmem,      # VMEM scratch for the streamed weights
                  sem):                  # DMA semaphores (2,)
    # Kick off both big weight DMAs immediately; fc1/fc2 compute hides them.
    cp2 = pltpu.make_async_copy(w2_hbm, w2_vmem, sem.at[0])
    cp3 = pltpu.make_async_copy(w3_hbm, w3_vmem, sem.at[1])
    cp2.start()
    cp3.start()

    x = x_ref[...]
    b, cd = x.shape

    # One-hot capsule mask, fully vectorized.  Flattened layout is class-major:
    # column c*N_DIM + d belongs to class c, matching x.view(-1, n_dim*n_classes)
    # applied to a (B, n_classes, n_dim) capsule tensor.
    lane = jax.lax.broadcasted_iota(jnp.int32, (b, cd), 1)
    if N_DIM & (N_DIM - 1) == 0:
        cls = lane >> (N_DIM.bit_length() - 1)   # N_DIM=16 -> lane >> 4
    else:
        cls = lane // N_DIM
    hit = cls == target_ref[...]                 # (B, cd) == (B, 1) broadcast
    xm = jnp.where(hit, x, 0.0).astype(jnp.bfloat16)

    # fc1 + ReLU (runs while w2/w3 stream in).
    h1 = jnp.dot(xm, w1_ref[...], preferred_element_type=jnp.float32) + b1_ref[...]
    h1 = jnp.maximum(h1, 0.0).astype(jnp.bfloat16)

    # fc2 + ReLU: wait only for w2 (w3 keeps streaming underneath).
    cp2.wait()
    h2 = jnp.dot(h1, w2_vmem[...], preferred_element_type=jnp.float32) + b2_ref[...]
    h2 = jnp.maximum(h2, 0.0).astype(jnp.bfloat16)

    # fc3 + sigmoid: wait only for w3.  Store is lane-dense (896 = 7*128).
    cp3.wait()
    y = jnp.dot(h2, w3_vmem[...], preferred_element_type=jnp.float32) + b3_ref[...]
    out_ref[...] = jax.nn.sigmoid(y)


def _vmem(shape):
    """Whole-array VMEM BlockSpec for the trivial grid=(1,)."""
    zeros = (0,) * len(shape)
    return pl.BlockSpec(shape, lambda i: zeros)


_HBM = pl.BlockSpec(memory_space=pl.ANY)   # raw HBM ref, DMA'd manually in-kernel


@jax.jit
def reconstruction_net(kparams, x, target):
    B = x.shape[0]
    x_flat = x.reshape(B, IN_FEATS).astype(jnp.float32)   # == x.view(-1, n_dim*n_classes)
    tgt = target.reshape(B, 1).astype(jnp.int32)

    out_pad = pl.pallas_call(
        _recon_kernel,
        grid=(1,),
        in_specs=[
            _vmem((B, 1)),                                   # target
            _vmem((B, IN_FEATS)),                            # x
            _vmem((IN_FEATS, FC1)), _vmem((1, FC1)),         # w1, b1
            _HBM, _vmem((1, FC2)),                           # w2 (HBM), b2
            _HBM, _vmem((1, OUT_PAD)),                       # w3 (HBM), b3
        ],
        out_specs=_vmem((B, OUT_PAD)),
        out_shape=jax.ShapeDtypeStruct((B, OUT_PAD), jnp.float32),
        scratch_shapes=[
            pltpu.VMEM((FC1, FC2), jnp.bfloat16),
            pltpu.VMEM((FC2, OUT_PAD), jnp.bfloat16),
            pltpu.SemaphoreType.DMA((2,)),
        ],
        compiler_params=pltpu.CompilerParams(
            dimension_semantics=("arbitrary",)),
    )(tgt, x_flat,
      kparams["w1"], kparams["b1"],
      kparams["w2"], kparams["b2"],
      kparams["w3"], kparams["b3"])
    return out_pad[:, :OUT]


# ----------------------------- params & reference ----------------------------
def init_params(key):
    """PyTorch nn.Linear default init; weights stored pre-transposed as (in, out)."""
    ks = jax.random.split(key, 6)

    def linear(kw, kb, fan_in, fan_out):
        bound = 1.0 / math.sqrt(fan_in)
        w = jax.random.uniform(kw, (fan_in, fan_out), jnp.float32, -bound, bound)
        b = jax.random.uniform(kb, (1, fan_out), jnp.float32, -bound, bound)
        return w, b

    w1, b1 = linear(ks[0], ks[1], IN_FEATS, FC1)
    w2, b2 = linear(ks[2], ks[3], FC1, FC2)
    w3, b3 = linear(ks[4], ks[5], FC2, OUT)
    return {"w1": w1, "b1": b1, "w2": w2, "b2": b2, "w3": w3, "b3": b3}


def to_kernel_params(params):
    """Hoisted once on the host: bf16 MXU weights, lane-dense (896-col) fc3."""
    w3p = jnp.pad(params["w3"], ((0, 0), (0, OUT_PAD - OUT)))
    b3p = jnp.pad(params["b3"], ((0, 0), (0, OUT_PAD - OUT)))
    return {
        "w1": params["w1"].astype(jnp.bfloat16), "b1": params["b1"],
        "w2": params["w2"].astype(jnp.bfloat16), "b2": params["b2"],
        "w3": w3p.astype(jnp.bfloat16),          "b3": b3p,
    }


def reference(params, x, target):
    """Pure-JAX f32 re-implementation of ReconstructionNet.forward."""
    mask = jax.nn.one_hot(target, N_CLASSES, dtype=x.dtype)[:, :, None]
    xm = (x * mask).reshape(x.shape[0], IN_FEATS)
    h1 = jax.nn.relu(xm @ params["w1"] + params["b1"])
    h2 = jax.nn.relu(h1 @ params["w2"] + params["b2"])
    return jax.nn.sigmoid(h2 @ params["w3"] + params["b3"])


# ----------------------------- main ------------------------------------------
if __name__ == "__main__":
    key = jax.random.PRNGKey(0)
    pkey, xkey = jax.random.split(key)
    params = init_params(pkey)
    kparams = to_kernel_params(params)

    x = jax.random.normal(xkey, (BATCH, N_CLASSES, N_DIM), jnp.float32)
    target = jnp.array([3, 7], dtype=jnp.int32)

    out = reconstruction_net(kparams, x, target)
    jax.block_until_ready(out)

    assert out.shape == (BATCH, OUT)
    assert bool(jnp.all(jnp.isfinite(out)))
    ref = reference(params, x, target)
    max_err = float(jnp.max(jnp.abs(out - ref)))
    assert max_err < 3e-2, f"max abs err vs f32 reference: {max_err}"
    print("KERNEL_OK")
</pallas_src>

<mosaic_0001>
module attributes {stable_mosaic.version = 11 : i64} {
  func.func @_recon_kernel(%arg0: i32, %arg1: memref<2x1xi32, #tpu.memory_space<vmem>>, %arg2: memref<2x160xf32, #tpu.memory_space<vmem>>, %arg3: memref<160x512xbf16, #tpu.memory_space<vmem>>, %arg4: memref<1x512xf32, #tpu.memory_space<vmem>>, %arg5: memref<512x1024xbf16, #tpu.memory_space<any>>, %arg6: memref<1x1024xf32, #tpu.memory_space<vmem>>, %arg7: memref<1024x896xbf16, #tpu.memory_space<any>>, %arg8: memref<1x896xf32, #tpu.memory_space<vmem>>, %arg9: memref<2x896xf32, #tpu.memory_space<vmem>>, %arg10: memref<512x1024xbf16, #tpu.memory_space<vmem>>, %arg11: memref<1024x896xbf16, #tpu.memory_space<vmem>>, %arg12: memref<2x!tpu.dma_semaphore, #tpu.memory_space<semaphore_mem>>) attributes {dimension_semantics = [#tpu.dimension_semantics<arbitrary>], iteration_bounds = array<i64: 1>, scalar_prefetch = 0 : i64, scratch_operands = 3 : i64, tpu.core_type = #tpu.core_type<tc>, window_params = [{pipeline_mode = #tpu.pipeline_mode<synchronous>, transform_indices = @transform_0, window_bounds = array<i64: 2, 1>}, {pipeline_mode = #tpu.pipeline_mode<synchronous>, transform_indices = @transform_1, window_bounds = array<i64: 2, 160>}, {pipeline_mode = #tpu.pipeline_mode<synchronous>, transform_indices = @transform_2, window_bounds = array<i64: 160, 512>}, {pipeline_mode = #tpu.pipeline_mode<synchronous>, transform_indices = @transform_3, window_bounds = array<i64: 1, 512>}, {}, {pipeline_mode = #tpu.pipeline_mode<synchronous>, transform_indices = @transform_5, window_bounds = array<i64: 1, 1024>}, {}, {pipeline_mode = #tpu.pipeline_mode<synchronous>, transform_indices = @transform_7, window_bounds = array<i64: 1, 896>}, {pipeline_mode = #tpu.pipeline_mode<synchronous>, transform_indices = @transform_8, window_bounds = array<i64: 2, 896>}]} {
    %c0_i32 = arith.constant 0 : i32
    %0 = tpu.memref_slice %arg12[%c0_i32] : memref<2x!tpu.dma_semaphore, #tpu.memory_space<semaphore_mem>> -> memref<1x!tpu.dma_semaphore, #tpu.memory_space<semaphore_mem>>
    %1 = tpu.memref_squeeze %0 : memref<1x!tpu.dma_semaphore, #tpu.memory_space<semaphore_mem>> -> memref<!tpu.dma_semaphore, #tpu.memory_space<semaphore_mem>>
    tpu.enqueue_dma source(%arg5 : memref<512x1024xbf16, #tpu.memory_space<any>>) target(%arg10 : memref<512x1024xbf16, #tpu.memory_space<vmem>>) target_semaphore(%1 : memref<!tpu.dma_semaphore, #tpu.memory_space<semaphore_mem>>)
    %c1_i32 = arith.constant 1 : i32
    %2 = tpu.memref_slice %arg12[%c1_i32] : memref<2x!tpu.dma_semaphore, #tpu.memory_space<semaphore_mem>> -> memref<1x!tpu.dma_semaphore, #tpu.memory_space<semaphore_mem>>
    %3 = tpu.memref_squeeze %2 : memref<1x!tpu.dma_semaphore, #tpu.memory_space<semaphore_mem>> -> memref<!tpu.dma_semaphore, #tpu.memory_space<semaphore_mem>>
    tpu.enqueue_dma source(%arg7 : memref<1024x896xbf16, #tpu.memory_space<any>>) target(%arg11 : memref<1024x896xbf16, #tpu.memory_space<vmem>>) target_semaphore(%3 : memref<!tpu.dma_semaphore, #tpu.memory_space<semaphore_mem>>)
    %c0 = arith.constant 0 : index
    %c0_0 = arith.constant 0 : index
    %4 = vector.load %arg2[%c0, %c0_0] : memref<2x160xf32, #tpu.memory_space<vmem>>, vector<2x160xf32>
    %5 = tpu.iota {dimensions = array<i32: 1>} : vector<2x160xi32>
    %c4_i32 = arith.constant 4 : i32
    %6 = vector.broadcast %c4_i32 : i32 to vector<2x160xi32>
    %7 = arith.shrsi %5, %6 : vector<2x160xi32>
    %c0_1 = arith.constant 0 : index
    %c0_2 = arith.constant 0 : index
    %8 = vector.load %arg1[%c0_1, %c0_2] : memref<2x1xi32, #tpu.memory_space<vmem>>, vector<2x1xi32>
    %9 = vector.broadcast %8 : vector<2x1xi32> to vector<2x160xi32>
    %10 = arith.cmpi eq, %7, %9 : vector<2x160xi32>
    %cst = arith.constant 0.000000e+00 : f32
    %11 = vector.broadcast %cst : f32 to vector<2x160xf32>
    %12 = arith.select %10, %4, %11 : vector<2x160xi1>, vector<2x160xf32>
    %13 = arith.truncf %12 : vector<2x160xf32> to vector<2x160xbf16>
    %c0_3 = arith.constant 0 : index
    %c0_4 = arith.constant 0 : index
    %14 = vector.load %arg3[%c0_3, %c0_4] : memref<160x512xbf16, #tpu.memory_space<vmem>>, vector<160x512xbf16>
    %cst_5 = arith.constant dense<0.000000e+00> : vector<2x512xf32>
    %15 = tpu.matmul %13, %14, %cst_5 {dimension_numbers = #tpu.dot_dimension_numbers<[1], [0], [0], [1], [0, 0, 1, 1], [], []>} : vector<2x160xbf16>, vector<160x512xbf16>, vector<2x512xf32> -> vector<2x512xf32>
    %c0_6 = arith.constant 0 : index
    %c0_7 = arith.constant 0 : index
    %16 = vector.load %arg4[%c0_6, %c0_7] : memref<1x512xf32, #tpu.memory_space<vmem>>, vector<1x512xf32>
    %17 = vector.broadcast %16 : vector<1x512xf32> to vector<2x512xf32>
    %18 = arith.addf %15, %17 : vector<2x512xf32>
    %cst_8 = arith.constant 0.000000e+00 : f32
    %19 = vector.broadcast %cst_8 : f32 to vector<2x512xf32>
    %20 = arith.maximumf %18, %19 : vector<2x512xf32>
    %21 = arith.truncf %20 : vector<2x512xf32> to vector<2x512xbf16>
    %c0_i32_9 = arith.constant 0 : i32
    %22 = tpu.memref_slice %arg12[%c0_i32_9] : memref<2x!tpu.dma_semaphore, #tpu.memory_space<semaphore_mem>> -> memref<1x!tpu.dma_semaphore, #tpu.memory_space<semaphore_mem>>
    %23 = tpu.memref_squeeze %22 : memref<1x!tpu.dma_semaphore, #tpu.memory_space<semaphore_mem>> -> memref<!tpu.dma_semaphore, #tpu.memory_space<semaphore_mem>>
    tpu.wait_dma2 semaphore(%23 : memref<!tpu.dma_semaphore, #tpu.memory_space<semaphore_mem>>) src(%arg5 : memref<512x1024xbf16, #tpu.memory_space<any>>) dst(%arg10 : memref<512x1024xbf16, #tpu.memory_space<vmem>>)
    %c0_10 = arith.constant 0 : index
    %c0_11 = arith.constant 0 : index
    %24 = vector.load %arg10[%c0_10, %c0_11] : memref<512x1024xbf16, #tpu.memory_space<vmem>>, vector<512x1024xbf16>
    %cst_12 = arith.constant dense<0.000000e+00> : vector<2x1024xf32>
    %25 = tpu.matmul %21, %24, %cst_12 {dimension_numbers = #tpu.dot_dimension_numbers<[1], [0], [0], [1], [0, 0, 1, 1], [], []>} : vector<2x512xbf16>, vector<512x1024xbf16>, vector<2x1024xf32> -> vector<2x1024xf32>
    %c0_13 = arith.constant 0 : index
    %c0_14 = arith.constant 0 : index
    %26 = vector.load %arg6[%c0_13, %c0_14] : memref<1x1024xf32, #tpu.memory_space<vmem>>, vector<1x1024xf32>
    %27 = vector.broadcast %26 : vector<1x1024xf32> to vector<2x1024xf32>
    %28 = arith.addf %25, %27 : vector<2x1024xf32>
    %cst_15 = arith.constant 0.000000e+00 : f32
    %29 = vector.broadcast %cst_15 : f32 to vector<2x1024xf32>
    %30 = arith.maximumf %28, %29 : vector<2x1024xf32>
    %31 = arith.truncf %30 : vector<2x1024xf32> to vector<2x1024xbf16>
    %c1_i32_16 = arith.constant 1 : i32
    %32 = tpu.memref_slice %arg12[%c1_i32_16] : memref<2x!tpu.dma_semaphore, #tpu.memory_space<semaphore_mem>> -> memref<1x!tpu.dma_semaphore, #tpu.memory_space<semaphore_mem>>
    %33 = tpu.memref_squeeze %32 : memref<1x!tpu.dma_semaphore, #tpu.memory_space<semaphore_mem>> -> memref<!tpu.dma_semaphore, #tpu.memory_space<semaphore_mem>>
    tpu.wait_dma2 semaphore(%33 : memref<!tpu.dma_semaphore, #tpu.memory_space<semaphore_mem>>) src(%arg7 : memref<1024x896xbf16, #tpu.memory_space<any>>) dst(%arg11 : memref<1024x896xbf16, #tpu.memory_space<vmem>>)
    %c0_17 = arith.constant 0 : index
    %c0_18 = arith.constant 0 : index
    %34 = vector.load %arg11[%c0_17, %c0_18] : memref<1024x896xbf16, #tpu.memory_space<vmem>>, vector<1024x896xbf16>
    %cst_19 = arith.constant dense<0.000000e+00> : vector<2x896xf32>
    %35 = tpu.matmul %31, %34, %cst_19 {dimension_numbers = #tpu.dot_dimension_numbers<[1], [0], [0], [1], [0, 0, 1, 1], [], []>} : vector<2x1024xbf16>, vector<1024x896xbf16>, vector<2x896xf32> -> vector<2x896xf32>
    %c0_20 = arith.constant 0 : index
    %c0_21 = arith.constant 0 : index
    %36 = vector.load %arg8[%c0_20, %c0_21] : memref<1x896xf32, #tpu.memory_space<vmem>>, vector<1x896xf32>
    %37 = vector.broadcast %36 : vector<1x896xf32> to vector<2x896xf32>
    %38 = arith.addf %35, %37 : vector<2x896xf32>
    %39 = arith.negf %38 : vector<2x896xf32>
    %40 = math.exp %39 : vector<2x896xf32>
    %cst_22 = arith.constant 1.000000e+00 : f32
    %41 = vector.broadcast %cst_22 : f32 to vector<2x896xf32>
    %42 = arith.addf %41, %40 : vector<2x896xf32>
    %43 = arith.divf %41, %42 : vector<2x896xf32>
    %c0_23 = arith.constant 0 : index
    %c0_24 = arith.constant 0 : index
    %44 = vector.load %arg9[%c0_23, %c0_24] : memref<2x896xf32, #tpu.memory_space<vmem>>, vector<2x896xf32>
    tpu.vector_store %arg9[%c0_23, %c0_24], %43 {strides = array<i32>} : memref<2x896xf32, #tpu.memory_space<vmem>>, vector<2x896xf32>,
    return
  }
  func.func @transform_0(%arg0: i32) -> (i32, i32) {
    %c0_i32 = arith.constant 0 : i32
    %c0_i32_0 = arith.constant 0 : i32
    %c0_i32_1 = arith.constant 0 : i32
    return %c0_i32, %c0_i32_0 : i32, i32
  }
  func.func @transform_1(%arg0: i32) -> (i32, i32) {
    %c0_i32 = arith.constant 0 : i32
    %c0_i32_0 = arith.constant 0 : i32
    %c0_i32_1 = arith.constant 0 : i32
    return %c0_i32, %c0_i32_0 : i32, i32
  }
  func.func @transform_2(%arg0: i32) -> (i32, i32) {
    %c0_i32 = arith.constant 0 : i32
    %c0_i32_0 = arith.constant 0 : i32
    %c0_i32_1 = arith.constant 0 : i32
    return %c0_i32, %c0_i32_0 : i32, i32
  }
  func.func @transform_3(%arg0: i32) -> (i32, i32) {
    %c0_i32 = arith.constant 0 : i32
    %c0_i32_0 = arith.constant 0 : i32
    %c0_i32_1 = arith.constant 0 : i32
    return %c0_i32, %c0_i32_0 : i32, i32
  }
  func.func @transform_5(%arg0: i32) -> (i32, i32) {
    %c0_i32 = arith.constant 0 : i32
    %c0_i32_0 = arith.constant 0 : i32
    %c0_i32_1 = arith.constant 0 : i32
    return %c0_i32, %c0_i32_0 : i32, i32
  }
  func.func @transform_7(%arg0: i32) -> (i32, i32) {
    %c0_i32 = arith.constant 0 : i32
    %c0_i32_0 = arith.constant 0 : i32
    %c0_i32_1 = arith.constant 0 : i32
    return %c0_i32, %c0_i32_0 : i32, i32
  }
  func.func @transform_8(%arg0: i32) -> (i32, i32) {
    %c0_i32 = arith.constant 0 : i32
    %c0_i32_0 = arith.constant 0 : i32
    %c0_i32_1 = arith.constant 0 : i32
    return %c0_i32, %c0_i32_0 : i32, i32
  }
}

</mosaic_0001>

<bundles_post_ra>
// kernel: reconstruction_net.1
= control target key start
LH: loop header
LB: loop body
LE: loop exit
PB: predicated region body
PF: predicated region fallthrough
CT: control target
= control target key end

     0   :  { %13 = vsyncpa [#allocation6], 0  ;;  %s3175_s0 = inlined_call_operand.vmem [shape: s32[2,1], index: 0, kind: input, shape index: {}]   ;;  %s3176_s1 = inlined_call_operand.vmem [shape: f32[2,160], index: 1, kind: input, shape index: {}]   ;;  %s3177_s2 = inlined_call_operand.hbm [shape: bf16[160,512], index: 2, kind: input, shape index: {}]   ;;  %s3178_s3 = inlined_call_operand.hbm [shape: f32[1,512], index: 3, kind: input, shape index: {}]   ;;  %s3179_s4 = inlined_call_operand.hbm [shape: bf16[512,1024], index: 4, kind: input, shape index: {}]   ;;  %s3180_s5 = inlined_call_operand.hbm [shape: f32[1,1024], index: 5, kind: input, shape index: {}]   ;;  %s3181_s6 = inlined_call_operand.hbm [shape: bf16[1024,896], index: 6, kind: input, shape index: {}]   ;;  %s3182_s7 = inlined_call_operand.hbm [shape: f32[1,896], index: 7, kind: input, shape index: {}]   ;;  %s3183_s8 = inlined_call_operand.hbm [shape: f32[2,896], index: 8, kind: output, shape index: {}]  }
   0x1   :  { %14 = vsyncpa [#allocation9], 0 }
   0x2   :  { %15 = vsyncpa [#allocation12], 0 }
   0x3   :  { %16 = vsyncpa [#allocation7], 0  ;;  %s2882_s27 = smov [#allocation8]   ;;  %s2883_s29 = smov [#allocation5]  }
   0x4   :  { %s39_s28 = sshll.u32 %s2882_s27, 4  ;;  %s26_s30 = sshll.u32 %s2883_s29, 4  ;;  %s40_s28 = int_to_ptr.vmem [resolvable:$true] %s39_s28  ;;  %s2952_s30 = int_to_ptr.vmem [resolvable:$true] %s26_s30 }
   0x5   :  { %s2760_s11 = scalar_lea.hbm %s3178_s3, 64 }
   0x6   :  { %p2761_p0 = scmp.ne.s32.totalorder %s3178_s3, %s2760_s11  ;;  %p2764_p1 = scmp.lt.u32.totalorder %s2760_s11, %s3178_s3 }
   0x8   :  { %p2766_p2 = pnand %p2764_p1, %p2761_p0 }
   0xa   :  { %2769 = shalt.err (!%p2766_p2)
}
   0xb   :  { %s2770_s16 = scalar_lea.vmem %s40_s28, 64  ;;  %p2775_p4 = scmp.lt.s32.totalorder %s40_s28, %s40_s28 }
   0xc   :  { %p2771_p3 = scmp.ne.s32.totalorder %s40_s28, %s2770_s16  ;;  %p2776_p5 = scmp.lt.s32.totalorder %s2770_s16, %s2770_s16 }
   0xe   :  { %p2777_p6 = por %p2776_p5, %p2775_p4 }
  0x10   :  { %p2778_p7 = pnand %p2777_p6, %p2771_p3 }
  0x12   :  { %2781 = shalt.err (!%p2778_p7)
}
  0x13   :  { %42 = dma.hbm_to_vmem [thread:$0]  %s3178_s3, 64, %s40_s28, [#allocation9]  }
  0x14   :  { %s2782_s21 = scalar_lea.hbm %s3177_s2, 5120 }
  0x15   :  { %p2783_p8 = scmp.ne.s32.totalorder %s3177_s2, %s2782_s21  ;;  %p2786_p9 = scmp.lt.u32.totalorder %s2782_s21, %s3177_s2 }
  0x17   :  { %p2788_p10 = pnand %p2786_p9, %p2783_p8 }
  0x19   :  { %2791 = shalt.err (!%p2788_p10)
}
  0x1a   :  { %s2792_s26 = scalar_lea.vmem %s2952_s30, 5120  ;;  %p2797_p12 = scmp.lt.s32.totalorder %s2952_s30, %s2952_s30 }
  0x1b   :  { %p2793_p11 = scmp.ne.s32.totalorder %s2952_s30, %s2792_s26  ;;  %p2798_p13 = scmp.lt.s32.totalorder %s2792_s26, %s2792_s26 }
  0x1d   :  { %p2799_p0 = por %p2798_p13, %p2797_p12 }
  0x1f   :  { %p2800_p1 = pnand %p2799_p0, %p2793_p11 }
  0x21   :  { %2803 = shalt.err (!%p2800_p1)
}
  0x22   :  { %s2884_s3 = smov 256   ;;  %s2885_s27 = smov 16  }
  0x23   :  { %32 = dma.hbm_to_vmem [thread:$0]  %s3177_s2, 5120, %s2952_s30, [#allocation6], %s2884_s3, %s2884_s3, %s2885_s27  }
  0x24   :  { %s2886_s9 = smov [#allocation10]   ;;  %s2887_s11 = smov [#allocation11]  }
  0x25   :  { %s49_s10 = sshll.u32 %s2886_s9, 4  ;;  %s59_s12 = sshll.u32 %s2887_s11, 4  ;;  %s50_s10 = int_to_ptr.vmem [resolvable:$true] %s49_s10  ;;  %s60_s12 = int_to_ptr.vmem [resolvable:$true] %s59_s12 }
  0x26   :  { %s2804_s15 = scalar_lea.hbm %s3180_s5, 128 }
  0x27   :  { %p2805_p2 = scmp.ne.s32.totalorder %s3180_s5, %s2804_s15  ;;  %p2808_p3 = scmp.lt.u32.totalorder %s2804_s15, %s3180_s5 }
  0x29   :  { %p2810_p4 = pnand %p2808_p3, %p2805_p2 }
  0x2b   :  { %2813 = shalt.err (!%p2810_p4)
}
  0x2c   :  { %s2814_s2 = scalar_lea.vmem %s50_s10, 128  ;;  %p2819_p6 = scmp.lt.s32.totalorder %s50_s10, %s50_s10 }
  0x2d   :  { %p2815_p5 = scmp.ne.s32.totalorder %s50_s10, %s2814_s2  ;;  %p2820_p7 = scmp.lt.s32.totalorder %s2814_s2, %s2814_s2 }
  0x2f   :  { %p2821_p8 = por %p2820_p7, %p2819_p6 }
  0x31   :  { %p2822_p9 = pnand %p2821_p8, %p2815_p5 }
  0x33   :  { %2825 = shalt.err (!%p2822_p9)
}
  0x34   :  { %52 = dma.hbm_to_vmem [thread:$0]  %s3180_s5, 128, %s50_s10, [#allocation9]  }
  0x35   :  { %s2826_s23 = scalar_lea.hbm %s3182_s7, 112 }
  0x36   :  { %p2827_p10 = scmp.ne.s32.totalorder %s3182_s7, %s2826_s23  ;;  %p2830_p11 = scmp.lt.u32.totalorder %s2826_s23, %s3182_s7 }
  0x38   :  { %p2832_p12 = pnand %p2830_p11, %p2827_p10 }
  0x3a   :  { %2835 = shalt.err (!%p2832_p12)
}
  0x3b   :  { %s2836_s27 = scalar_lea.vmem %s60_s12, 112  ;;  %s2840_s28 = scalar_lea.vmem %s60_s12, 128 }
  0x3c   :  { %p2837_p13 = scmp.ne.s32.totalorder %s60_s12, %s2836_s27  ;;  %p2841_p0 = scmp.lt.s32.totalorder %s60_s12, %s60_s12 }
  0x3d   :  { %p2842_p1 = scmp.lt.s32.totalorder %s2840_s28, %s2836_s27 }
  0x3f   :  { %p2843_p2 = por %p2842_p1, %p2841_p0 }
  0x41   :  { %p2844_p3 = pnand %p2843_p2, %p2837_p13 }
  0x43   :  { %2847 = shalt.err (!%p2844_p3)
}
  0x44   :  { %62 = dma.hbm_to_vmem [thread:$0]  %s3182_s7, 112, %s60_s12, [#allocation12]  }
  0x45   :  { %2870 = dma.done.wait [#allocation6], 5120  }
  0x46   :  { %2871 = vsyncadd [#allocation6], 4294962176 }
  0x47   :  { %2872 = dma.done.wait [#allocation9], 192  }
  0x48   :  { %2873 = vsyncadd [#allocation9], 4294967104 }
  0x49   :  { %2874 = dma.done.wait [#allocation12], 112  }
  0x4a   :  { %2875 = vsyncadd [#allocation12], 4294967184  ;;  %s80_s9 = sld [smem:[#allocation0]]   ;;  %s2888_s10 = smov 1024   ;;  %v2889_v0 = vmov 0   ;;  %v147_v42 = vlaneseq  ;;  %vm435_vm2 = vcmask 261120  }
  0x4b   :  { %92 = sst [smem:[#allocation15]] %s2888_s10  ;;  %2671 = vset.pattern.permute.xlu0 %v2889_v0  ;;  %s2890_s11 = smov 8  }
  0x4c   :  { %94 = sst [smem:[#allocation15 + $0x1]] %s2888_s10  ;;  %s2891_s13 = smov 512   ;;  %v148_v43 = vand.u32 127, %v147_v42  ;;  %v3023_v53 = vshrl.u32 %v147_v42, 7 }
  0x4d   :  { %96 = sst [smem:[#allocation15 + $0x2]] %s2890_s11  ;;  %s2892_s14 = smov [#allocation2]  }
  0x4e   :  { %104 = sst [smem:[#allocation15 + $0x6]] %s2891_s13  ;;  %s88_s15 = sshll.u32 %s2892_s14, 4  ;;  %v149_v44 = vadd.s32 128, %v148_v43  ;;  %v150_v47 = vshra.s32 %v148_v43, 4  ;;  %v3026_v54 = vsub.s32 0, %v3023_v53  ;;  %v3029_v55 = vsub.s32 2, %v3023_v53  ;;  %s89_s15 = int_to_ptr.vmem [resolvable:$true] %s88_s15 }
  0x4f   :  { %s2893_s7 = smov 64   ;;  %s2894_s16 = smov 128   ;;  %v3032_v57 = vsub.s32 1, %v3023_v53  ;;  %v3035_v58 = vsub.s32 3, %v3023_v53 }
  0x50   :  { %98 = sst [smem:[#allocation15 + $0x3]] %s2893_s7  ;;  %s2432_s12 = sshll.u32 %s80_s9, 26  ;;  %v151_v46 = vshra.s32 %v149_v44, 4 }
  0x51   :  { %100 = sst [smem:[#allocation15 + $0x4]] %s2894_s16  ;;  %s3007_s17 = sadd.s32 134217728, %s2432_s12 }
  0x52   :  { %s2895_s18 = smov 2   ;;  %106 = sst [smem:[#allocation15 + $0x7]] %s2893_s7 }
  0x53   :  { %102 = sst [smem:[#allocation15 + $0x5]] %s2895_s18  ;;  %s2896_s19 = smov 4  }
  0x54   :  { %108 = sst [smem:[#allocation15 + $0x8]] %s2896_s19  ;;  %s2897_s2 = smov [#allocation4]  }
  0x55   :  { %s2898_s30 = smov [#allocation14]   ;;  %s2899_s22 = smov 896  }
  0x56   :  { %110 = dma.general %s3179_s4, 32768, %s89_s15, %s2897_s2, %s2898_s30, [#allocation15], %s3007_s17, 0  }
  0x57   :  { %127 = sst [smem:[#allocation17]] %s2899_s22  ;;  %s2900_s23 = smov 7  }
  0x58   :  { %129 = sst [smem:[#allocation17 + $0x1]] %s2899_s22  ;;  %s2901_s24 = smov [#allocation3]  }
  0x59   :  { %131 = sst [smem:[#allocation17 + $0x2]] %s2900_s23  ;;  %s123_s25 = sshll.u32 %s2901_s24, 4  ;;  %s124_s25 = int_to_ptr.vmem [resolvable:$true] %s123_s25 }
  0x5a   :  { %133 = sst [smem:[#allocation17 + $0x3]] %s2893_s7  ;;  %s2902_s26 = smov 448  }
  0x5b   :  { %135 = sst [smem:[#allocation17 + $0x4]] %s2894_s16  ;;  %s2903_s3 = smov [#allocation4 + $0x1]  }
  0x5c   :  { %137 = sst [smem:[#allocation17 + $0x5]] %s2895_s18  ;;  %s2904_s27 = smov [#allocation16]  }
  0x5d   :  { %139 = sst [smem:[#allocation17 + $0x6]] %s2902_s26 }
  0x5e   :  { %141 = sst [smem:[#allocation17 + $0x7]] %s2893_s7 }
  0x5f   :  { %143 = sst [smem:[#allocation17 + $0x8]] %s2896_s19 }
  0x60   :  { %145 = dma.general %s3181_s6, 57344, %s124_s25, %s2903_s3, %s2904_s27, [#allocation17], %s3007_s17, 0  }
  0x61   :  { %v152_v1 = vld [vmem:[%s3175_s0] sm:$0x3]  ;;  %v2672_v2 = vld [vmem:[#allocation5 + $0x4] ss:$16 sps:$4 sm:$0xff]   ;;  %v2674_v3 = vld [vmem:[#allocation5 + $0xc] ss:$16 sps:$4 sm:$0xff]  }
  0x62   :  { %154 = vperm.xlu0 %2671, %v152_v1   ;;  %v2676_v4 = vld [vmem:[#allocation5] ss:$16 sps:$4 sm:$0xff]   ;;  %v2677_v5 = vld [vmem:[#allocation5 + $0x8] ss:$16 sps:$4 sm:$0xff]   ;;  %439 = vmatprep.subr.bf16.mxu0 %v2672_v2  ;;  %v2678_v6 = vld [vmem:[#allocation5 + $0x24] ss:$16 sps:$4 sm:$0xff]  }
  0x63   :  { %480 = vmatprep.subr.bf16.mxu1 %v2674_v3  ;;  %440 = vmatpush1.bf16.msra.mxu0 %v2676_v4  ;;  %v2680_v7 = vld [vmem:[#allocation5 + $0x2c] ss:$16 sps:$4 sm:$0xff]   ;;  %v2682_v8 = vld [vmem:[#allocation5 + $0x20] ss:$16 sps:$4 sm:$0xff]   ;;  %v2683_v9 = vld [vmem:[#allocation5 + $0x28] ss:$16 sps:$4 sm:$0xff]  }
  0x64   :  { %481 = vmatpush1.bf16.msra.mxu1 %v2677_v5  ;;  %441 = vmatprep.subr.bf16.mxu0 %v2678_v6  ;;  %v2684_v10 = vld [vmem:[#allocation5 + $0x44] ss:$16 sps:$4 sm:$0xff]   ;;  %v2686_v11 = vld [vmem:[#allocation5 + $0x4c] ss:$16 sps:$4 sm:$0xff]   ;;  %v2688_v12 = vld [vmem:[#allocation5 + $0x40] ss:$16 sps:$4 sm:$0xff]  }
  0x65   :  { %482 = vmatprep.subr.bf16.mxu1 %v2680_v7  ;;  %v2689_v13 = vld [vmem:[#allocation5 + $0x48] ss:$16 sps:$4 sm:$0xff]   ;;  %v2690_v14 = vld [vmem:[#allocation5 + $0x64] ss:$16 sps:$4 sm:$0xff]   ;;  %v2692_v15 = vld [vmem:[#allocation5 + $0x6c] ss:$16 sps:$4 sm:$0xff]  }
  0x66   :  { %v2694_v16 = vld [vmem:[#allocation5 + $0x60] ss:$16 sps:$4 sm:$0xff]   ;;  %v2695_v17 = vld [vmem:[#allocation5 + $0x68] ss:$16 sps:$4 sm:$0xff]   ;;  %v2696_v18 = vld [vmem:[#allocation5 + $0x84] ss:$16 sps:$4 sm:$0xff]  }
  0x67   :  { %442 = vmatpush1.bf16.msra.mxu0 %v2682_v8  ;;  %v2698_v19 = vld [vmem:[#allocation5 + $0x8c] ss:$16 sps:$4 sm:$0xff]   ;;  %v2700_v20 = vld [vmem:[#allocation5 + $0x80] ss:$16 sps:$4 sm:$0xff]   ;;  %v2701_v21 = vld [vmem:[#allocation5 + $0x88] ss:$16 sps:$4 sm:$0xff]  }
  0x68   :  { %483 = vmatpush1.bf16.msra.mxu1 %v2683_v9  ;;  %443 = vmatprep.subr.bf16.mxu0 %v2684_v10  ;;  %v2702_v22 = vld [vmem:[#allocation5 + $0xa4] ss:$16 sps:$4 sm:$0xff]   ;;  %v2704_v23 = vld [vmem:[#allocation5 + $0xac] ss:$16 sps:$4 sm:$0xff]   ;;  %v2706_v24 = vld [vmem:[#allocation5 + $0xa0] ss:$16 sps:$4 sm:$0xff]  }
  0x69   :  { %484 = vmatprep.subr.bf16.mxu1 %v2686_v11  ;;  %v2707_v25 = vld [vmem:[#allocation5 + $0xa8] ss:$16 sps:$4 sm:$0xff]   ;;  %v2708_v26 = vld [vmem:[#allocation5 + $0xc4] ss:$16 sps:$4 sm:$0xff]   ;;  %v2710_v27 = vld [vmem:[#allocation5 + $0xcc] ss:$16 sps:$4 sm:$0xff]  }
  0x6a   :  { %v2712_v28 = vld [vmem:[#allocation5 + $0xc0] ss:$16 sps:$4 sm:$0xff]   ;;  %v2713_v29 = vld [vmem:[#allocation5 + $0xc8] ss:$16 sps:$4 sm:$0xff]   ;;  %v2714_v30 = vld [vmem:[#allocation5 + $0xe4] ss:$16 sps:$4 sm:$0xff]  }
  0x6b   :  { %444 = vmatpush1.bf16.msra.mxu0 %v2688_v12  ;;  %v2716_v31 = vld [vmem:[#allocation5 + $0xec] ss:$16 sps:$4 sm:$0xff]   ;;  %v2718_v32 = vld [vmem:[#allocation5 + $0xe0] ss:$16 sps:$4 sm:$0xff]   ;;  %v2719_v33 = vld [vmem:[#allocation5 + $0xe8] ss:$16 sps:$4 sm:$0xff]  }
  0x6c   :  { %485 = vmatpush1.bf16.msra.mxu1 %v2689_v13  ;;  %445 = vmatprep.subr.bf16.mxu0 %v2690_v14  ;;  %v2720_v34 = vld [vmem:[#allocation5 + $0x104] ss:$16 sps:$4 sm:$0xff]   ;;  %v2722_v35 = vld [vmem:[#allocation5 + $0x10c] ss:$16 sps:$4 sm:$0xff]   ;;  %v2724_v36 = vld [vmem:[#allocation5 + $0x100] ss:$16 sps:$4 sm:$0xff]  }
  0x6d   :  { %486 = vmatprep.subr.bf16.mxu1 %v2692_v15  ;;  %v2725_v37 = vld [vmem:[#allocation5 + $0x108] ss:$16 sps:$4 sm:$0xff]   ;;  %v2726_v38 = vld [vmem:[#allocation5 + $0x124] ss:$16 sps:$4 sm:$0xff]   ;;  %v2728_v39 = vld [vmem:[#allocation5 + $0x12c] ss:$16 sps:$4 sm:$0xff]  }
  0x6e   :  { %v2730_v40 = vld [vmem:[#allocation5 + $0x120] ss:$16 sps:$4 sm:$0xff]   ;;  %v2731_v41 = vld [vmem:[#allocation5 + $0x128] ss:$16 sps:$4 sm:$0xff]  }
  0x6f   :  { %446 = vmatpush1.bf16.msra.mxu0 %v2694_v16  ;;  %v2436_v45 = vld.sshfl [vmem:[%s3176_s1] sm:$0x33 pattern:$0x76325410] }
  0x70   :  { %487 = vmatpush1.bf16.msra.mxu1 %v2695_v17  ;;  %447 = vmatprep.subr.bf16.mxu0 %v2696_v18  ;;  %v166_v48 = vcombine.high %v2436_v45, %v2436_v45  ;;  %v2479_v51 = vpack.c.bf16 %v2436_v45, %v2436_v45  ;;  %v213_v56 = vld [vmem:[#allocation8] sm:$0xf] }
  0x71   :  { %488 = vmatprep.subr.bf16.mxu1 %v2698_v19  ;;  %v218_v59 = vrot.slane %v213_v56, %v3026_v54  ;;  %v226_v60 = vrot.slane %v213_v56, %v3029_v55  ;;  %v222_v61 = vrot.slane %v213_v56, %v3032_v57  ;;  %v230_v62 = vrot.slane %v213_v56, %v3035_v58 }
  0x73   :  { %448 = vmatpush1.bf16.msra.mxu0 %v2700_v20 }
  0x74   :  { %489 = vmatpush1.bf16.msra.mxu1 %v2701_v21  ;;  %449 = vmatprep.subr.bf16.mxu0 %v2702_v22 }
  0x75   :  { %490 = vmatprep.subr.bf16.mxu1 %v2704_v23 }
  0x77   :  { %450 = vmatpush1.bf16.msra.mxu0 %v2706_v24 }
  0x78   :  { %491 = vmatpush1.bf16.msra.mxu1 %v2707_v25  ;;  %451 = vmatprep.subr.bf16.mxu0 %v2708_v26 }
  0x79   :  { %492 = vmatprep.subr.bf16.mxu1 %v2710_v27 }
  0x7b   :  { %452 = vmatpush1.bf16.msra.mxu0 %v2712_v28 }
  0x7c   :  { %493 = vmatpush1.bf16.msra.mxu1 %v2713_v29  ;;  %453 = vmatprep.subr.bf16.mxu0 %v2714_v30 }
  0x7d   :  { %494 = vmatprep.subr.bf16.mxu1 %v2716_v31 }
  0x7f   :  { %454 = vmatpush1.bf16.msra.mxu0 %v2718_v32 }
  0x80   :  { %495 = vmatpush1.bf16.msra.mxu1 %v2719_v33  ;;  %455 = vmatprep.subr.bf16.mxu0 %v2720_v34 }
  0x81   :  { %496 = vmatprep.subr.bf16.mxu1 %v2722_v35 }
  0x83   :  { %456 = vmatpush1.bf16.msra.mxu0 %v2724_v36 }
  0x84   :  { %497 = vmatpush1.bf16.msra.mxu1 %v2725_v37  ;;  %457 = vmatprep.subr.bf16.mxu0 %v2726_v38 }
  0x85   :  { %498 = vmatprep.subr.bf16.mxu1 %v2728_v39 }
  0x87   :  { %458 = vmatpush1.bf16.msra.mxu0 %v2730_v40 }
  0x88   :  { %499 = vmatpush1.bf16.msra.mxu1 %v2731_v41 }
  0xe1   :  { %v155_v49 = vpop.permute.xlu0 %154 }
  0xe2   :  { %vm157_vm0 = vcmp.eq.s32.totalorder %v151_v46, %v155_v49  ;;  %vm156_vm1 = vcmp.eq.s32.totalorder %v150_v47, %v155_v49 }
  0xe3   :  { %v170_v50 = vsel %vm157_vm0, %v166_v48, 0.0  ;;  %vm2478_vm3 = vmpackc.low %vm156_vm1, %vm156_vm1 }
  0xe4   :  { %v172_v52 = vpack.c.bf16 %v170_v50, %v170_v50 }
  0xe6   :  { %2477 = vmatprep.mubr.msk.bf16.mxu0 %vm435_vm2, %v172_v52  ;;  %2481 = vmatprep.mubr.msk.bf16.mxu1 %vm435_vm2, %v172_v52 }
  0xe7   :  { %2480 = vmatmul.mubr.msk.bf16.vlgmr.msra.gmra.mrb[0].mxu0 %vm2478_vm3, %v2479_v51  ;;  %2484 = vmatmul.mubr.msk.bf16.vlgmr.msra.gmra.mrb[0].mxu1 %vm2478_vm3, %v2479_v51 }
 0x1ba   :  { %v473_v63 = vpop.f32.mrb[0].mxu0  ;;  %v514_v0 = vpop.f32.mrb[0].mxu1 }
 0x1bb   :  { %v474_v1 = vadd.f32 %v473_v63, %v218_v59  ;;  %v515_v2 = vadd.f32 %v514_v0, %v226_v60  ;;  %v475_v3 = vpop.f32.mrb[1].mxu0  ;;  %v516_v4 = vpop.f32.mrb[1].mxu1 }
 0x1bc   :  { %v476_v5 = vadd.f32 %v475_v3, %v222_v61  ;;  %v517_v6 = vadd.f32 %v516_v4, %v230_v62  ;;  %v477_v7 = vpop.f32.mrb[2].mxu0  ;;  %v518_v8 = vpop.f32.mrb[2].mxu1 }
 0x1bd   :  { %v521_v9 = vmax.f32 %v474_v1, 0.0  ;;  %v523_v10 = vmax.f32 %v515_v2, 0.0  ;;  %v478_v11 = vpop.f32.mrb[3].mxu0  ;;  %v519_v12 = vpop.f32.mrb[3].mxu1 }
 0x1be   :  { %v522_v13 = vmax.f32 %v476_v5, 0.0  ;;  %v524_v14 = vmax.f32 %v517_v6, 0.0 }
 0x1bf   :  { %v3041_v15 = vpack.c.bf16 %v521_v9, %v521_v9  ;;  %v3043_v16 = vpack.c.bf16 %v523_v10, %v523_v10 }
 0x1c0   :  { %v3045_v17 = vpack.c.bf16 %v522_v13, %v522_v13  ;;  %v3047_v18 = vpack.c.bf16 %v524_v14, %v524_v14 }
 0x1c1   :  { %2876 = dma.done.wait [#allocation4], 32768 }
 0x1c2   :  { %2877 = vsyncadd [#allocation4], 4294934528  ;;  %863 = vmatprep.mubr.bf16.mxu1 %v3045_v17  ;;  %904 = vmatprep.mubr.bf16.mxu0 %v3047_v18  ;;  %v534_v19 = vld [vmem:[#allocation2 + $0x8] sm:$0xff]  ;;  %v533_v20 = vld [vmem:[#allocation2] sm:$0xff] }
 0x1c3   :  { %v662_v21 = vld [vmem:[#allocation2 + $0x408] sm:$0xff]  ;;  %831 = vmatprep.subr.bf16.mxu1 %v534_v19  ;;  %v661_v22 = vld [vmem:[#allocation2 + $0x400] sm:$0xff] }
 0x1c4   :  { %872 = vmatprep.subr.bf16.mxu0 %v662_v21  ;;  %v542_v23 = vld [vmem:[#allocation2 + $0x48] sm:$0xff]  ;;  %832 = vmatpush1.bf16.msra.mxu1 %v533_v20  ;;  %v541_v25 = vld [vmem:[#allocation2 + $0x40] sm:$0xff] }
 0x1c5   :  { %873 = vmatpush1.bf16.msra.mxu0 %v661_v22  ;;  %v670_v24 = vld [vmem:[#allocation2 + $0x448] sm:$0xff]  ;;  %833 = vmatprep.subr.bf16.mxu1 %v542_v23  ;;  %v669_v26 = vld [vmem:[#allocation2 + $0x440] sm:$0xff] }
 0x1c6   :  { %874 = vmatprep.subr.bf16.mxu0 %v670_v24  ;;  %v550_v27 = vld [vmem:[#allocation2 + $0x88] sm:$0xff]  ;;  %v549_v29 = vld [vmem:[#allocation2 + $0x80] sm:$0xff] }
 0x1c7   :  { %v678_v28 = vld [vmem:[#allocation2 + $0x488] sm:$0xff]  ;;  %v677_v30 = vld [vmem:[#allocation2 + $0x480] sm:$0xff] }
 0x1c8   :  { %834 = vmatpush1.bf16.msra.mxu1 %v541_v25  ;;  %v558_v31 = vld [vmem:[#allocation2 + $0xc8] sm:$0xff]  ;;  %v557_v33 = vld [vmem:[#allocation2 + $0xc0] sm:$0xff] }
 0x1c9   :  { %875 = vmatpush1.bf16.msra.mxu0 %v669_v26  ;;  %835 = vmatprep.subr.bf16.mxu1 %v550_v27  ;;  %v686_v32 = vld [vmem:[#allocation2 + $0x4c8] sm:$0xff]  ;;  %v685_v34 = vld [vmem:[#allocation2 + $0x4c0] sm:$0xff] }
 0x1ca   :  { %876 = vmatprep.subr.bf16.mxu0 %v678_v28  ;;  %v566_v35 = vld [vmem:[#allocation2 + $0x108] sm:$0xff]  ;;  %v565_v37 = vld [vmem:[#allocation2 + $0x100] sm:$0xff]  ;;  %v536_v28 = vld [vmem:[#allocation2 + $0x18] sm:$0xff] }
 0x1cb   :  { %v694_v36 = vld [vmem:[#allocation2 + $0x508] sm:$0xff]  ;;  %v693_v38 = vld [vmem:[#allocation2 + $0x500] sm:$0xff] }
 0x1cc   :  { %836 = vmatpush1.bf16.msra.mxu1 %v549_v29  ;;  %v574_v39 = vld [vmem:[#allocation2 + $0x148] sm:$0xff]  ;;  %v573_v41 = vld [vmem:[#allocation2 + $0x140] sm:$0xff] }
 0x1cd   :  { %877 = vmatpush1.bf16.msra.mxu0 %v677_v30  ;;  %837 = vmatprep.subr.bf16.mxu1 %v558_v31  ;;  %v702_v40 = vld [vmem:[#allocation2 + $0x548] sm:$0xff]  ;;  %v701_v42 = vld [vmem:[#allocation2 + $0x540] sm:$0xff]  ;;  %v535_v30 = vld [vmem:[#allocation2 + $0x10] sm:$0xff] }
 0x1ce   :  { %878 = vmatprep.subr.bf16.mxu0 %v686_v32  ;;  %v582_v43 = vld [vmem:[#allocation2 + $0x188] sm:$0xff]  ;;  %v581_v45 = vld [vmem:[#allocation2 + $0x180] sm:$0xff]  ;;  %v544_v32 = vld [vmem:[#allocation2 + $0x58] sm:$0xff] }
 0x1cf   :  { %v710_v44 = vld [vmem:[#allocation2 + $0x588] sm:$0xff]  ;;  %v709_v46 = vld [vmem:[#allocation2 + $0x580] sm:$0xff] }
 0x1d0   :  { %838 = vmatpush1.bf16.msra.mxu1 %v557_v33  ;;  %v590_v47 = vld [vmem:[#allocation2 + $0x1c8] sm:$0xff]  ;;  %v589_v49 = vld [vmem:[#allocation2 + $0x1c0] sm:$0xff] }
 0x1d1   :  { %879 = vmatpush1.bf16.msra.mxu0 %v685_v34  ;;  %839 = vmatprep.subr.bf16.mxu1 %v566_v35  ;;  %v718_v48 = vld [vmem:[#allocation2 + $0x5c8] sm:$0xff]  ;;  %v717_v50 = vld [vmem:[#allocation2 + $0x5c0] sm:$0xff]  ;;  %v543_v34 = vld [vmem:[#allocation2 + $0x50] sm:$0xff] }
 0x1d2   :  { %880 = vmatprep.subr.bf16.mxu0 %v694_v36  ;;  %v598_v51 = vld [vmem:[#allocation2 + $0x208] sm:$0xff]  ;;  %v597_v56 = vld [vmem:[#allocation2 + $0x200] sm:$0xff]  ;;  %v552_v36 = vld [vmem:[#allocation2 + $0x98] sm:$0xff] }
 0x1d3   :  { %v726_v52 = vld [vmem:[#allocation2 + $0x608] sm:$0xff]  ;;  %v725_v59 = vld [vmem:[#allocation2 + $0x600] sm:$0xff] }
 0x1d4   :  { %840 = vmatpush1.bf16.msra.mxu1 %v565_v37  ;;  %v606_v60 = vld [vmem:[#allocation2 + $0x248] sm:$0xff]  ;;  %v605_v62 = vld [vmem:[#allocation2 + $0x240] sm:$0xff] }
 0x1d5   :  { %881 = vmatpush1.bf16.msra.mxu0 %v693_v38  ;;  %841 = vmatprep.subr.bf16.mxu1 %v574_v39  ;;  %v734_v61 = vld [vmem:[#allocation2 + $0x648] sm:$0xff]  ;;  %v733_v63 = vld [vmem:[#allocation2 + $0x640] sm:$0xff]  ;;  %v551_v38 = vld [vmem:[#allocation2 + $0x90] sm:$0xff] }
 0x1d6   :  { %882 = vmatprep.subr.bf16.mxu0 %v702_v40  ;;  %v614_v0 = vld [vmem:[#allocation2 + $0x288] sm:$0xff]  ;;  %v613_v2 = vld [vmem:[#allocation2 + $0x280] sm:$0xff]  ;;  %v560_v40 = vld [vmem:[#allocation2 + $0xd8] sm:$0xff] }
 0x1d7   :  { %v742_v1 = vld [vmem:[#allocation2 + $0x688] sm:$0xff]  ;;  %v741_v3 = vld [vmem:[#allocation2 + $0x680] sm:$0xff] }
 0x1d8   :  { %842 = vmatpush1.bf16.msra.mxu1 %v573_v41  ;;  %v622_v4 = vld [vmem:[#allocation2 + $0x2c8] sm:$0xff]  ;;  %v621_v6 = vld [vmem:[#allocation2 + $0x2c0] sm:$0xff] }
 0x1d9   :  { %883 = vmatpush1.bf16.msra.mxu0 %v701_v42  ;;  %843 = vmatprep.subr.bf16.mxu1 %v582_v43  ;;  %v750_v5 = vld [vmem:[#allocation2 + $0x6c8] sm:$0xff]  ;;  %v749_v7 = vld [vmem:[#allocation2 + $0x6c0] sm:$0xff]  ;;  %v559_v42 = vld [vmem:[#allocation2 + $0xd0] sm:$0xff] }
 0x1da   :  { %884 = vmatprep.subr.bf16.mxu0 %v710_v44  ;;  %v630_v8 = vld [vmem:[#allocation2 + $0x308] sm:$0xff]  ;;  %v629_v10 = vld [vmem:[#allocation2 + $0x300] sm:$0xff]  ;;  %v568_v44 = vld [vmem:[#allocation2 + $0x118] sm:$0xff] }
 0x1db   :  { %v758_v9 = vld [vmem:[#allocation2 + $0x708] sm:$0xff]  ;;  %v757_v11 = vld [vmem:[#allocation2 + $0x700] sm:$0xff] }
 0x1dc   :  { %844 = vmatpush1.bf16.msra.mxu1 %v581_v45  ;;  %v638_v12 = vld [vmem:[#allocation2 + $0x348] sm:$0xff]  ;;  %v637_v14 = vld [vmem:[#allocation2 + $0x340] sm:$0xff] }
 0x1dd   :  { %885 = vmatpush1.bf16.msra.mxu0 %v709_v46  ;;  %845 = vmatprep.subr.bf16.mxu1 %v590_v47  ;;  %v766_v13 = vld [vmem:[#allocation2 + $0x748] sm:$0xff]  ;;  %v765_v19 = vld [vmem:[#allocation2 + $0x740] sm:$0xff]  ;;  %v567_v46 = vld [vmem:[#allocation2 + $0x110] sm:$0xff] }
 0x1de   :  { %886 = vmatprep.subr.bf16.mxu0 %v718_v48  ;;  %v646_v20 = vld [vmem:[#allocation2 + $0x388] sm:$0xff]  ;;  %v645_v22 = vld [vmem:[#allocation2 + $0x380] sm:$0xff]  ;;  %v576_v48 = vld [vmem:[#allocation2 + $0x158] sm:$0xff] }
 0x1df   :  { %v774_v21 = vld [vmem:[#allocation2 + $0x788] sm:$0xff]  ;;  %v773_v23 = vld [vmem:[#allocation2 + $0x780] sm:$0xff] }
 0x1e0   :  { %846 = vmatpush1.bf16.msra.mxu1 %v589_v49  ;;  %v654_v24 = vld [vmem:[#allocation2 + $0x3c8] sm:$0xff]  ;;  %v653_v26 = vld [vmem:[#allocation2 + $0x3c0] sm:$0xff] }
 0x1e1   :  { %887 = vmatpush1.bf16.msra.mxu0 %v717_v50  ;;  %847 = vmatprep.subr.bf16.mxu1 %v598_v51  ;;  %v782_v25 = vld [vmem:[#allocation2 + $0x7c8] sm:$0xff]  ;;  %v781_v27 = vld [vmem:[#allocation2 + $0x7c0] sm:$0xff]  ;;  %v575_v50 = vld [vmem:[#allocation2 + $0x150] sm:$0xff] }
 0x1e2   :  { %888 = vmatprep.subr.bf16.mxu0 %v726_v52  ;;  %v538_v29 = vld [vmem:[#allocation2 + $0x28] sm:$0xff]  ;;  %v537_v31 = vld [vmem:[#allocation2 + $0x20] sm:$0xff]  ;;  %v584_v52 = vld [vmem:[#allocation2 + $0x198] sm:$0xff] }
 0x1e3   :  { %v546_v33 = vld [vmem:[#allocation2 + $0x68] sm:$0xff]  ;;  %v545_v35 = vld [vmem:[#allocation2 + $0x60] sm:$0xff] }
 0x1e4   :  { %848 = vmatpush1.bf16.msra.mxu1 %v597_v56  ;;  %v554_v37 = vld [vmem:[#allocation2 + $0xa8] sm:$0xff]  ;;  %v553_v39 = vld [vmem:[#allocation2 + $0xa0] sm:$0xff] }
 0x1e5   :  { %889 = vmatpush1.bf16.msra.mxu0 %v725_v59  ;;  %849 = vmatprep.subr.bf16.mxu1 %v606_v60  ;;  %v562_v41 = vld [vmem:[#allocation2 + $0xe8] sm:$0xff]  ;;  %v561_v43 = vld [vmem:[#allocation2 + $0xe0] sm:$0xff]  ;;  %v583_v59 = vld [vmem:[#allocation2 + $0x190] sm:$0xff] }
 0x1e6   :  { %890 = vmatprep.subr.bf16.mxu0 %v734_v61  ;;  %v570_v45 = vld [vmem:[#allocation2 + $0x128] sm:$0xff]  ;;  %v569_v47 = vld [vmem:[#allocation2 + $0x120] sm:$0xff]  ;;  %v592_v61 = vld [vmem:[#allocation2 + $0x1d8] sm:$0xff] }
 0x1e7   :  { %v578_v49 = vld [vmem:[#allocation2 + $0x168] sm:$0xff]  ;;  %v577_v51 = vld [vmem:[#allocation2 + $0x160] sm:$0xff] }
 0x1e8   :  { %850 = vmatpush1.bf16.msra.mxu1 %v605_v62  ;;  %v586_v56 = vld [vmem:[#allocation2 + $0x1a8] sm:$0xff]  ;;  %v585_v60 = vld [vmem:[#allocation2 + $0x1a0] sm:$0xff] }
 0x1e9   :  { %891 = vmatpush1.bf16.msra.mxu0 %v733_v63  ;;  %851 = vmatprep.subr.bf16.mxu1 %v614_v0  ;;  %v594_v62 = vld [vmem:[#allocation2 + $0x1e8] sm:$0xff]  ;;  %v591_v63 = vld [vmem:[#allocation2 + $0x1d0] sm:$0xff]  ;;  %v593_v0 = vld [vmem:[#allocation2 + $0x1e0] sm:$0xff] }
 0x1ea   :  { %892 = vmatprep.subr.bf16.mxu0 %v742_v1  ;;  %v600_v1 = vld [vmem:[#allocation2 + $0x218] sm:$0xff] }
 0x1ec   :  { %852 = vmatpush1.bf16.msra.mxu1 %v613_v2  ;;  %v602_v2 = vld [vmem:[#allocation2 + $0x228] sm:$0xff] }
 0x1ed   :  { %893 = vmatpush1.bf16.msra.mxu0 %v741_v3  ;;  %853 = vmatprep.subr.bf16.mxu1 %v622_v4  ;;  %v599_v3 = vld [vmem:[#allocation2 + $0x210] sm:$0xff]  ;;  %v601_v4 = vld [vmem:[#allocation2 + $0x220] sm:$0xff] }
 0x1ee   :  { %894 = vmatprep.subr.bf16.mxu0 %v750_v5  ;;  %v608_v5 = vld [vmem:[#allocation2 + $0x258] sm:$0xff] }
 0x1f0   :  { %854 = vmatpush1.bf16.msra.mxu1 %v621_v6  ;;  %v610_v6 = vld [vmem:[#allocation2 + $0x268] sm:$0xff] }
 0x1f1   :  { %895 = vmatpush1.bf16.msra.mxu0 %v749_v7  ;;  %855 = vmatprep.subr.bf16.mxu1 %v630_v8  ;;  %v607_v7 = vld [vmem:[#allocation2 + $0x250] sm:$0xff]  ;;  %v609_v8 = vld [vmem:[#allocation2 + $0x260] sm:$0xff] }
 0x1f2   :  { %896 = vmatprep.subr.bf16.mxu0 %v758_v9  ;;  %v616_v9 = vld [vmem:[#allocation2 + $0x298] sm:$0xff] }
 0x1f4   :  { %856 = vmatpush1.bf16.msra.mxu1 %v629_v10  ;;  %v618_v10 = vld [vmem:[#allocation2 + $0x2a8] sm:$0xff] }
 0x1f5   :  { %897 = vmatpush1.bf16.msra.mxu0 %v757_v11  ;;  %857 = vmatprep.subr.bf16.mxu1 %v638_v12  ;;  %v615_v11 = vld [vmem:[#allocation2 + $0x290] sm:$0xff]  ;;  %v617_v12 = vld [vmem:[#allocation2 + $0x2a0] sm:$0xff] }
 0x1f6   :  { %898 = vmatprep.subr.bf16.mxu0 %v766_v13  ;;  %v624_v13 = vld [vmem:[#allocation2 + $0x2d8] sm:$0xff] }
 0x1f8   :  { %858 = vmatpush1.bf16.msra.mxu1 %v637_v14  ;;  %v626_v14 = vld [vmem:[#allocation2 + $0x2e8] sm:$0xff] }
 0x1f9   :  { %899 = vmatpush1.bf16.msra.mxu0 %v765_v19  ;;  %859 = vmatprep.subr.bf16.mxu1 %v646_v20  ;;  %v623_v19 = vld [vmem:[#allocation2 + $0x2d0] sm:$0xff]  ;;  %v625_v20 = vld [vmem:[#allocation2 + $0x2e0] sm:$0xff] }
 0x1fa   :  { %900 = vmatprep.subr.bf16.mxu0 %v774_v21  ;;  %v632_v21 = vld [vmem:[#allocation2 + $0x318] sm:$0xff] }
 0x1fc   :  { %860 = vmatpush1.bf16.msra.mxu1 %v645_v22  ;;  %v634_v22 = vld [vmem:[#allocation2 + $0x328] sm:$0xff] }
 0x1fd   :  { %901 = vmatpush1.bf16.msra.mxu0 %v773_v23  ;;  %861 = vmatprep.subr.bf16.mxu1 %v654_v24  ;;  %v631_v23 = vld [vmem:[#allocation2 + $0x310] sm:$0xff]  ;;  %v633_v24 = vld [vmem:[#allocation2 + $0x320] sm:$0xff] }
 0x1fe   :  { %902 = vmatprep.subr.bf16.mxu0 %v782_v25  ;;  %v640_v25 = vld [vmem:[#allocation2 + $0x358] sm:$0xff] }
 0x200   :  { %862 = vmatpush1.bf16.msra.mxu1 %v653_v26  ;;  %v642_v26 = vld [vmem:[#allocation2 + $0x368] sm:$0xff] }
 0x201   :  { %903 = vmatpush1.bf16.msra.mxu0 %v781_v27  ;;  %913 = vmatprep.subr.bf16.mxu1 %v536_v28  ;;  %v639_v27 = vld [vmem:[#allocation2 + $0x350] sm:$0xff]  ;;  %v641_v28 = vld [vmem:[#allocation2 + $0x360] sm:$0xff] }
 0x202   :  { %995 = vmatprep.subr.bf16.mxu0 %v538_v29  ;;  %v648_v29 = vld [vmem:[#allocation2 + $0x398] sm:$0xff] }
 0x203   :  { %864 = vmatmul.mubr.bf16.vlgmr.msra.gmra.mrb[4].mxu1 %v3041_v15 }
 0x204   :  { %905 = vmatmul.mubr.bf16.vlgmr.msra.gmra.mrb[4].mxu0 %v3043_v16  ;;  %914 = vmatpush1.bf16.msra.mxu1 %v535_v30  ;;  %v650_v30 = vld [vmem:[#allocation2 + $0x3a8] sm:$0xff] }
 0x205   :  { %996 = vmatpush1.bf16.msra.mxu0 %v537_v31  ;;  %915 = vmatprep.subr.bf16.mxu1 %v544_v32  ;;  %v647_v31 = vld [vmem:[#allocation2 + $0x390] sm:$0xff]  ;;  %v649_v32 = vld [vmem:[#allocation2 + $0x3a0] sm:$0xff] }
 0x206   :  { %945 = vmatprep.mubr.bf16.mxu1 %v3045_v17  ;;  %997 = vmatprep.subr.bf16.mxu0 %v546_v33  ;;  %v656_v33 = vld [vmem:[#allocation2 + $0x3d8] sm:$0xff] }
 0x207   :  { %1027 = vmatprep.mubr.bf16.mxu0 %v3045_v17 }
 0x208   :  { %916 = vmatpush1.bf16.msra.mxu1 %v543_v34  ;;  %v658_v34 = vld [vmem:[#allocation2 + $0x3e8] sm:$0xff] }
 0x209   :  { %998 = vmatpush1.bf16.msra.mxu0 %v545_v35  ;;  %917 = vmatprep.subr.bf16.mxu1 %v552_v36  ;;  %v655_v35 = vld [vmem:[#allocation2 + $0x3d0] sm:$0xff]  ;;  %v657_v36 = vld [vmem:[#allocation2 + $0x3e0] sm:$0xff] }
 0x20a   :  { %999 = vmatprep.subr.bf16.mxu0 %v554_v37  ;;  %v664_v37 = vld [vmem:[#allocation2 + $0x418] sm:$0xff] }
 0x20c   :  { %918 = vmatpush1.bf16.msra.mxu1 %v551_v38  ;;  %v666_v38 = vld [vmem:[#allocation2 + $0x428] sm:$0xff] }
 0x20d   :  { %1000 = vmatpush1.bf16.msra.mxu0 %v553_v39  ;;  %919 = vmatprep.subr.bf16.mxu1 %v560_v40  ;;  %v663_v39 = vld [vmem:[#allocation2 + $0x410] sm:$0xff]  ;;  %v672_v40 = vld [vmem:[#allocation2 + $0x458] sm:$0xff] }
 0x20e   :  { %1001 = vmatprep.subr.bf16.mxu0 %v562_v41  ;;  %v665_v41 = vld [vmem:[#allocation2 + $0x420] sm:$0xff] }
 0x210   :  { %920 = vmatpush1.bf16.msra.mxu1 %v559_v42  ;;  %v674_v42 = vld [vmem:[#allocation2 + $0x468] sm:$0xff] }
 0x211   :  { %1002 = vmatpush1.bf16.msra.mxu0 %v561_v43  ;;  %921 = vmatprep.subr.bf16.mxu1 %v568_v44  ;;  %v671_v43 = vld [vmem:[#allocation2 + $0x450] sm:$0xff]  ;;  %v680_v44 = vld [vmem:[#allocation2 + $0x498] sm:$0xff] }
 0x212   :  { %1003 = vmatprep.subr.bf16.mxu0 %v570_v45  ;;  %v673_v45 = vld [vmem:[#allocation2 + $0x460] sm:$0xff] }
 0x214   :  { %922 = vmatpush1.bf16.msra.mxu1 %v567_v46  ;;  %v682_v46 = vld [vmem:[#allocation2 + $0x4a8] sm:$0xff] }
 0x215   :  { %1004 = vmatpush1.bf16.msra.mxu0 %v569_v47  ;;  %923 = vmatprep.subr.bf16.mxu1 %v576_v48  ;;  %v679_v47 = vld [vmem:[#allocation2 + $0x490] sm:$0xff]  ;;  %v688_v48 = vld [vmem:[#allocation2 + $0x4d8] sm:$0xff] }
 0x216   :  { %1005 = vmatprep.subr.bf16.mxu0 %v578_v49  ;;  %v681_v49 = vld [vmem:[#allocation2 + $0x4a0] sm:$0xff] }
 0x218   :  { %924 = vmatpush1.bf16.msra.mxu1 %v575_v50  ;;  %v690_v50 = vld [vmem:[#allocation2 + $0x4e8] sm:$0xff] }
 0x219   :  { %1006 = vmatpush1.bf16.msra.mxu0 %v577_v51  ;;  %925 = vmatprep.subr.bf16.mxu1 %v584_v52  ;;  %v687_v51 = vld [vmem:[#allocation2 + $0x4d0] sm:$0xff]  ;;  %v696_v52 = vld [vmem:[#allocation2 + $0x518] sm:$0xff] }
 0x21a   :  { %1007 = vmatprep.subr.bf16.mxu0 %v586_v56  ;;  %v689_v56 = vld [vmem:[#allocation2 + $0x4e0] sm:$0xff] }
 0x21c   :  { %926 = vmatpush1.bf16.msra.mxu1 %v583_v59  ;;  %v698_v59 = vld [vmem:[#allocation2 + $0x528] sm:$0xff] }
 0x21d   :  { %1008 = vmatpush1.bf16.msra.mxu0 %v585_v60  ;;  %927 = vmatprep.subr.bf16.mxu1 %v592_v61  ;;  %v695_v60 = vld [vmem:[#allocation2 + $0x510] sm:$0xff]  ;;  %v704_v61 = vld [vmem:[#allocation2 + $0x558] sm:$0xff] }
 0x21e   :  { %1009 = vmatprep.subr.bf16.mxu0 %v594_v62  ;;  %v697_v62 = vld [vmem:[#allocation2 + $0x520] sm:$0xff] }
 0x220   :  { %928 = vmatpush1.bf16.msra.mxu1 %v591_v63  ;;  %v706_v63 = vld [vmem:[#allocation2 + $0x568] sm:$0xff] }
 0x221   :  { %1010 = vmatpush1.bf16.msra.mxu0 %v593_v0  ;;  %929 = vmatprep.subr.bf16.mxu1 %v600_v1  ;;  %v703_v0 = vld [vmem:[#allocation2 + $0x550] sm:$0xff]  ;;  %v712_v1 = vld [vmem:[#allocation2 + $0x598] sm:$0xff] }
 0x222   :  { %1011 = vmatprep.subr.bf16.mxu0 %v602_v2  ;;  %v705_v2 = vld [vmem:[#allocation2 + $0x560] sm:$0xff] }
 0x224   :  { %930 = vmatpush1.bf16.msra.mxu1 %v599_v3  ;;  %v714_v3 = vld [vmem:[#allocation2 + $0x5a8] sm:$0xff] }
 0x225   :  { %1012 = vmatpush1.bf16.msra.mxu0 %v601_v4  ;;  %931 = vmatprep.subr.bf16.mxu1 %v608_v5  ;;  %v711_v4 = vld [vmem:[#allocation2 + $0x590] sm:$0xff]  ;;  %v720_v5 = vld [vmem:[#allocation2 + $0x5d8] sm:$0xff] }
 0x226   :  { %1013 = vmatprep.subr.bf16.mxu0 %v610_v6  ;;  %v713_v6 = vld [vmem:[#allocation2 + $0x5a0] sm:$0xff] }
 0x228   :  { %932 = vmatpush1.bf16.msra.mxu1 %v607_v7  ;;  %v722_v7 = vld [vmem:[#allocation2 + $0x5e8] sm:$0xff] }
 0x229   :  { %1014 = vmatpush1.bf16.msra.mxu0 %v609_v8  ;;  %933 = vmatprep.subr.bf16.mxu1 %v616_v9  ;;  %v719_v8 = vld [vmem:[#allocation2 + $0x5d0] sm:$0xff]  ;;  %v728_v9 = vld [vmem:[#allocation2 + $0x618] sm:$0xff] }
 0x22a   :  { %1015 = vmatprep.subr.bf16.mxu0 %v618_v10  ;;  %v721_v10 = vld [vmem:[#allocation2 + $0x5e0] sm:$0xff] }
 0x22c   :  { %934 = vmatpush1.bf16.msra.mxu1 %v615_v11  ;;  %v730_v11 = vld [vmem:[#allocation2 + $0x628] sm:$0xff] }
 0x22d   :  { %1016 = vmatpush1.bf16.msra.mxu0 %v617_v12  ;;  %935 = vmatprep.subr.bf16.mxu1 %v624_v13  ;;  %v727_v12 = vld [vmem:[#allocation2 + $0x610] sm:$0xff]  ;;  %v736_v13 = vld [vmem:[#allocation2 + $0x658] sm:$0xff] }
 0x22e   :  { %1017 = vmatprep.subr.bf16.mxu0 %v626_v14  ;;  %v729_v14 = vld [vmem:[#allocation2 + $0x620] sm:$0xff] }
 0x230   :  { %936 = vmatpush1.bf16.msra.mxu1 %v623_v19  ;;  %v738_v19 = vld [vmem:[#allocation2 + $0x668] sm:$0xff] }
 0x231   :  { %1018 = vmatpush1.bf16.msra.mxu0 %v625_v20  ;;  %937 = vmatprep.subr.bf16.mxu1 %v632_v21  ;;  %v735_v20 = vld [vmem:[#allocation2 + $0x650] sm:$0xff]  ;;  %v744_v21 = vld [vmem:[#allocation2 + $0x698] sm:$0xff] }
 0x232   :  { %1019 = vmatprep.subr.bf16.mxu0 %v634_v22  ;;  %v737_v22 = vld [vmem:[#allocation2 + $0x660] sm:$0xff] }
 0x234   :  { %938 = vmatpush1.bf16.msra.mxu1 %v631_v23  ;;  %v746_v23 = vld [vmem:[#allocation2 + $0x6a8] sm:$0xff] }
 0x235   :  { %1020 = vmatpush1.bf16.msra.mxu0 %v633_v24  ;;  %939 = vmatprep.subr.bf16.mxu1 %v640_v25  ;;  %v743_v24 = vld [vmem:[#allocation2 + $0x690] sm:$0xff]  ;;  %v752_v25 = vld [vmem:[#allocation2 + $0x6d8] sm:$0xff] }
 0x236   :  { %1021 = vmatprep.subr.bf16.mxu0 %v642_v26  ;;  %v745_v26 = vld [vmem:[#allocation2 + $0x6a0] sm:$0xff] }
 0x238   :  { %940 = vmatpush1.bf16.msra.mxu1 %v639_v27  ;;  %v754_v27 = vld [vmem:[#allocation2 + $0x6e8] sm:$0xff] }
 0x239   :  { %1022 = vmatpush1.bf16.msra.mxu0 %v641_v28  ;;  %941 = vmatprep.subr.bf16.mxu1 %v648_v29  ;;  %v751_v28 = vld [vmem:[#allocation2 + $0x6d0] sm:$0xff]  ;;  %v760_v29 = vld [vmem:[#allocation2 + $0x718] sm:$0xff] }
 0x23a   :  { %1023 = vmatprep.subr.bf16.mxu0 %v650_v30  ;;  %v753_v30 = vld [vmem:[#allocation2 + $0x6e0] sm:$0xff] }
 0x23c   :  { %942 = vmatpush1.bf16.msra.mxu1 %v647_v31  ;;  %v762_v31 = vld [vmem:[#allocation2 + $0x728] sm:$0xff] }
 0x23d   :  { %1024 = vmatpush1.bf16.msra.mxu0 %v649_v32  ;;  %943 = vmatprep.subr.bf16.mxu1 %v656_v33  ;;  %v759_v32 = vld [vmem:[#allocation2 + $0x710] sm:$0xff]  ;;  %v768_v33 = vld [vmem:[#allocation2 + $0x758] sm:$0xff] }
 0x23e   :  { %1025 = vmatprep.subr.bf16.mxu0 %v658_v34  ;;  %v761_v34 = vld [vmem:[#allocation2 + $0x720] sm:$0xff] }
 0x240   :  { %944 = vmatpush1.bf16.msra.mxu1 %v655_v35  ;;  %v770_v35 = vld [vmem:[#allocation2 + $0x768] sm:$0xff] }
 0x241   :  { %1026 = vmatpush1.bf16.msra.mxu0 %v657_v36  ;;  %954 = vmatprep.subr.bf16.mxu1 %v664_v37  ;;  %v767_v36 = vld [vmem:[#allocation2 + $0x750] sm:$0xff]  ;;  %v776_v37 = vld [vmem:[#allocation2 + $0x798] sm:$0xff] }
 0x242   :  { %1036 = vmatprep.subr.bf16.mxu0 %v666_v38  ;;  %v769_v38 = vld [vmem:[#allocation2 + $0x760] sm:$0xff] }
 0x243   :  { %946 = vmatmul.mubr.bf16.vlgmr.msra.gmra.mrb[8].mxu1 %v3041_v15 }
 0x244   :  { %1028 = vmatmul.mubr.bf16.vlgmr.msra.gmra.mrb[8].mxu0 %v3041_v15  ;;  %955 = vmatpush1.bf16.msra.mxu1 %v663_v39  ;;  %v778_v39 = vld [vmem:[#allocation2 + $0x7a8] sm:$0xff] }
 0x245   :  { %986 = vmatprep.mubr.bf16.mxu1 %v3047_v18  ;;  %956 = vmatprep.subr.bf16.mxu1 %v672_v40  ;;  %v775_v40 = vld [vmem:[#allocation2 + $0x790] sm:$0xff] }
 0x246   :  { %1037 = vmatpush1.bf16.msra.mxu0 %v665_v41  ;;  %1068 = vmatprep.mubr.bf16.mxu0 %v3047_v18  ;;  %v784_v41 = vld [vmem:[#allocation2 + $0x7d8] sm:$0xff] }
 0x247   :  { %1038 = vmatprep.subr.bf16.mxu0 %v674_v42  ;;  %v777_v42 = vld [vmem:[#allocation2 + $0x7a0] sm:$0xff] }
 0x248   :  { %957 = vmatpush1.bf16.msra.mxu1 %v671_v43  ;;  %v786_v43 = vld [vmem:[#allocation2 + $0x7e8] sm:$0xff] }
 0x249   :  { %958 = vmatprep.subr.bf16.mxu1 %v680_v44  ;;  %v783_v44 = vld [vmem:[#allocation2 + $0x7d0] sm:$0xff] }
 0x24a   :  { %1039 = vmatpush1.bf16.msra.mxu0 %v673_v45  ;;  %v540_v45 = vld [vmem:[#allocation2 + $0x38] sm:$0xff] }
 0x24b   :  { %1040 = vmatprep.subr.bf16.mxu0 %v682_v46  ;;  %v785_v46 = vld [vmem:[#allocation2 + $0x7e0] sm:$0xff] }
 0x24c   :  { %959 = vmatpush1.bf16.msra.mxu1 %v679_v47  ;;  %v539_v47 = vld [vmem:[#allocation2 + $0x30] sm:$0xff] }
 0x24d   :  { %960 = vmatprep.subr.bf16.mxu1 %v688_v48  ;;  %v548_v48 = vld [vmem:[#allocation2 + $0x78] sm:$0xff] }
 0x24e   :  { %1041 = vmatpush1.bf16.msra.mxu0 %v681_v49  ;;  %v547_v49 = vld [vmem:[#allocation2 + $0x70] sm:$0xff] }
 0x24f   :  { %1042 = vmatprep.subr.bf16.mxu0 %v690_v50  ;;  %v556_v50 = vld [vmem:[#allocation2 + $0xb8] sm:$0xff] }
 0x250   :  { %961 = vmatpush1.bf16.msra.mxu1 %v687_v51  ;;  %v555_v51 = vld [vmem:[#allocation2 + $0xb0] sm:$0xff] }
 0x251   :  { %962 = vmatprep.subr.bf16.mxu1 %v696_v52  ;;  %v564_v52 = vld [vmem:[#allocation2 + $0xf8] sm:$0xff] }
 0x252   :  { %1043 = vmatpush1.bf16.msra.mxu0 %v689_v56  ;;  %v563_v56 = vld [vmem:[#allocation2 + $0xf0] sm:$0xff] }
 0x253   :  { %1044 = vmatprep.subr.bf16.mxu0 %v698_v59  ;;  %v572_v59 = vld [vmem:[#allocation2 + $0x138] sm:$0xff] }
 0x254   :  { %963 = vmatpush1.bf16.msra.mxu1 %v695_v60  ;;  %v571_v60 = vld [vmem:[#allocation2 + $0x130] sm:$0xff] }
 0x255   :  { %964 = vmatprep.subr.bf16.mxu1 %v704_v61  ;;  %v580_v61 = vld [vmem:[#allocation2 + $0x178] sm:$0xff] }
 0x256   :  { %1045 = vmatpush1.bf16.msra.mxu0 %v697_v62  ;;  %v579_v62 = vld [vmem:[#allocation2 + $0x170] sm:$0xff] }
 0x257   :  { %1046 = vmatprep.subr.bf16.mxu0 %v706_v63  ;;  %v588_v63 = vld [vmem:[#allocation2 + $0x1b8] sm:$0xff] }
 0x258   :  { %965 = vmatpush1.bf16.msra.mxu1 %v703_v0  ;;  %v596_v0 = vld [vmem:[#allocation2 + $0x1f8] sm:$0xff] }
 0x259   :  { %966 = vmatprep.subr.bf16.mxu1 %v712_v1  ;;  %v595_v1 = vld [vmem:[#allocation2 + $0x1f0] sm:$0xff] }
 0x25a   :  { %1047 = vmatpush1.bf16.msra.mxu0 %v705_v2  ;;  %v604_v2 = vld [vmem:[#allocation2 + $0x238] sm:$0xff] }
 0x25b   :  { %1048 = vmatprep.subr.bf16.mxu0 %v714_v3  ;;  %v603_v3 = vld [vmem:[#allocation2 + $0x230] sm:$0xff] }
 0x25c   :  { %967 = vmatpush1.bf16.msra.mxu1 %v711_v4  ;;  %v612_v4 = vld [vmem:[#allocation2 + $0x278] sm:$0xff] }
 0x25d   :  { %968 = vmatprep.subr.bf16.mxu1 %v720_v5  ;;  %v611_v5 = vld [vmem:[#allocation2 + $0x270] sm:$0xff] }
 0x25e   :  { %1049 = vmatpush1.bf16.msra.mxu0 %v713_v6  ;;  %v620_v6 = vld [vmem:[#allocation2 + $0x2b8] sm:$0xff] }
 0x25f   :  { %1050 = vmatprep.subr.bf16.mxu0 %v722_v7  ;;  %v619_v7 = vld [vmem:[#allocation2 + $0x2b0] sm:$0xff] }
 0x260   :  { %969 = vmatpush1.bf16.msra.mxu1 %v719_v8  ;;  %v628_v8 = vld [vmem:[#allocation2 + $0x2f8] sm:$0xff] }
 0x261   :  { %970 = vmatprep.subr.bf16.mxu1 %v728_v9  ;;  %v627_v9 = vld [vmem:[#allocation2 + $0x2f0] sm:$0xff] }
 0x262   :  { %1051 = vmatpush1.bf16.msra.mxu0 %v721_v10  ;;  %v636_v10 = vld [vmem:[#allocation2 + $0x338] sm:$0xff] }
 0x263   :  { %1052 = vmatprep.subr.bf16.mxu0 %v730_v11  ;;  %v635_v11 = vld [vmem:[#allocation2 + $0x330] sm:$0xff] }
 0x264   :  { %971 = vmatpush1.bf16.msra.mxu1 %v727_v12  ;;  %v644_v12 = vld [vmem:[#allocation2 + $0x378] sm:$0xff] }
 0x265   :  { %972 = vmatprep.subr.bf16.mxu1 %v736_v13  ;;  %v643_v13 = vld [vmem:[#allocation2 + $0x370] sm:$0xff] }
 0x266   :  { %1053 = vmatpush1.bf16.msra.mxu0 %v729_v14  ;;  %v652_v14 = vld [vmem:[#allocation2 + $0x3b8] sm:$0xff] }
 0x267   :  { %1054 = vmatprep.subr.bf16.mxu0 %v738_v19  ;;  %v651_v19 = vld [vmem:[#allocation2 + $0x3b0] sm:$0xff] }
 0x268   :  { %973 = vmatpush1.bf16.msra.mxu1 %v735_v20  ;;  %v660_v20 = vld [vmem:[#allocation2 + $0x3f8] sm:$0xff] }
 0x269   :  { %974 = vmatprep.subr.bf16.mxu1 %v744_v21  ;;  %v659_v21 = vld [vmem:[#allocation2 + $0x3f0] sm:$0xff] }
 0x26a   :  { %1055 = vmatpush1.bf16.msra.mxu0 %v737_v22  ;;  %v668_v22 = vld [vmem:[#allocation2 + $0x438] sm:$0xff] }
 0x26b   :  { %1056 = vmatprep.subr.bf16.mxu0 %v746_v23  ;;  %v667_v23 = vld [vmem:[#allocation2 + $0x430] sm:$0xff] }
 0x26c   :  { %975 = vmatpush1.bf16.msra.mxu1 %v743_v24  ;;  %v676_v24 = vld [vmem:[#allocation2 + $0x478] sm:$0xff] }
 0x26d   :  { %976 = vmatprep.subr.bf16.mxu1 %v752_v25  ;;  %v675_v25 = vld [vmem:[#allocation2 + $0x470] sm:$0xff] }
 0x26e   :  { %1057 = vmatpush1.bf16.msra.mxu0 %v745_v26  ;;  %v684_v26 = vld [vmem:[#allocation2 + $0x4b8] sm:$0xff] }
 0x26f   :  { %1058 = vmatprep.subr.bf16.mxu0 %v754_v27  ;;  %v683_v27 = vld [vmem:[#allocation2 + $0x4b0] sm:$0xff] }
 0x270   :  { %977 = vmatpush1.bf16.msra.mxu1 %v751_v28  ;;  %v692_v28 = vld [vmem:[#allocation2 + $0x4f8] sm:$0xff] }
 0x271   :  { %978 = vmatprep.subr.bf16.mxu1 %v760_v29  ;;  %v691_v29 = vld [vmem:[#allocation2 + $0x4f0] sm:$0xff] }
 0x272   :  { %1059 = vmatpush1.bf16.msra.mxu0 %v753_v30  ;;  %v700_v30 = vld [vmem:[#allocation2 + $0x538] sm:$0xff] }
 0x273   :  { %1060 = vmatprep.subr.bf16.mxu0 %v762_v31  ;;  %v3064_v31 = vld [vmem:[#allocation10] sm:$0xff] }
 0x274   :  { %979 = vmatpush1.bf16.msra.mxu1 %v759_v32  ;;  %v699_v32 = vld [vmem:[#allocation2 + $0x530] sm:$0xff] }
 0x275   :  { %980 = vmatprep.subr.bf16.mxu1 %v768_v33  ;;  %v798_v33 = vrot.slane %v3064_v31, %v3032_v57 }
 0x276   :  { %1061 = vmatpush1.bf16.msra.mxu0 %v761_v34  ;;  %v707_v34 = vld [vmem:[#allocation2 + $0x570] sm:$0xff] }
 0x277   :  { %1062 = vmatprep.subr.bf16.mxu0 %v770_v35 }
 0x278   :  { %981 = vmatpush1.bf16.msra.mxu1 %v767_v36 }
 0x279   :  { %982 = vmatprep.subr.bf16.mxu1 %v776_v37  ;;  %v716_v37 = vld [vmem:[#allocation2 + $0x5b8] sm:$0xff] }
 0x27a   :  { %1063 = vmatpush1.bf16.msra.mxu0 %v769_v38 }
 0x27b   :  { %1064 = vmatprep.subr.bf16.mxu0 %v778_v39 }
 0x27c   :  { %983 = vmatpush1.bf16.msra.mxu1 %v775_v40 }
 0x27d   :  { %984 = vmatprep.subr.bf16.mxu1 %v784_v41 }
 0x27e   :  { %1065 = vmatpush1.bf16.msra.mxu0 %v777_v42 }
 0x27f   :  { %1066 = vmatprep.subr.bf16.mxu0 %v786_v43 }
 0x280   :  { %985 = vmatpush1.bf16.msra.mxu1 %v783_v44 }
 0x281   :  { %1077 = vmatprep.subr.bf16.mxu1 %v540_v45 }
 0x282   :  { %1067 = vmatpush1.bf16.msra.mxu0 %v785_v46  ;;  %v715_v46 = vld [vmem:[#allocation2 + $0x5b0] sm:$0xff] }
 0x283   :  { %987 = vmatmul.mubr.bf16.vlgmr.msra.gmra.mrb[8].mxu1 %v3043_v16 }
 0x284   :  { %1078 = vmatpush1.bf16.msra.mxu1 %v539_v47  ;;  %1109 = vmatprep.mubr.bf16.mxu1 %v3045_v17  ;;  %v587_v17 = vld [vmem:[#allocation2 + $0x1b0] sm:$0xff] }
 0x285   :  { %1069 = vmatmul.mubr.bf16.vlgmr.msra.gmra.mrb[8].mxu0 %v3043_v16  ;;  %1079 = vmatprep.subr.bf16.mxu1 %v548_v48 }
 0x288   :  { %1080 = vmatpush1.bf16.msra.mxu1 %v547_v49  ;;  %v724_v49 = vld [vmem:[#allocation2 + $0x5f8] sm:$0xff] }
 0x289   :  { %1081 = vmatprep.subr.bf16.mxu1 %v556_v50 }
 0x28c   :  { %1082 = vmatpush1.bf16.msra.mxu1 %v555_v51 }
 0x28d   :  { %1083 = vmatprep.subr.bf16.mxu1 %v564_v52 }
 0x290   :  { %1084 = vmatpush1.bf16.msra.mxu1 %v563_v56  ;;  %v723_v56 = vld [vmem:[#allocation2 + $0x5f0] sm:$0xff] }
 0x291   :  { %1085 = vmatprep.subr.bf16.mxu1 %v572_v59 }
 0x294   :  { %1086 = vmatpush1.bf16.msra.mxu1 %v571_v60  ;;  %v732_v60 = vld [vmem:[#allocation2 + $0x638] sm:$0xff] }
 0x295   :  { %1087 = vmatprep.subr.bf16.mxu1 %v580_v61  ;;  %v731_v61 = vld [vmem:[#allocation2 + $0x630] sm:$0xff] }
 0x298   :  { %1088 = vmatpush1.bf16.msra.mxu1 %v579_v62  ;;  %v740_v62 = vld [vmem:[#allocation2 + $0x678] sm:$0xff] }
 0x299   :  { %1089 = vmatprep.subr.bf16.mxu1 %v588_v63  ;;  %v739_v63 = vld [vmem:[#allocation2 + $0x670] sm:$0xff] }
 0x29c   :  { %1090 = vmatpush1.bf16.msra.mxu1 %v587_v17  ;;  %v748_v17 = vld [vmem:[#allocation2 + $0x6b8] sm:$0xff] }
 0x29d   :  { %1091 = vmatprep.subr.bf16.mxu1 %v596_v0  ;;  %v747_v0 = vld [vmem:[#allocation2 + $0x6b0] sm:$0xff] }
 0x2a0   :  { %1092 = vmatpush1.bf16.msra.mxu1 %v595_v1  ;;  %v756_v1 = vld [vmem:[#allocation2 + $0x6f8] sm:$0xff] }
 0x2a1   :  { %1093 = vmatprep.subr.bf16.mxu1 %v604_v2  ;;  %v755_v2 = vld [vmem:[#allocation2 + $0x6f0] sm:$0xff] }
 0x2a4   :  { %1094 = vmatpush1.bf16.msra.mxu1 %v603_v3  ;;  %v764_v3 = vld [vmem:[#allocation2 + $0x738] sm:$0xff] }
 0x2a5   :  { %1095 = vmatprep.subr.bf16.mxu1 %v612_v4  ;;  %v763_v4 = vld [vmem:[#allocation2 + $0x730] sm:$0xff] }
 0x2a8   :  { %1096 = vmatpush1.bf16.msra.mxu1 %v611_v5  ;;  %v772_v5 = vld [vmem:[#allocation2 + $0x778] sm:$0xff] }
 0x2a9   :  { %1097 = vmatprep.subr.bf16.mxu1 %v620_v6  ;;  %v771_v6 = vld [vmem:[#allocation2 + $0x770] sm:$0xff] }
 0x2ac   :  { %1098 = vmatpush1.bf16.msra.mxu1 %v619_v7  ;;  %v780_v7 = vld [vmem:[#allocation2 + $0x7b8] sm:$0xff] }
 0x2ad   :  { %1099 = vmatprep.subr.bf16.mxu1 %v628_v8  ;;  %v779_v8 = vld [vmem:[#allocation2 + $0x7b0] sm:$0xff] }
 0x2b0   :  { %1100 = vmatpush1.bf16.msra.mxu1 %v627_v9  ;;  %v788_v9 = vld [vmem:[#allocation2 + $0x7f8] sm:$0xff] }
 0x2b1   :  { %1101 = vmatprep.subr.bf16.mxu1 %v636_v10  ;;  %v787_v10 = vld [vmem:[#allocation2 + $0x7f0] sm:$0xff] }
 0x2b4   :  { %1102 = vmatpush1.bf16.msra.mxu1 %v635_v11  ;;  %v809_v11 = vsub.s32 4, %v3023_v53 }
 0x2b5   :  { %1103 = vmatprep.subr.bf16.mxu1 %v644_v12  ;;  %v813_v12 = vsub.s32 5, %v3023_v53 }
 0x2b8   :  { %1104 = vmatpush1.bf16.msra.mxu1 %v643_v13  ;;  %v802_v13 = vrot.slane %v3064_v31, %v3029_v55 }
 0x2b9   :  { %1105 = vmatprep.subr.bf16.mxu1 %v652_v14  ;;  %v806_v14 = vrot.slane %v3064_v31, %v3035_v58 }
 0x2bc   :  { %1106 = vmatpush1.bf16.msra.mxu1 %v651_v19  ;;  %v810_v19 = vrot.slane %v3064_v31, %v809_v11 }
 0x2bd   :  { %1107 = vmatprep.subr.bf16.mxu1 %v660_v20  ;;  %v814_v20 = vrot.slane %v3064_v31, %v813_v12 }
 0x2c0   :  { %1108 = vmatpush1.bf16.msra.mxu1 %v659_v21 }
 0x2c1   :  { %1118 = vmatprep.subr.bf16.mxu1 %v668_v22 }
 0x2c3   :  { %1110 = vmatmul.mubr.bf16.vlgmr.msra.gmra.mrb[12].mxu1 %v3041_v15  ;;  %v708_v15 = vld [vmem:[#allocation2 + $0x578] sm:$0xff] }
 0x2c4   :  { %1119 = vmatpush1.bf16.msra.mxu1 %v667_v23  ;;  %1150 = vmatprep.mubr.bf16.mxu1 %v3047_v18  ;;  %v794_v18 = vrot.slane %v3064_v31, %v3026_v54 }
 0x2c5   :  { %1120 = vmatprep.subr.bf16.mxu1 %v676_v24 }
 0x2c8   :  { %1121 = vmatpush1.bf16.msra.mxu1 %v675_v25 }
 0x2c9   :  { %1122 = vmatprep.subr.bf16.mxu1 %v684_v26 }
 0x2cc   :  { %1123 = vmatpush1.bf16.msra.mxu1 %v683_v27 }
 0x2cd   :  { %1124 = vmatprep.subr.bf16.mxu1 %v692_v28 }
 0x2d0   :  { %1125 = vmatpush1.bf16.msra.mxu1 %v691_v29 }
 0x2d1   :  { %1126 = vmatprep.subr.bf16.mxu1 %v700_v30 }
 0x2d4   :  { %1127 = vmatpush1.bf16.msra.mxu1 %v699_v32 }
 0x2d5   :  { %1128 = vmatprep.subr.bf16.mxu1 %v708_v15 }
 0x2d6   :  { %v865_v35 = vpop.f32.mrb[4].mxu1 }
 0x2d7   :  { %v906_v36 = vpop.f32.mrb[4].mxu0  ;;  %v866_v38 = vadd.f32 %v865_v35, %v794_v18  ;;  %v867_v39 = vpop.f32.mrb[5].mxu1 }
 0x2d8   :  { %v908_v40 = vpop.f32.mrb[5].mxu0  ;;  %v868_v41 = vadd.f32 %v867_v39, %v798_v33  ;;  %v869_v42 = vpop.f32.mrb[6].mxu1  ;;  %1129 = vmatpush1.bf16.msra.mxu1 %v707_v34  ;;  %v817_v39 = vsub.s32 6, %v3023_v53 }
 0x2d9   :  { %v910_v43 = vpop.f32.mrb[6].mxu0  ;;  %v907_v44 = vadd.f32 %v906_v36, %v866_v38  ;;  %v870_v45 = vpop.f32.mrb[7].mxu1  ;;  %1130 = vmatprep.subr.bf16.mxu1 %v716_v37 }
 0x2da   :  { %v911_v47 = vpop.f32.mrb[7].mxu0  ;;  %v909_v48 = vadd.f32 %v908_v40, %v868_v41  ;;  %v821_v40 = vsub.s32 7, %v3023_v53  ;;  %v818_v41 = vrot.slane %v3064_v31, %v817_v39 }
 0x2db   :  { %v1159_v50 = vmax.f32 %v907_v44, 0.0 }
 0x2dc   :  { %v1160_v51 = vmax.f32 %v909_v48, 0.0  ;;  %1131 = vmatpush1.bf16.msra.mxu1 %v715_v46  ;;  %v822_v42 = vrot.slane %v3064_v31, %v821_v40 }
 0x2dd   :  { %v3070_v52 = vpack.c.bf16 %v1159_v50, %v1159_v50  ;;  %1132 = vmatprep.subr.bf16.mxu1 %v724_v49 }
 0x2de   :  { %v3072_v59 = vpack.c.bf16 %v1160_v51, %v1160_v51 }
 0x2e0   :  { %1133 = vmatpush1.bf16.msra.mxu1 %v723_v56 }
 0x2e1   :  { %1134 = vmatprep.subr.bf16.mxu1 %v732_v60 }
 0x2e4   :  { %1135 = vmatpush1.bf16.msra.mxu1 %v731_v61 }
 0x2e5   :  { %1136 = vmatprep.subr.bf16.mxu1 %v740_v62 }
 0x2e8   :  { %1137 = vmatpush1.bf16.msra.mxu1 %v739_v63 }
 0x2e9   :  { %1138 = vmatprep.subr.bf16.mxu1 %v748_v17 }
 0x2ec   :  { %1139 = vmatpush1.bf16.msra.mxu1 %v747_v0 }
 0x2ed   :  { %1140 = vmatprep.subr.bf16.mxu1 %v756_v1 }
 0x2f0   :  { %1141 = vmatpush1.bf16.msra.mxu1 %v755_v2 }
 0x2f1   :  { %1142 = vmatprep.subr.bf16.mxu1 %v764_v3 }
 0x2f4   :  { %1143 = vmatpush1.bf16.msra.mxu1 %v763_v4 }
 0x2f5   :  { %1144 = vmatprep.subr.bf16.mxu1 %v772_v5 }
 0x2f8   :  { %1145 = vmatpush1.bf16.msra.mxu1 %v771_v6 }
 0x2f9   :  { %1146 = vmatprep.subr.bf16.mxu1 %v780_v7 }
 0x2fc   :  { %1147 = vmatpush1.bf16.msra.mxu1 %v779_v8 }
 0x2fd   :  { %1148 = vmatprep.subr.bf16.mxu1 %v788_v9 }
 0x300   :  { %1149 = vmatpush1.bf16.msra.mxu1 %v787_v10 }
 0x303   :  { %1151 = vmatmul.mubr.bf16.vlgmr.msra.gmra.mrb[12].mxu1 %v3043_v16 }
 0x356   :  { %v988_v21 = vpop.f32.mrb[8].mxu1 }
 0x357   :  { %v2586_v16 = vadd.f32 %v988_v21, %v802_v13  ;;  %v990_v22 = vpop.f32.mrb[9].mxu1 }
 0x358   :  { %v1070_v23 = vpop.f32.mrb[8].mxu0  ;;  %v2587_v24 = vadd.f32 %v990_v22, %v806_v14  ;;  %v992_v25 = vpop.f32.mrb[10].mxu1 }
 0x359   :  { %v2588_v26 = vadd.f32 %v1070_v23, %v810_v19  ;;  %v1072_v27 = vpop.f32.mrb[9].mxu0  ;;  %v1161_v28 = vmax.f32 %v2586_v16, 0.0  ;;  %v993_v29 = vpop.f32.mrb[11].mxu1 }
 0x35a   :  { %v2589_v30 = vadd.f32 %v1072_v27, %v814_v20  ;;  %v1074_v32 = vpop.f32.mrb[10].mxu0  ;;  %v1162_v15 = vmax.f32 %v2587_v24, 0.0 }
 0x35b   :  { %v1163_v18 = vmax.f32 %v2588_v26, 0.0  ;;  %v1075_v33 = vpop.f32.mrb[11].mxu0  ;;  %v3087_v34 = vpack.c.bf16 %v1161_v28, %v1161_v28 }
 0x35c   :  { %v1164_v35 = vmax.f32 %v2589_v30, 0.0  ;;  %v3089_v36 = vpack.c.bf16 %v1162_v15, %v1162_v15 }
 0x35d   :  { %v3091_v37 = vpack.c.bf16 %v1163_v18, %v1163_v18 }
 0x35e   :  { %v3093_v38 = vpack.c.bf16 %v1164_v35, %v1164_v35 }
 0x3d6   :  { %v1152_v43 = vpop.f32.mrb[12].mxu1 }
 0x3d7   :  { %v2590_v44 = vadd.f32 %v1152_v43, %v818_v41  ;;  %v1154_v45 = vpop.f32.mrb[13].mxu1 }
 0x3d8   :  { %v2591_v46 = vadd.f32 %v1154_v45, %v822_v42  ;;  %v1156_v47 = vpop.f32.mrb[14].mxu1 }
 0x3d9   :  { %v1165_v48 = vmax.f32 %v2590_v44, 0.0  ;;  %v1157_v49 = vpop.f32.mrb[15].mxu1 }
 0x3da   :  { %v1166_v50 = vmax.f32 %v2591_v46, 0.0 }
 0x3db   :  { %v3101_v51 = vpack.c.bf16 %v1165_v48, %v1165_v48 }
 0x3dc   :  { %v3103_v56 = vpack.c.bf16 %v1166_v50, %v1166_v50 }
 0x3dd   :  { %2878 = dma.done.wait [#allocation4 + $0x1], 57344 }
 0x3de   :  { %2879 = vsyncadd [#allocation4 + $0x1], 4294909952  ;;  %1696 = vmatprep.mubr.bf16.mxu0 %v3072_v59  ;;  %1860 = vmatprep.mubr.bf16.mxu1 %v3072_v59  ;;  %v1180_v60 = vld [vmem:[#allocation3 + $0x8] sm:$0xff]  ;;  %v1182_v31 = vld [vmem:[#allocation3 + $0x18] sm:$0xff]  ;;  %s2906_s1 = smov [#allocation13]  }
 0x3df   :  { %v1179_v61 = vld [vmem:[#allocation3] sm:$0xff]  ;;  %1664 = vmatprep.subr.bf16.mxu0 %v1180_v60  ;;  %1828 = vmatprep.subr.bf16.mxu1 %v1182_v31  ;;  %v1181_v62 = vld [vmem:[#allocation3 + $0x10] sm:$0xff]  ;;  %v1186_v0 = vld [vmem:[#allocation3 + $0x38] sm:$0xff]  ;;  %s2408_s9 = sshll.u32 %s2906_s1, 4  ;;  %s2409_s9 = int_to_ptr.vmem [resolvable:$true] %s2408_s9 }
 0x3e0   :  { %v1187_v63 = vld [vmem:[#allocation3 + $0x40] sm:$0xff]  ;;  %v1189_v17 = vld [vmem:[#allocation3 + $0x50] sm:$0xff]  ;;  %1665 = vmatpush1.bf16.msra.mxu0 %v1179_v61  ;;  %1829 = vmatpush1.bf16.msra.mxu1 %v1181_v62  ;;  %v1188_v1 = vld [vmem:[#allocation3 + $0x48] sm:$0xff]  ;;  %s2848_s10 = scalar_lea.vmem %s2409_s9, 224  ;;  %p2853_p5 = scmp.lt.s32.totalorder %s2409_s9, %s2409_s9 }
 0x3e1   :  { %1666 = vmatprep.subr.bf16.mxu0 %v1187_v63  ;;  %1830 = vmatprep.subr.bf16.mxu1 %v1189_v17  ;;  %v1194_v2 = vld [vmem:[#allocation3 + $0x78] sm:$0xff]  ;;  %v1196_v3 = vld [vmem:[#allocation3 + $0x88] sm:$0xff]  ;;  %v1193_v4 = vld [vmem:[#allocation3 + $0x70] sm:$0xff]  ;;  %p2849_p4 = scmp.ne.s32.totalorder %s2409_s9, %s2848_s10  ;;  %p2854_p6 = scmp.lt.s32.totalorder %s2848_s10, %s2848_s10 }
 0x3e2   :  { %v1195_v5 = vld [vmem:[#allocation3 + $0x80] sm:$0xff]  ;;  %v1201_v6 = vld [vmem:[#allocation3 + $0xb0] sm:$0xff]  ;;  %v1200_v8 = vld [vmem:[#allocation3 + $0xa8] sm:$0xff] }
 0x3e3   :  { %v1203_v7 = vld [vmem:[#allocation3 + $0xc0] sm:$0xff]  ;;  %v1202_v9 = vld [vmem:[#allocation3 + $0xb8] sm:$0xff]  ;;  %v1208_v10 = vld [vmem:[#allocation3 + $0xe8] sm:$0xff]  ;;  %p2855_p7 = por %p2854_p6, %p2853_p5 }
 0x3e4   :  { %1667 = vmatpush1.bf16.msra.mxu0 %v1186_v0  ;;  %1831 = vmatpush1.bf16.msra.mxu1 %v1188_v1  ;;  %v1210_v13 = vld [vmem:[#allocation3 + $0xf8] sm:$0xff]  ;;  %v1207_v14 = vld [vmem:[#allocation3 + $0xe0] sm:$0xff]  ;;  %v1209_v19 = vld [vmem:[#allocation3 + $0xf0] sm:$0xff] }
 0x3e5   :  { %1668 = vmatprep.subr.bf16.mxu0 %v1194_v2  ;;  %1832 = vmatprep.subr.bf16.mxu1 %v1196_v3  ;;  %v1215_v20 = vld [vmem:[#allocation3 + $0x120] sm:$0xff]  ;;  %v1217_v21 = vld [vmem:[#allocation3 + $0x130] sm:$0xff]  ;;  %v1214_v16 = vld [vmem:[#allocation3 + $0x118] sm:$0xff]  ;;  %p2856_p8 = pnand %p2855_p7, %p2849_p4 }
 0x3e6   :  { %v1216_v22 = vld [vmem:[#allocation3 + $0x128] sm:$0xff]  ;;  %v1222_v23 = vld [vmem:[#allocation3 + $0x158] sm:$0xff]  ;;  %v1221_v25 = vld [vmem:[#allocation3 + $0x150] sm:$0xff] }
 0x3e7   :  { %v1224_v24 = vld [vmem:[#allocation3 + $0x168] sm:$0xff]  ;;  %v1223_v26 = vld [vmem:[#allocation3 + $0x160] sm:$0xff]  ;;  %v1229_v27 = vld [vmem:[#allocation3 + $0x190] sm:$0xff] }
 0x3e8   :  { %1669 = vmatpush1.bf16.msra.mxu0 %v1193_v4  ;;  %1833 = vmatpush1.bf16.msra.mxu1 %v1195_v5  ;;  %v1231_v28 = vld [vmem:[#allocation3 + $0x1a0] sm:$0xff]  ;;  %v1228_v29 = vld [vmem:[#allocation3 + $0x188] sm:$0xff]  ;;  %v1230_v30 = vld [vmem:[#allocation3 + $0x198] sm:$0xff] }
 0x3e9   :  { %1670 = vmatprep.subr.bf16.mxu0 %v1201_v6  ;;  %1834 = vmatprep.subr.bf16.mxu1 %v1203_v7  ;;  %v1236_v32 = vld [vmem:[#allocation3 + $0x1c8] sm:$0xff]  ;;  %v1238_v15 = vld [vmem:[#allocation3 + $0x1d8] sm:$0xff]  ;;  %v1235_v18 = vld [vmem:[#allocation3 + $0x1c0] sm:$0xff] }
 0x3ea   :  { %v1237_v33 = vld [vmem:[#allocation3 + $0x1d0] sm:$0xff]  ;;  %v1243_v35 = vld [vmem:[#allocation3 + $0x200] sm:$0xff]  ;;  %v1242_v41 = vld [vmem:[#allocation3 + $0x1f8] sm:$0xff] }
 0x3eb   :  { %v1245_v40 = vld [vmem:[#allocation3 + $0x210] sm:$0xff]  ;;  %v1244_v42 = vld [vmem:[#allocation3 + $0x208] sm:$0xff]  ;;  %v1250_v43 = vld [vmem:[#allocation3 + $0x238] sm:$0xff] }
 0x3ec   :  { %1671 = vmatpush1.bf16.msra.mxu0 %v1200_v8  ;;  %1835 = vmatpush1.bf16.msra.mxu1 %v1202_v9  ;;  %v1252_v44 = vld [vmem:[#allocation3 + $0x248] sm:$0xff]  ;;  %v1249_v45 = vld [vmem:[#allocation3 + $0x230] sm:$0xff]  ;;  %v1251_v46 = vld [vmem:[#allocation3 + $0x240] sm:$0xff] }
 0x3ed   :  { %1672 = vmatprep.subr.bf16.mxu0 %v1208_v10  ;;  %1836 = vmatprep.subr.bf16.mxu1 %v1210_v13  ;;  %v1257_v47 = vld [vmem:[#allocation3 + $0x270] sm:$0xff]  ;;  %v1259_v48 = vld [vmem:[#allocation3 + $0x280] sm:$0xff]  ;;  %v1256_v49 = vld [vmem:[#allocation3 + $0x268] sm:$0xff] }
 0x3ee   :  { %v1258_v50 = vld [vmem:[#allocation3 + $0x278] sm:$0xff]  ;;  %v1264_v60 = vld [vmem:[#allocation3 + $0x2a8] sm:$0xff]  ;;  %v1263_v61 = vld [vmem:[#allocation3 + $0x2a0] sm:$0xff] }
 0x3ef   :  { %v1266_v31 = vld [vmem:[#allocation3 + $0x2b8] sm:$0xff]  ;;  %v1265_v62 = vld [vmem:[#allocation3 + $0x2b0] sm:$0xff]  ;;  %v1271_v63 = vld [vmem:[#allocation3 + $0x2e0] sm:$0xff] }
 0x3f0   :  { %1673 = vmatpush1.bf16.msra.mxu0 %v1207_v14  ;;  %1837 = vmatpush1.bf16.msra.mxu1 %v1209_v19  ;;  %v1273_v17 = vld [vmem:[#allocation3 + $0x2f0] sm:$0xff]  ;;  %v1270_v0 = vld [vmem:[#allocation3 + $0x2d8] sm:$0xff]  ;;  %v1272_v1 = vld [vmem:[#allocation3 + $0x2e8] sm:$0xff] }
 0x3f1   :  { %1674 = vmatprep.subr.bf16.mxu0 %v1215_v20  ;;  %1838 = vmatprep.subr.bf16.mxu1 %v1217_v21  ;;  %v1278_v2 = vld [vmem:[#allocation3 + $0x318] sm:$0xff]  ;;  %v1280_v3 = vld [vmem:[#allocation3 + $0x328] sm:$0xff]  ;;  %v1277_v4 = vld [vmem:[#allocation3 + $0x310] sm:$0xff] }
 0x3f2   :  { %v1279_v5 = vld [vmem:[#allocation3 + $0x320] sm:$0xff]  ;;  %v1285_v6 = vld [vmem:[#allocation3 + $0x350] sm:$0xff]  ;;  %v1284_v8 = vld [vmem:[#allocation3 + $0x348] sm:$0xff] }
 0x3f3   :  { %v1287_v7 = vld [vmem:[#allocation3 + $0x360] sm:$0xff]  ;;  %v1286_v9 = vld [vmem:[#allocation3 + $0x358] sm:$0xff]  ;;  %v1292_v10 = vld [vmem:[#allocation3 + $0x388] sm:$0xff] }
 0x3f4   :  { %1675 = vmatpush1.bf16.msra.mxu0 %v1214_v16  ;;  %1839 = vmatpush1.bf16.msra.mxu1 %v1216_v22  ;;  %v1294_v13 = vld [vmem:[#allocation3 + $0x398] sm:$0xff]  ;;  %v1291_v14 = vld [vmem:[#allocation3 + $0x380] sm:$0xff]  ;;  %v1293_v19 = vld [vmem:[#allocation3 + $0x390] sm:$0xff] }
 0x3f5   :  { %1676 = vmatprep.subr.bf16.mxu0 %v1222_v23  ;;  %1840 = vmatprep.subr.bf16.mxu1 %v1224_v24  ;;  %v1299_v20 = vld [vmem:[#allocation3 + $0x3c0] sm:$0xff]  ;;  %v1301_v21 = vld [vmem:[#allocation3 + $0x3d0] sm:$0xff]  ;;  %v1298_v16 = vld [vmem:[#allocation3 + $0x3b8] sm:$0xff] }
 0x3f6   :  { %v1300_v22 = vld [vmem:[#allocation3 + $0x3c8] sm:$0xff]  ;;  %v1306_v23 = vld [vmem:[#allocation3 + $0x3f8] sm:$0xff] }
 0x3f7   :  { %v1308_v24 = vld [vmem:[#allocation3 + $0x408] sm:$0xff] }
 0x3f8   :  { %1677 = vmatpush1.bf16.msra.mxu0 %v1221_v25  ;;  %1841 = vmatpush1.bf16.msra.mxu1 %v1223_v26  ;;  %v1305_v25 = vld [vmem:[#allocation3 + $0x3f0] sm:$0xff]  ;;  %v1307_v26 = vld [vmem:[#allocation3 + $0x400] sm:$0xff] }
 0x3f9   :  { %1678 = vmatprep.subr.bf16.mxu0 %v1229_v27  ;;  %1842 = vmatprep.subr.bf16.mxu1 %v1231_v28  ;;  %v1313_v27 = vld [vmem:[#allocation3 + $0x430] sm:$0xff]  ;;  %v1315_v28 = vld [vmem:[#allocation3 + $0x440] sm:$0xff] }
 0x3fc   :  { %1679 = vmatpush1.bf16.msra.mxu0 %v1228_v29  ;;  %1843 = vmatpush1.bf16.msra.mxu1 %v1230_v30  ;;  %v1312_v29 = vld [vmem:[#allocation3 + $0x428] sm:$0xff]  ;;  %v1314_v30 = vld [vmem:[#allocation3 + $0x438] sm:$0xff] }
 0x3fd   :  { %1680 = vmatprep.subr.bf16.mxu0 %v1236_v32  ;;  %1844 = vmatprep.subr.bf16.mxu1 %v1238_v15  ;;  %v1320_v32 = vld [vmem:[#allocation3 + $0x468] sm:$0xff]  ;;  %v1322_v15 = vld [vmem:[#allocation3 + $0x478] sm:$0xff] }
 0x400   :  { %1681 = vmatpush1.bf16.msra.mxu0 %v1235_v18  ;;  %1845 = vmatpush1.bf16.msra.mxu1 %v1237_v33  ;;  %v1319_v18 = vld [vmem:[#allocation3 + $0x460] sm:$0xff]  ;;  %v1321_v33 = vld [vmem:[#allocation3 + $0x470] sm:$0xff] }
 0x401   :  { %1682 = vmatprep.subr.bf16.mxu0 %v1243_v35  ;;  %1846 = vmatprep.subr.bf16.mxu1 %v1245_v40  ;;  %v1327_v35 = vld [vmem:[#allocation3 + $0x4a0] sm:$0xff]  ;;  %v1329_v40 = vld [vmem:[#allocation3 + $0x4b0] sm:$0xff] }
 0x404   :  { %1683 = vmatpush1.bf16.msra.mxu0 %v1242_v41  ;;  %1847 = vmatpush1.bf16.msra.mxu1 %v1244_v42  ;;  %v1326_v41 = vld [vmem:[#allocation3 + $0x498] sm:$0xff]  ;;  %v1328_v42 = vld [vmem:[#allocation3 + $0x4a8] sm:$0xff] }
 0x405   :  { %1684 = vmatprep.subr.bf16.mxu0 %v1250_v43  ;;  %1848 = vmatprep.subr.bf16.mxu1 %v1252_v44  ;;  %v1334_v43 = vld [vmem:[#allocation3 + $0x4d8] sm:$0xff]  ;;  %v1336_v44 = vld [vmem:[#allocation3 + $0x4e8] sm:$0xff] }
 0x408   :  { %1685 = vmatpush1.bf16.msra.mxu0 %v1249_v45  ;;  %1849 = vmatpush1.bf16.msra.mxu1 %v1251_v46  ;;  %v1333_v45 = vld [vmem:[#allocation3 + $0x4d0] sm:$0xff]  ;;  %v1335_v46 = vld [vmem:[#allocation3 + $0x4e0] sm:$0xff] }
 0x409   :  { %1686 = vmatprep.subr.bf16.mxu0 %v1257_v47  ;;  %1850 = vmatprep.subr.bf16.mxu1 %v1259_v48  ;;  %v1341_v47 = vld [vmem:[#allocation3 + $0x510] sm:$0xff]  ;;  %v1343_v48 = vld [vmem:[#allocation3 + $0x520] sm:$0xff] }
 0x40c   :  { %1687 = vmatpush1.bf16.msra.mxu0 %v1256_v49  ;;  %1851 = vmatpush1.bf16.msra.mxu1 %v1258_v50  ;;  %v1340_v49 = vld [vmem:[#allocation3 + $0x508] sm:$0xff]  ;;  %v1342_v50 = vld [vmem:[#allocation3 + $0x518] sm:$0xff] }
 0x40d   :  { %1688 = vmatprep.subr.bf16.mxu0 %v1264_v60  ;;  %1852 = vmatprep.subr.bf16.mxu1 %v1266_v31  ;;  %v1348_v60 = vld [vmem:[#allocation3 + $0x548] sm:$0xff]  ;;  %v1350_v31 = vld [vmem:[#allocation3 + $0x558] sm:$0xff] }
 0x410   :  { %1689 = vmatpush1.bf16.msra.mxu0 %v1263_v61  ;;  %1853 = vmatpush1.bf16.msra.mxu1 %v1265_v62  ;;  %v1347_v61 = vld [vmem:[#allocation3 + $0x540] sm:$0xff]  ;;  %v1349_v62 = vld [vmem:[#allocation3 + $0x550] sm:$0xff] }
 0x411   :  { %1690 = vmatprep.subr.bf16.mxu0 %v1271_v63  ;;  %1854 = vmatprep.subr.bf16.mxu1 %v1273_v17  ;;  %v1355_v63 = vld [vmem:[#allocation3 + $0x580] sm:$0xff]  ;;  %v1357_v17 = vld [vmem:[#allocation3 + $0x590] sm:$0xff] }
 0x414   :  { %1691 = vmatpush1.bf16.msra.mxu0 %v1270_v0  ;;  %1855 = vmatpush1.bf16.msra.mxu1 %v1272_v1  ;;  %v1354_v0 = vld [vmem:[#allocation3 + $0x578] sm:$0xff]  ;;  %v1356_v1 = vld [vmem:[#allocation3 + $0x588] sm:$0xff] }
 0x415   :  { %1692 = vmatprep.subr.bf16.mxu0 %v1278_v2  ;;  %1856 = vmatprep.subr.bf16.mxu1 %v1280_v3  ;;  %v1362_v2 = vld [vmem:[#allocation3 + $0x5b8] sm:$0xff]  ;;  %v1364_v3 = vld [vmem:[#allocation3 + $0x5c8] sm:$0xff] }
 0x418   :  { %1693 = vmatpush1.bf16.msra.mxu0 %v1277_v4  ;;  %1857 = vmatpush1.bf16.msra.mxu1 %v1279_v5  ;;  %v1361_v4 = vld [vmem:[#allocation3 + $0x5b0] sm:$0xff]  ;;  %v1363_v5 = vld [vmem:[#allocation3 + $0x5c0] sm:$0xff] }
 0x419   :  { %1694 = vmatprep.subr.bf16.mxu0 %v1285_v6  ;;  %1858 = vmatprep.subr.bf16.mxu1 %v1287_v7  ;;  %v1369_v6 = vld [vmem:[#allocation3 + $0x5f0] sm:$0xff]  ;;  %v1371_v7 = vld [vmem:[#allocation3 + $0x600] sm:$0xff] }
 0x41c   :  { %1695 = vmatpush1.bf16.msra.mxu0 %v1284_v8  ;;  %1859 = vmatpush1.bf16.msra.mxu1 %v1286_v9  ;;  %v1368_v8 = vld [vmem:[#allocation3 + $0x5e8] sm:$0xff]  ;;  %v1370_v9 = vld [vmem:[#allocation3 + $0x5f8] sm:$0xff] }
 0x41d   :  { %1705 = vmatprep.subr.bf16.mxu0 %v1292_v10  ;;  %1869 = vmatprep.subr.bf16.mxu1 %v1294_v13  ;;  %v1376_v10 = vld [vmem:[#allocation3 + $0x628] sm:$0xff]  ;;  %v1378_v13 = vld [vmem:[#allocation3 + $0x638] sm:$0xff] }
 0x41f   :  { %1697 = vmatmul.mubr.bf16.vlgmr.msra.gmra.mrb[12].mxu0 %v3070_v52  ;;  %1861 = vmatmul.mubr.bf16.vlgmr.msra.gmra.mrb[16].mxu1 %v3070_v52 }
 0x420   :  { %1706 = vmatpush1.bf16.msra.mxu0 %v1291_v14  ;;  %1870 = vmatpush1.bf16.msra.mxu1 %v1293_v19  ;;  %v1375_v14 = vld [vmem:[#allocation3 + $0x620] sm:$0xff]  ;;  %v1377_v19 = vld [vmem:[#allocation3 + $0x630] sm:$0xff] }
 0x421   :  { %1707 = vmatprep.subr.bf16.mxu0 %v1299_v20  ;;  %1871 = vmatprep.subr.bf16.mxu1 %v1301_v21  ;;  %v1383_v20 = vld [vmem:[#allocation3 + $0x660] sm:$0xff]  ;;  %v1385_v21 = vld [vmem:[#allocation3 + $0x670] sm:$0xff] }
 0x422   :  { %1737 = vmatprep.mubr.bf16.mxu0 %v3089_v36  ;;  %1901 = vmatprep.mubr.bf16.mxu1 %v3089_v36 }
 0x424   :  { %1708 = vmatpush1.bf16.msra.mxu0 %v1298_v16  ;;  %1872 = vmatpush1.bf16.msra.mxu1 %v1300_v22  ;;  %v1382_v16 = vld [vmem:[#allocation3 + $0x658] sm:$0xff]  ;;  %v1384_v22 = vld [vmem:[#allocation3 + $0x668] sm:$0xff] }
 0x425   :  { %1709 = vmatprep.subr.bf16.mxu0 %v1306_v23  ;;  %1873 = vmatprep.subr.bf16.mxu1 %v1308_v24  ;;  %v1390_v23 = vld [vmem:[#allocation3 + $0x698] sm:$0xff]  ;;  %v1392_v24 = vld [vmem:[#allocation3 + $0x6a8] sm:$0xff] }
 0x428   :  { %1710 = vmatpush1.bf16.msra.mxu0 %v1305_v25  ;;  %1874 = vmatpush1.bf16.msra.mxu1 %v1307_v26  ;;  %v1389_v25 = vld [vmem:[#allocation3 + $0x690] sm:$0xff]  ;;  %v1391_v26 = vld [vmem:[#allocation3 + $0x6a0] sm:$0xff] }
 0x429   :  { %1711 = vmatprep.subr.bf16.mxu0 %v1313_v27  ;;  %1875 = vmatprep.subr.bf16.mxu1 %v1315_v28  ;;  %v1397_v27 = vld [vmem:[#allocation3 + $0x6d0] sm:$0xff]  ;;  %v1399_v28 = vld [vmem:[#allocation3 + $0x6e0] sm:$0xff] }
 0x42c   :  { %1712 = vmatpush1.bf16.msra.mxu0 %v1312_v29  ;;  %1876 = vmatpush1.bf16.msra.mxu1 %v1314_v30  ;;  %v1396_v29 = vld [vmem:[#allocation3 + $0x6c8] sm:$0xff]  ;;  %v1398_v30 = vld [vmem:[#allocation3 + $0x6d8] sm:$0xff] }
 0x42d   :  { %1713 = vmatprep.subr.bf16.mxu0 %v1320_v32  ;;  %1877 = vmatprep.subr.bf16.mxu1 %v1322_v15  ;;  %v1404_v32 = vld [vmem:[#allocation3 + $0x708] sm:$0xff]  ;;  %v1406_v15 = vld [vmem:[#allocation3 + $0x718] sm:$0xff] }
 0x430   :  { %1714 = vmatpush1.bf16.msra.mxu0 %v1319_v18  ;;  %1878 = vmatpush1.bf16.msra.mxu1 %v1321_v33  ;;  %v1403_v18 = vld [vmem:[#allocation3 + $0x700] sm:$0xff]  ;;  %v1405_v33 = vld [vmem:[#allocation3 + $0x710] sm:$0xff] }
 0x431   :  { %1715 = vmatprep.subr.bf16.mxu0 %v1327_v35  ;;  %1879 = vmatprep.subr.bf16.mxu1 %v1329_v40  ;;  %v1411_v35 = vld [vmem:[#allocation3 + $0x740] sm:$0xff]  ;;  %v1413_v40 = vld [vmem:[#allocation3 + $0x750] sm:$0xff] }
 0x434   :  { %1716 = vmatpush1.bf16.msra.mxu0 %v1326_v41  ;;  %1880 = vmatpush1.bf16.msra.mxu1 %v1328_v42  ;;  %v1410_v41 = vld [vmem:[#allocation3 + $0x738] sm:$0xff]  ;;  %v1412_v42 = vld [vmem:[#allocation3 + $0x748] sm:$0xff] }
 0x435   :  { %1717 = vmatprep.subr.bf16.mxu0 %v1334_v43  ;;  %1881 = vmatprep.subr.bf16.mxu1 %v1336_v44  ;;  %v1418_v43 = vld [vmem:[#allocation3 + $0x778] sm:$0xff]  ;;  %v1420_v44 = vld [vmem:[#allocation3 + $0x788] sm:$0xff] }
 0x438   :  { %1718 = vmatpush1.bf16.msra.mxu0 %v1333_v45  ;;  %1882 = vmatpush1.bf16.msra.mxu1 %v1335_v46  ;;  %v1417_v45 = vld [vmem:[#allocation3 + $0x770] sm:$0xff]  ;;  %v1419_v46 = vld [vmem:[#allocation3 + $0x780] sm:$0xff] }
 0x439   :  { %1719 = vmatprep.subr.bf16.mxu0 %v1341_v47  ;;  %1883 = vmatprep.subr.bf16.mxu1 %v1343_v48  ;;  %v1425_v47 = vld [vmem:[#allocation3 + $0x7b0] sm:$0xff]  ;;  %v1427_v48 = vld [vmem:[#allocation3 + $0x7c0] sm:$0xff] }
 0x43c   :  { %1720 = vmatpush1.bf16.msra.mxu0 %v1340_v49  ;;  %1884 = vmatpush1.bf16.msra.mxu1 %v1342_v50  ;;  %v1424_v49 = vld [vmem:[#allocation3 + $0x7a8] sm:$0xff]  ;;  %v1426_v50 = vld [vmem:[#allocation3 + $0x7b8] sm:$0xff] }
 0x43d   :  { %1721 = vmatprep.subr.bf16.mxu0 %v1348_v60  ;;  %1885 = vmatprep.subr.bf16.mxu1 %v1350_v31  ;;  %v1432_v60 = vld [vmem:[#allocation3 + $0x7e8] sm:$0xff]  ;;  %v1434_v31 = vld [vmem:[#allocation3 + $0x7f8] sm:$0xff] }
 0x440   :  { %1722 = vmatpush1.bf16.msra.mxu0 %v1347_v61  ;;  %1886 = vmatpush1.bf16.msra.mxu1 %v1349_v62  ;;  %v1431_v61 = vld [vmem:[#allocation3 + $0x7e0] sm:$0xff]  ;;  %v1433_v62 = vld [vmem:[#allocation3 + $0x7f0] sm:$0xff] }
 0x441   :  { %1723 = vmatprep.subr.bf16.mxu0 %v1355_v63  ;;  %1887 = vmatprep.subr.bf16.mxu1 %v1357_v17  ;;  %v1439_v63 = vld [vmem:[#allocation3 + $0x820] sm:$0xff]  ;;  %v1441_v17 = vld [vmem:[#allocation3 + $0x830] sm:$0xff] }
 0x444   :  { %1724 = vmatpush1.bf16.msra.mxu0 %v1354_v0  ;;  %1888 = vmatpush1.bf16.msra.mxu1 %v1356_v1  ;;  %v1438_v0 = vld [vmem:[#allocation3 + $0x818] sm:$0xff]  ;;  %v1440_v1 = vld [vmem:[#allocation3 + $0x828] sm:$0xff] }
 0x445   :  { %1725 = vmatprep.subr.bf16.mxu0 %v1362_v2  ;;  %1889 = vmatprep.subr.bf16.mxu1 %v1364_v3  ;;  %v1446_v2 = vld [vmem:[#allocation3 + $0x858] sm:$0xff]  ;;  %v1448_v3 = vld [vmem:[#allocation3 + $0x868] sm:$0xff] }
 0x448   :  { %1726 = vmatpush1.bf16.msra.mxu0 %v1361_v4  ;;  %1890 = vmatpush1.bf16.msra.mxu1 %v1363_v5  ;;  %v1445_v4 = vld [vmem:[#allocation3 + $0x850] sm:$0xff]  ;;  %v1447_v5 = vld [vmem:[#allocation3 + $0x860] sm:$0xff] }
 0x449   :  { %1727 = vmatprep.subr.bf16.mxu0 %v1369_v6  ;;  %1891 = vmatprep.subr.bf16.mxu1 %v1371_v7  ;;  %v1453_v6 = vld [vmem:[#allocation3 + $0x890] sm:$0xff]  ;;  %v1455_v7 = vld [vmem:[#allocation3 + $0x8a0] sm:$0xff] }
 0x44c   :  { %1728 = vmatpush1.bf16.msra.mxu0 %v1368_v8  ;;  %1892 = vmatpush1.bf16.msra.mxu1 %v1370_v9  ;;  %v1452_v8 = vld [vmem:[#allocation3 + $0x888] sm:$0xff]  ;;  %v1454_v9 = vld [vmem:[#allocation3 + $0x898] sm:$0xff] }
 0x44d   :  { %1729 = vmatprep.subr.bf16.mxu0 %v1376_v10  ;;  %1893 = vmatprep.subr.bf16.mxu1 %v1378_v13  ;;  %v1460_v10 = vld [vmem:[#allocation3 + $0x8c8] sm:$0xff]  ;;  %v1462_v13 = vld [vmem:[#allocation3 + $0x8d8] sm:$0xff] }
 0x450   :  { %1730 = vmatpush1.bf16.msra.mxu0 %v1375_v14  ;;  %1894 = vmatpush1.bf16.msra.mxu1 %v1377_v19  ;;  %v1459_v14 = vld [vmem:[#allocation3 + $0x8c0] sm:$0xff]  ;;  %v1461_v19 = vld [vmem:[#allocation3 + $0x8d0] sm:$0xff] }
 0x451   :  { %1731 = vmatprep.subr.bf16.mxu0 %v1383_v20  ;;  %1895 = vmatprep.subr.bf16.mxu1 %v1385_v21  ;;  %v1467_v20 = vld [vmem:[#allocation3 + $0x900] sm:$0xff]  ;;  %v1469_v21 = vld [vmem:[#allocation3 + $0x910] sm:$0xff] }
 0x454   :  { %1732 = vmatpush1.bf16.msra.mxu0 %v1382_v16  ;;  %1896 = vmatpush1.bf16.msra.mxu1 %v1384_v22  ;;  %v1466_v16 = vld [vmem:[#allocation3 + $0x8f8] sm:$0xff]  ;;  %v1468_v22 = vld [vmem:[#allocation3 + $0x908] sm:$0xff] }
 0x455   :  { %1733 = vmatprep.subr.bf16.mxu0 %v1390_v23  ;;  %1897 = vmatprep.subr.bf16.mxu1 %v1392_v24  ;;  %v1474_v23 = vld [vmem:[#allocation3 + $0x938] sm:$0xff]  ;;  %v1476_v24 = vld [vmem:[#allocation3 + $0x948] sm:$0xff] }
 0x458   :  { %1734 = vmatpush1.bf16.msra.mxu0 %v1389_v25  ;;  %1898 = vmatpush1.bf16.msra.mxu1 %v1391_v26  ;;  %v1473_v25 = vld [vmem:[#allocation3 + $0x930] sm:$0xff]  ;;  %v1475_v26 = vld [vmem:[#allocation3 + $0x940] sm:$0xff] }
 0x459   :  { %1735 = vmatprep.subr.bf16.mxu0 %v1397_v27  ;;  %1899 = vmatprep.subr.bf16.mxu1 %v1399_v28  ;;  %v1481_v27 = vld [vmem:[#allocation3 + $0x970] sm:$0xff]  ;;  %v1483_v28 = vld [vmem:[#allocation3 + $0x980] sm:$0xff] }
 0x45c   :  { %1736 = vmatpush1.bf16.msra.mxu0 %v1396_v29  ;;  %1900 = vmatpush1.bf16.msra.mxu1 %v1398_v30  ;;  %v1480_v29 = vld [vmem:[#allocation3 + $0x968] sm:$0xff]  ;;  %v1482_v30 = vld [vmem:[#allocation3 + $0x978] sm:$0xff] }
 0x45d   :  { %1746 = vmatprep.subr.bf16.mxu0 %v1404_v32  ;;  %1910 = vmatprep.subr.bf16.mxu1 %v1406_v15  ;;  %v1488_v32 = vld [vmem:[#allocation3 + $0x9a8] sm:$0xff]  ;;  %v1490_v15 = vld [vmem:[#allocation3 + $0x9b8] sm:$0xff] }
 0x45f   :  { %1738 = vmatmul.mubr.bf16.vlgmr.msra.gmra.mrb[12].mxu0 %v3087_v34  ;;  %1902 = vmatmul.mubr.bf16.vlgmr.msra.gmra.mrb[16].mxu1 %v3087_v34 }
 0x460   :  { %1747 = vmatpush1.bf16.msra.mxu0 %v1403_v18  ;;  %1911 = vmatpush1.bf16.msra.mxu1 %v1405_v33  ;;  %v1487_v18 = vld [vmem:[#allocation3 + $0x9a0] sm:$0xff]  ;;  %v1489_v33 = vld [vmem:[#allocation3 + $0x9b0] sm:$0xff] }
 0x461   :  { %1748 = vmatprep.subr.bf16.mxu0 %v1411_v35  ;;  %1912 = vmatprep.subr.bf16.mxu1 %v1413_v40  ;;  %v1495_v35 = vld [vmem:[#allocation3 + $0x9e0] sm:$0xff]  ;;  %v1497_v40 = vld [vmem:[#allocation3 + $0x9f0] sm:$0xff] }
 0x462   :  { %1778 = vmatprep.mubr.bf16.mxu0 %v3093_v38  ;;  %1942 = vmatprep.mubr.bf16.mxu1 %v3093_v38 }
 0x464   :  { %1749 = vmatpush1.bf16.msra.mxu0 %v1410_v41  ;;  %1913 = vmatpush1.bf16.msra.mxu1 %v1412_v42  ;;  %v1494_v41 = vld [vmem:[#allocation3 + $0x9d8] sm:$0xff]  ;;  %v1496_v42 = vld [vmem:[#allocation3 + $0x9e8] sm:$0xff] }
 0x465   :  { %1750 = vmatprep.subr.bf16.mxu0 %v1418_v43  ;;  %1914 = vmatprep.subr.bf16.mxu1 %v1420_v44  ;;  %v1502_v43 = vld [vmem:[#allocation3 + $0xa18] sm:$0xff]  ;;  %v1504_v44 = vld [vmem:[#allocation3 + $0xa28] sm:$0xff] }
 0x468   :  { %1751 = vmatpush1.bf16.msra.mxu0 %v1417_v45  ;;  %1915 = vmatpush1.bf16.msra.mxu1 %v1419_v46  ;;  %v1501_v45 = vld [vmem:[#allocation3 + $0xa10] sm:$0xff]  ;;  %v1503_v46 = vld [vmem:[#allocation3 + $0xa20] sm:$0xff] }
 0x469   :  { %1752 = vmatprep.subr.bf16.mxu0 %v1425_v47  ;;  %1916 = vmatprep.subr.bf16.mxu1 %v1427_v48  ;;  %v1509_v47 = vld [vmem:[#allocation3 + $0xa50] sm:$0xff]  ;;  %v1511_v48 = vld [vmem:[#allocation3 + $0xa60] sm:$0xff] }
 0x46c   :  { %1753 = vmatpush1.bf16.msra.mxu0 %v1424_v49  ;;  %1917 = vmatpush1.bf16.msra.mxu1 %v1426_v50  ;;  %v1508_v49 = vld [vmem:[#allocation3 + $0xa48] sm:$0xff]  ;;  %v1510_v50 = vld [vmem:[#allocation3 + $0xa58] sm:$0xff] }
 0x46d   :  { %1754 = vmatprep.subr.bf16.mxu0 %v1432_v60  ;;  %1918 = vmatprep.subr.bf16.mxu1 %v1434_v31  ;;  %v1516_v60 = vld [vmem:[#allocation3 + $0xa88] sm:$0xff]  ;;  %v1518_v31 = vld [vmem:[#allocation3 + $0xa98] sm:$0xff] }
 0x470   :  { %1755 = vmatpush1.bf16.msra.mxu0 %v1431_v61  ;;  %1919 = vmatpush1.bf16.msra.mxu1 %v1433_v62  ;;  %v1515_v61 = vld [vmem:[#allocation3 + $0xa80] sm:$0xff]  ;;  %v1517_v62 = vld [vmem:[#allocation3 + $0xa90] sm:$0xff] }
 0x471   :  { %1756 = vmatprep.subr.bf16.mxu0 %v1439_v63  ;;  %1920 = vmatprep.subr.bf16.mxu1 %v1441_v17  ;;  %v1523_v63 = vld [vmem:[#allocation3 + $0xac0] sm:$0xff]  ;;  %v1525_v17 = vld [vmem:[#allocation3 + $0xad0] sm:$0xff] }
 0x474   :  { %1757 = vmatpush1.bf16.msra.mxu0 %v1438_v0  ;;  %1921 = vmatpush1.bf16.msra.mxu1 %v1440_v1  ;;  %v1522_v0 = vld [vmem:[#allocation3 + $0xab8] sm:$0xff]  ;;  %v1524_v1 = vld [vmem:[#allocation3 + $0xac8] sm:$0xff] }
 0x475   :  { %1758 = vmatprep.subr.bf16.mxu0 %v1446_v2  ;;  %1922 = vmatprep.subr.bf16.mxu1 %v1448_v3  ;;  %v1530_v2 = vld [vmem:[#allocation3 + $0xaf8] sm:$0xff]  ;;  %v1532_v3 = vld [vmem:[#allocation3 + $0xb08] sm:$0xff] }
 0x478   :  { %1759 = vmatpush1.bf16.msra.mxu0 %v1445_v4  ;;  %1923 = vmatpush1.bf16.msra.mxu1 %v1447_v5  ;;  %v1529_v4 = vld [vmem:[#allocation3 + $0xaf0] sm:$0xff]  ;;  %v1531_v5 = vld [vmem:[#allocation3 + $0xb00] sm:$0xff] }
 0x479   :  { %1760 = vmatprep.subr.bf16.mxu0 %v1453_v6  ;;  %1924 = vmatprep.subr.bf16.mxu1 %v1455_v7  ;;  %v1537_v6 = vld [vmem:[#allocation3 + $0xb30] sm:$0xff]  ;;  %v1539_v7 = vld [vmem:[#allocation3 + $0xb40] sm:$0xff] }
 0x47c   :  { %1761 = vmatpush1.bf16.msra.mxu0 %v1452_v8  ;;  %1925 = vmatpush1.bf16.msra.mxu1 %v1454_v9  ;;  %v1536_v8 = vld [vmem:[#allocation3 + $0xb28] sm:$0xff]  ;;  %v1538_v9 = vld [vmem:[#allocation3 + $0xb38] sm:$0xff] }
 0x47d   :  { %1762 = vmatprep.subr.bf16.mxu0 %v1460_v10  ;;  %1926 = vmatprep.subr.bf16.mxu1 %v1462_v13  ;;  %v1544_v10 = vld [vmem:[#allocation3 + $0xb68] sm:$0xff]  ;;  %v1546_v13 = vld [vmem:[#allocation3 + $0xb78] sm:$0xff] }
 0x480   :  { %1763 = vmatpush1.bf16.msra.mxu0 %v1459_v14  ;;  %1927 = vmatpush1.bf16.msra.mxu1 %v1461_v19  ;;  %v1543_v14 = vld [vmem:[#allocation3 + $0xb60] sm:$0xff]  ;;  %v1545_v19 = vld [vmem:[#allocation3 + $0xb70] sm:$0xff] }
 0x481   :  { %1764 = vmatprep.subr.bf16.mxu0 %v1467_v20  ;;  %1928 = vmatprep.subr.bf16.mxu1 %v1469_v21  ;;  %v1551_v20 = vld [vmem:[#allocation3 + $0xba0] sm:$0xff]  ;;  %v1553_v21 = vld [vmem:[#allocation3 + $0xbb0] sm:$0xff] }
 0x484   :  { %1765 = vmatpush1.bf16.msra.mxu0 %v1466_v16  ;;  %1929 = vmatpush1.bf16.msra.mxu1 %v1468_v22  ;;  %v1550_v16 = vld [vmem:[#allocation3 + $0xb98] sm:$0xff]  ;;  %v1552_v22 = vld [vmem:[#allocation3 + $0xba8] sm:$0xff] }
 0x485   :  { %1766 = vmatprep.subr.bf16.mxu0 %v1474_v23  ;;  %1930 = vmatprep.subr.bf16.mxu1 %v1476_v24  ;;  %v1558_v23 = vld [vmem:[#allocation3 + $0xbd8] sm:$0xff]  ;;  %v1560_v24 = vld [vmem:[#allocation3 + $0xbe8] sm:$0xff] }
 0x488   :  { %1767 = vmatpush1.bf16.msra.mxu0 %v1473_v25  ;;  %1931 = vmatpush1.bf16.msra.mxu1 %v1475_v26  ;;  %v1557_v25 = vld [vmem:[#allocation3 + $0xbd0] sm:$0xff]  ;;  %v1559_v26 = vld [vmem:[#allocation3 + $0xbe0] sm:$0xff] }
 0x489   :  { %1768 = vmatprep.subr.bf16.mxu0 %v1481_v27  ;;  %1932 = vmatprep.subr.bf16.mxu1 %v1483_v28  ;;  %v1565_v27 = vld [vmem:[#allocation3 + $0xc10] sm:$0xff]  ;;  %v1567_v28 = vld [vmem:[#allocation3 + $0xc20] sm:$0xff] }
 0x48c   :  { %1769 = vmatpush1.bf16.msra.mxu0 %v1480_v29  ;;  %1933 = vmatpush1.bf16.msra.mxu1 %v1482_v30  ;;  %v1564_v29 = vld [vmem:[#allocation3 + $0xc08] sm:$0xff]  ;;  %v1566_v30 = vld [vmem:[#allocation3 + $0xc18] sm:$0xff] }
 0x48d   :  { %1770 = vmatprep.subr.bf16.mxu0 %v1488_v32  ;;  %1934 = vmatprep.subr.bf16.mxu1 %v1490_v15  ;;  %v1572_v32 = vld [vmem:[#allocation3 + $0xc48] sm:$0xff]  ;;  %v1574_v15 = vld [vmem:[#allocation3 + $0xc58] sm:$0xff] }
 0x490   :  { %1771 = vmatpush1.bf16.msra.mxu0 %v1487_v18  ;;  %1935 = vmatpush1.bf16.msra.mxu1 %v1489_v33  ;;  %v1571_v18 = vld [vmem:[#allocation3 + $0xc40] sm:$0xff]  ;;  %v1573_v33 = vld [vmem:[#allocation3 + $0xc50] sm:$0xff] }
 0x491   :  { %1772 = vmatprep.subr.bf16.mxu0 %v1495_v35  ;;  %1936 = vmatprep.subr.bf16.mxu1 %v1497_v40  ;;  %v1579_v35 = vld [vmem:[#allocation3 + $0xc80] sm:$0xff]  ;;  %v1581_v40 = vld [vmem:[#allocation3 + $0xc90] sm:$0xff] }
 0x494   :  { %1773 = vmatpush1.bf16.msra.mxu0 %v1494_v41  ;;  %1937 = vmatpush1.bf16.msra.mxu1 %v1496_v42  ;;  %v1578_v41 = vld [vmem:[#allocation3 + $0xc78] sm:$0xff]  ;;  %v1580_v42 = vld [vmem:[#allocation3 + $0xc88] sm:$0xff] }
 0x495   :  { %1774 = vmatprep.subr.bf16.mxu0 %v1502_v43  ;;  %1938 = vmatprep.subr.bf16.mxu1 %v1504_v44  ;;  %v1586_v43 = vld [vmem:[#allocation3 + $0xcb8] sm:$0xff]  ;;  %v1588_v44 = vld [vmem:[#allocation3 + $0xcc8] sm:$0xff] }
 0x498   :  { %1775 = vmatpush1.bf16.msra.mxu0 %v1501_v45  ;;  %1939 = vmatpush1.bf16.msra.mxu1 %v1503_v46  ;;  %v1585_v45 = vld [vmem:[#allocation3 + $0xcb0] sm:$0xff]  ;;  %v1587_v46 = vld [vmem:[#allocation3 + $0xcc0] sm:$0xff] }
 0x499   :  { %1776 = vmatprep.subr.bf16.mxu0 %v1509_v47  ;;  %1940 = vmatprep.subr.bf16.mxu1 %v1511_v48  ;;  %v1593_v47 = vld [vmem:[#allocation3 + $0xcf0] sm:$0xff]  ;;  %v1595_v48 = vld [vmem:[#allocation3 + $0xd00] sm:$0xff] }
 0x49c   :  { %1777 = vmatpush1.bf16.msra.mxu0 %v1508_v49  ;;  %1941 = vmatpush1.bf16.msra.mxu1 %v1510_v50  ;;  %v1592_v49 = vld [vmem:[#allocation3 + $0xce8] sm:$0xff]  ;;  %v1594_v50 = vld [vmem:[#allocation3 + $0xcf8] sm:$0xff] }
 0x49d   :  { %1787 = vmatprep.subr.bf16.mxu0 %v1516_v60  ;;  %1951 = vmatprep.subr.bf16.mxu1 %v1518_v31  ;;  %v1600_v60 = vld [vmem:[#allocation3 + $0xd28] sm:$0xff]  ;;  %v1602_v31 = vld [vmem:[#allocation3 + $0xd38] sm:$0xff] }
 0x49f   :  { %1779 = vmatmul.mubr.bf16.vlgmr.msra.gmra.mrb[12].mxu0 %v3091_v37  ;;  %1943 = vmatmul.mubr.bf16.vlgmr.msra.gmra.mrb[16].mxu1 %v3091_v37 }
 0x4a0   :  { %1788 = vmatpush1.bf16.msra.mxu0 %v1515_v61  ;;  %1952 = vmatpush1.bf16.msra.mxu1 %v1517_v62  ;;  %v1599_v61 = vld [vmem:[#allocation3 + $0xd20] sm:$0xff]  ;;  %v1601_v62 = vld [vmem:[#allocation3 + $0xd30] sm:$0xff] }
 0x4a1   :  { %1789 = vmatprep.subr.bf16.mxu0 %v1523_v63  ;;  %1953 = vmatprep.subr.bf16.mxu1 %v1525_v17  ;;  %v1607_v63 = vld [vmem:[#allocation3 + $0xd60] sm:$0xff]  ;;  %v1609_v17 = vld [vmem:[#allocation3 + $0xd70] sm:$0xff] }
 0x4a2   :  { %1819 = vmatprep.mubr.bf16.mxu0 %v3103_v56  ;;  %1983 = vmatprep.mubr.bf16.mxu1 %v3103_v56 }
 0x4a4   :  { %1790 = vmatpush1.bf16.msra.mxu0 %v1522_v0  ;;  %1954 = vmatpush1.bf16.msra.mxu1 %v1524_v1  ;;  %v1606_v0 = vld [vmem:[#allocation3 + $0xd58] sm:$0xff]  ;;  %v1608_v1 = vld [vmem:[#allocation3 + $0xd68] sm:$0xff] }
 0x4a5   :  { %1791 = vmatprep.subr.bf16.mxu0 %v1530_v2  ;;  %1955 = vmatprep.subr.bf16.mxu1 %v1532_v3  ;;  %v1614_v2 = vld [vmem:[#allocation3 + $0xd98] sm:$0xff]  ;;  %v1616_v3 = vld [vmem:[#allocation3 + $0xda8] sm:$0xff] }
 0x4a8   :  { %1792 = vmatpush1.bf16.msra.mxu0 %v1529_v4  ;;  %1956 = vmatpush1.bf16.msra.mxu1 %v1531_v5  ;;  %v1613_v4 = vld [vmem:[#allocation3 + $0xd90] sm:$0xff]  ;;  %v1615_v5 = vld [vmem:[#allocation3 + $0xda0] sm:$0xff] }
 0x4a9   :  { %1793 = vmatprep.subr.bf16.mxu0 %v1537_v6  ;;  %1957 = vmatprep.subr.bf16.mxu1 %v1539_v7  ;;  %v1621_v6 = vld [vmem:[#allocation3 + $0xdd0] sm:$0xff]  ;;  %v1623_v7 = vld [vmem:[#allocation3 + $0xde0] sm:$0xff] }
 0x4ac   :  { %1794 = vmatpush1.bf16.msra.mxu0 %v1536_v8  ;;  %1958 = vmatpush1.bf16.msra.mxu1 %v1538_v9  ;;  %v1620_v8 = vld [vmem:[#allocation3 + $0xdc8] sm:$0xff]  ;;  %v1622_v9 = vld [vmem:[#allocation3 + $0xdd8] sm:$0xff] }
 0x4ad   :  { %1795 = vmatprep.subr.bf16.mxu0 %v1544_v10  ;;  %1959 = vmatprep.subr.bf16.mxu1 %v1546_v13  ;;  %v1184_v10 = vld [vmem:[#allocation3 + $0x28] sm:$0xff]  ;;  %v1241_v13 = vld [vmem:[#allocation3 + $0x1f0] sm:$0xff] }
 0x4b0   :  { %1796 = vmatpush1.bf16.msra.mxu0 %v1543_v14  ;;  %1960 = vmatpush1.bf16.msra.mxu1 %v1545_v19  ;;  %v1183_v14 = vld [vmem:[#allocation3 + $0x20] sm:$0xff]  ;;  %v1185_v19 = vld [vmem:[#allocation3 + $0x30] sm:$0xff] }
 0x4b1   :  { %1797 = vmatprep.subr.bf16.mxu0 %v1551_v20  ;;  %1961 = vmatprep.subr.bf16.mxu1 %v1553_v21  ;;  %v1191_v20 = vld [vmem:[#allocation3 + $0x60] sm:$0xff]  ;;  %v1248_v21 = vld [vmem:[#allocation3 + $0x228] sm:$0xff] }
 0x4b4   :  { %1798 = vmatpush1.bf16.msra.mxu0 %v1550_v16  ;;  %1962 = vmatpush1.bf16.msra.mxu1 %v1552_v22  ;;  %v1190_v16 = vld [vmem:[#allocation3 + $0x58] sm:$0xff]  ;;  %v1192_v22 = vld [vmem:[#allocation3 + $0x68] sm:$0xff] }
 0x4b5   :  { %1799 = vmatprep.subr.bf16.mxu0 %v1558_v23  ;;  %1963 = vmatprep.subr.bf16.mxu1 %v1560_v24  ;;  %v1198_v23 = vld [vmem:[#allocation3 + $0x98] sm:$0xff]  ;;  %v1255_v24 = vld [vmem:[#allocation3 + $0x260] sm:$0xff] }
 0x4b8   :  { %1800 = vmatpush1.bf16.msra.mxu0 %v1557_v25  ;;  %1964 = vmatpush1.bf16.msra.mxu1 %v1559_v26  ;;  %v1197_v25 = vld [vmem:[#allocation3 + $0x90] sm:$0xff]  ;;  %v1199_v26 = vld [vmem:[#allocation3 + $0xa0] sm:$0xff] }
 0x4b9   :  { %1801 = vmatprep.subr.bf16.mxu0 %v1565_v27  ;;  %1965 = vmatprep.subr.bf16.mxu1 %v1567_v28  ;;  %v1205_v27 = vld [vmem:[#allocation3 + $0xd0] sm:$0xff]  ;;  %v1262_v28 = vld [vmem:[#allocation3 + $0x298] sm:$0xff] }
 0x4bc   :  { %1802 = vmatpush1.bf16.msra.mxu0 %v1564_v29  ;;  %1966 = vmatpush1.bf16.msra.mxu1 %v1566_v30  ;;  %v1204_v29 = vld [vmem:[#allocation3 + $0xc8] sm:$0xff]  ;;  %v1206_v30 = vld [vmem:[#allocation3 + $0xd8] sm:$0xff] }
 0x4bd   :  { %1803 = vmatprep.subr.bf16.mxu0 %v1572_v32  ;;  %1967 = vmatprep.subr.bf16.mxu1 %v1574_v15  ;;  %v1212_v32 = vld [vmem:[#allocation3 + $0x108] sm:$0xff]  ;;  %v1269_v15 = vld [vmem:[#allocation3 + $0x2d0] sm:$0xff] }
 0x4c0   :  { %1804 = vmatpush1.bf16.msra.mxu0 %v1571_v18  ;;  %1968 = vmatpush1.bf16.msra.mxu1 %v1573_v33  ;;  %v1213_v18 = vld [vmem:[#allocation3 + $0x110] sm:$0xff]  ;;  %v1219_v33 = vld [vmem:[#allocation3 + $0x140] sm:$0xff] }
 0x4c1   :  { %1805 = vmatprep.subr.bf16.mxu0 %v1579_v35  ;;  %1969 = vmatprep.subr.bf16.mxu1 %v1581_v40  ;;  %v1276_v35 = vld [vmem:[#allocation3 + $0x308] sm:$0xff]  ;;  %v1218_v40 = vld [vmem:[#allocation3 + $0x138] sm:$0xff] }
 0x4c4   :  { %1806 = vmatpush1.bf16.msra.mxu0 %v1578_v41  ;;  %1970 = vmatpush1.bf16.msra.mxu1 %v1580_v42  ;;  %v1220_v41 = vld [vmem:[#allocation3 + $0x148] sm:$0xff]  ;;  %v1226_v42 = vld [vmem:[#allocation3 + $0x178] sm:$0xff] }
 0x4c5   :  { %1807 = vmatprep.subr.bf16.mxu0 %v1586_v43  ;;  %1971 = vmatprep.subr.bf16.mxu1 %v1588_v44  ;;  %v1283_v43 = vld [vmem:[#allocation3 + $0x340] sm:$0xff]  ;;  %v1225_v44 = vld [vmem:[#allocation3 + $0x170] sm:$0xff] }
 0x4c8   :  { %1808 = vmatpush1.bf16.msra.mxu0 %v1585_v45  ;;  %1972 = vmatpush1.bf16.msra.mxu1 %v1587_v46  ;;  %v1227_v45 = vld [vmem:[#allocation3 + $0x180] sm:$0xff]  ;;  %v1233_v46 = vld [vmem:[#allocation3 + $0x1b0] sm:$0xff] }
 0x4c9   :  { %1809 = vmatprep.subr.bf16.mxu0 %v1593_v47  ;;  %1973 = vmatprep.subr.bf16.mxu1 %v1595_v48  ;;  %v1290_v47 = vld [vmem:[#allocation3 + $0x378] sm:$0xff]  ;;  %v1232_v48 = vld [vmem:[#allocation3 + $0x1a8] sm:$0xff] }
 0x4cc   :  { %1810 = vmatpush1.bf16.msra.mxu0 %v1592_v49  ;;  %1974 = vmatpush1.bf16.msra.mxu1 %v1594_v50  ;;  %v1234_v49 = vld [vmem:[#allocation3 + $0x1b8] sm:$0xff]  ;;  %v1240_v50 = vld [vmem:[#allocation3 + $0x1e8] sm:$0xff] }
 0x4cd   :  { %1811 = vmatprep.subr.bf16.mxu0 %v1600_v60  ;;  %1975 = vmatprep.subr.bf16.mxu1 %v1602_v31  ;;  %v1353_v60 = vld [vmem:[#allocation3 + $0x570] sm:$0xff]  ;;  %v1239_v31 = vld [vmem:[#allocation3 + $0x1e0] sm:$0xff] }
 0x4d0   :  { %1812 = vmatpush1.bf16.msra.mxu0 %v1599_v61  ;;  %1976 = vmatpush1.bf16.msra.mxu1 %v1601_v62  ;;  %v1297_v61 = vld [vmem:[#allocation3 + $0x3b0] sm:$0xff]  ;;  %v1247_v62 = vld [vmem:[#allocation3 + $0x220] sm:$0xff] }
 0x4d1   :  { %1813 = vmatprep.subr.bf16.mxu0 %v1607_v63  ;;  %1977 = vmatprep.subr.bf16.mxu1 %v1609_v17  ;;  %v1360_v63 = vld [vmem:[#allocation3 + $0x5a8] sm:$0xff]  ;;  %v1246_v17 = vld [vmem:[#allocation3 + $0x218] sm:$0xff] }
 0x4d4   :  { %1814 = vmatpush1.bf16.msra.mxu0 %v1606_v0  ;;  %1978 = vmatpush1.bf16.msra.mxu1 %v1608_v1  ;;  %v1304_v0 = vld [vmem:[#allocation3 + $0x3e8] sm:$0xff]  ;;  %v1254_v1 = vld [vmem:[#allocation3 + $0x258] sm:$0xff] }
 0x4d5   :  { %1815 = vmatprep.subr.bf16.mxu0 %v1614_v2  ;;  %1979 = vmatprep.subr.bf16.mxu1 %v1616_v3  ;;  %v1367_v2 = vld [vmem:[#allocation3 + $0x5e0] sm:$0xff]  ;;  %v1253_v3 = vld [vmem:[#allocation3 + $0x250] sm:$0xff] }
 0x4d8   :  { %1816 = vmatpush1.bf16.msra.mxu0 %v1613_v4  ;;  %1980 = vmatpush1.bf16.msra.mxu1 %v1615_v5  ;;  %v1311_v4 = vld [vmem:[#allocation3 + $0x420] sm:$0xff]  ;;  %v1261_v5 = vld [vmem:[#allocation3 + $0x290] sm:$0xff] }
 0x4d9   :  { %1817 = vmatprep.subr.bf16.mxu0 %v1621_v6  ;;  %1981 = vmatprep.subr.bf16.mxu1 %v1623_v7  ;;  %v1374_v6 = vld [vmem:[#allocation3 + $0x618] sm:$0xff]  ;;  %v1260_v7 = vld [vmem:[#allocation3 + $0x288] sm:$0xff] }
 0x4dc   :  { %1818 = vmatpush1.bf16.msra.mxu0 %v1620_v8  ;;  %1982 = vmatpush1.bf16.msra.mxu1 %v1622_v9  ;;  %v1318_v8 = vld [vmem:[#allocation3 + $0x458] sm:$0xff]  ;;  %v1268_v9 = vld [vmem:[#allocation3 + $0x2c8] sm:$0xff] }
 0x4dd   :  { %1992 = vmatprep.subr.bf16.mxu0 %v1184_v10  ;;  %2494 = vmatprep.subr.bf16.mxu1 %v1241_v13  ;;  %v1381_v10 = vld [vmem:[#allocation3 + $0x650] sm:$0xff]  ;;  %v1267_v13 = vld [vmem:[#allocation3 + $0x2c0] sm:$0xff] }
 0x4df   :  { %1820 = vmatmul.mubr.bf16.vlgmr.msra.gmra.mrb[12].mxu0 %v3101_v51  ;;  %1984 = vmatmul.mubr.bf16.vlgmr.msra.gmra.mrb[16].mxu1 %v3101_v51 }
 0x4e0   :  { %1993 = vmatpush1.bf16.msra.mxu0 %v1183_v14  ;;  %2495 = vmatpush3.bf16.msra.mxu1 %v1185_v19  ;;  %v1325_v14 = vld [vmem:[#allocation3 + $0x490] sm:$0xff]  ;;  %v1275_v19 = vld [vmem:[#allocation3 + $0x300] sm:$0xff] }
 0x4e1   :  { %1994 = vmatprep.subr.bf16.mxu0 %v1191_v20  ;;  %2496 = vmatprep.subr.bf16.mxu1 %v1248_v21  ;;  %v1388_v20 = vld [vmem:[#allocation3 + $0x688] sm:$0xff]  ;;  %v1274_v21 = vld [vmem:[#allocation3 + $0x2f8] sm:$0xff] }
 0x4e2   :  { %2024 = vmatprep.mubr.bf16.mxu0 %v3072_v59  ;;  %2188 = vmatprep.mubr.bf16.mxu1 %v3072_v59  ;;  %v1211_v59 = vld [vmem:[#allocation3 + $0x100] sm:$0xff] }
 0x4e4   :  { %1995 = vmatpush1.bf16.msra.mxu0 %v1190_v16  ;;  %2497 = vmatpush3.bf16.msra.mxu1 %v1192_v22  ;;  %v1332_v16 = vld [vmem:[#allocation3 + $0x4c8] sm:$0xff]  ;;  %v1282_v22 = vld [vmem:[#allocation3 + $0x338] sm:$0xff] }
 0x4e5   :  { %1996 = vmatprep.subr.bf16.mxu0 %v1198_v23  ;;  %2498 = vmatprep.subr.bf16.mxu1 %v1255_v24  ;;  %v1395_v23 = vld [vmem:[#allocation3 + $0x6c0] sm:$0xff]  ;;  %v1281_v24 = vld [vmem:[#allocation3 + $0x330] sm:$0xff] }
 0x4e8   :  { %1997 = vmatpush1.bf16.msra.mxu0 %v1197_v25  ;;  %2499 = vmatpush3.bf16.msra.mxu1 %v1199_v26  ;;  %v1339_v25 = vld [vmem:[#allocation3 + $0x500] sm:$0xff]  ;;  %v1289_v26 = vld [vmem:[#allocation3 + $0x370] sm:$0xff] }
 0x4e9   :  { %1998 = vmatprep.subr.bf16.mxu0 %v1205_v27  ;;  %2500 = vmatprep.subr.bf16.mxu1 %v1262_v28  ;;  %v1402_v27 = vld [vmem:[#allocation3 + $0x6f8] sm:$0xff]  ;;  %v1288_v28 = vld [vmem:[#allocation3 + $0x368] sm:$0xff] }
 0x4ec   :  { %1999 = vmatpush1.bf16.msra.mxu0 %v1204_v29  ;;  %2501 = vmatpush3.bf16.msra.mxu1 %v1206_v30  ;;  %v1346_v29 = vld [vmem:[#allocation3 + $0x538] sm:$0xff]  ;;  %v1296_v30 = vld [vmem:[#allocation3 + $0x3a8] sm:$0xff] }
 0x4ed   :  { %2000 = vmatprep.subr.bf16.mxu0 %v1212_v32  ;;  %2502 = vmatprep.subr.bf16.mxu1 %v1269_v15  ;;  %v1465_v32 = vld [vmem:[#allocation3 + $0x8f0] sm:$0xff]  ;;  %v1295_v15 = vld [vmem:[#allocation3 + $0x3a0] sm:$0xff] }
 0x4f0   :  { %2001 = vmatpush1.bf16.msra.mxu0 %v1211_v59  ;;  %2503 = vmatpush3.bf16.msra.mxu1 %v1213_v18  ;;  %v1409_v59 = vld [vmem:[#allocation3 + $0x730] sm:$0xff]  ;;  %v1303_v18 = vld [vmem:[#allocation3 + $0x3e0] sm:$0xff] }
 0x4f1   :  { %2002 = vmatprep.subr.bf16.mxu0 %v1219_v33  ;;  %2504 = vmatprep.subr.bf16.mxu1 %v1276_v35  ;;  %v1472_v33 = vld [vmem:[#allocation3 + $0x928] sm:$0xff]  ;;  %v1302_v35 = vld [vmem:[#allocation3 + $0x3d8] sm:$0xff] }
 0x4f4   :  { %2003 = vmatpush1.bf16.msra.mxu0 %v1218_v40  ;;  %2505 = vmatpush3.bf16.msra.mxu1 %v1220_v41  ;;  %v1416_v40 = vld [vmem:[#allocation3 + $0x768] sm:$0xff]  ;;  %v1310_v41 = vld [vmem:[#allocation3 + $0x418] sm:$0xff] }
 0x4f5   :  { %2004 = vmatprep.subr.bf16.mxu0 %v1226_v42  ;;  %2506 = vmatprep.subr.bf16.mxu1 %v1283_v43  ;;  %v1479_v42 = vld [vmem:[#allocation3 + $0x960] sm:$0xff]  ;;  %v1309_v43 = vld [vmem:[#allocation3 + $0x410] sm:$0xff] }
 0x4f8   :  { %2005 = vmatpush1.bf16.msra.mxu0 %v1225_v44  ;;  %2507 = vmatpush3.bf16.msra.mxu1 %v1227_v45  ;;  %v1317_v44 = vld [vmem:[#allocation3 + $0x450] sm:$0xff]  ;;  %v1486_v45 = vld [vmem:[#allocation3 + $0x998] sm:$0xff] }
 0x4f9   :  { %2006 = vmatprep.subr.bf16.mxu0 %v1233_v46  ;;  %2508 = vmatprep.subr.bf16.mxu1 %v1290_v47  ;;  %v1316_v46 = vld [vmem:[#allocation3 + $0x448] sm:$0xff]  ;;  %v1430_v47 = vld [vmem:[#allocation3 + $0x7d8] sm:$0xff] }
 0x4fc   :  { %2007 = vmatpush1.bf16.msra.mxu0 %v1232_v48  ;;  %2509 = vmatpush3.bf16.msra.mxu1 %v1234_v49  ;;  %v1324_v48 = vld [vmem:[#allocation3 + $0x488] sm:$0xff]  ;;  %v1493_v49 = vld [vmem:[#allocation3 + $0x9d0] sm:$0xff] }
 0x4fd   :  { %2008 = vmatprep.subr.bf16.mxu0 %v1240_v50  ;;  %2516 = vmatprep.subr.bf16.mxu1 %v1353_v60  ;;  %v1437_v50 = vld [vmem:[#allocation3 + $0x810] sm:$0xff]  ;;  %v1331_v60 = vld [vmem:[#allocation3 + $0x4c0] sm:$0xff] }
 0x4ff   :  { %2189 = vmatmul.mubr.bf16.vlgmr.msra.gmra.mrb[20].mxu1 %v3070_v52 }
 0x500   :  { %2009 = vmatpush1.bf16.msra.mxu0 %v1239_v31  ;;  %2517 = vmatpush3.bf16.msra.mxu1 %v1297_v61  ;;  %v1500_v31 = vld [vmem:[#allocation3 + $0xa08] sm:$0xff]  ;;  %v1330_v61 = vld [vmem:[#allocation3 + $0x4b8] sm:$0xff] }
 0x501   :  { %2010 = vmatprep.subr.bf16.mxu0 %v1247_v62  ;;  %2518 = vmatprep.subr.bf16.mxu1 %v1360_v63  ;;  %v1444_v62 = vld [vmem:[#allocation3 + $0x848] sm:$0xff]  ;;  %v1338_v63 = vld [vmem:[#allocation3 + $0x4f8] sm:$0xff] }
 0x502   :  { %2228 = vmatprep.mubr.bf16.mxu1 %v3089_v36 }
 0x504   :  { %2011 = vmatpush1.bf16.msra.mxu0 %v1246_v17  ;;  %2519 = vmatpush3.bf16.msra.mxu1 %v1304_v0  ;;  %v1507_v17 = vld [vmem:[#allocation3 + $0xa40] sm:$0xff]  ;;  %v1337_v0 = vld [vmem:[#allocation3 + $0x4f0] sm:$0xff] }
 0x505   :  { %2012 = vmatprep.subr.bf16.mxu0 %v1254_v1  ;;  %2520 = vmatprep.subr.bf16.mxu1 %v1367_v2  ;;  %v1451_v1 = vld [vmem:[#allocation3 + $0x880] sm:$0xff]  ;;  %v1345_v2 = vld [vmem:[#allocation3 + $0x530] sm:$0xff] }
 0x508   :  { %2013 = vmatpush1.bf16.msra.mxu0 %v1253_v3  ;;  %2521 = vmatpush3.bf16.msra.mxu1 %v1311_v4  ;;  %v1514_v3 = vld [vmem:[#allocation3 + $0xa78] sm:$0xff]  ;;  %v1344_v4 = vld [vmem:[#allocation3 + $0x528] sm:$0xff] }
 0x509   :  { %2014 = vmatprep.subr.bf16.mxu0 %v1261_v5  ;;  %2522 = vmatprep.subr.bf16.mxu1 %v1374_v6  ;;  %v1458_v5 = vld [vmem:[#allocation3 + $0x8b8] sm:$0xff]  ;;  %v1352_v6 = vld [vmem:[#allocation3 + $0x568] sm:$0xff] }
 0x50c   :  { %2015 = vmatpush1.bf16.msra.mxu0 %v1260_v7  ;;  %2523 = vmatpush3.bf16.msra.mxu1 %v1318_v8  ;;  %v1577_v7 = vld [vmem:[#allocation3 + $0xc70] sm:$0xff]  ;;  %v1351_v8 = vld [vmem:[#allocation3 + $0x560] sm:$0xff] }
 0x50d   :  { %2016 = vmatprep.subr.bf16.mxu0 %v1268_v9  ;;  %2524 = vmatprep.subr.bf16.mxu1 %v1381_v10  ;;  %v1521_v9 = vld [vmem:[#allocation3 + $0xab0] sm:$0xff]  ;;  %v1359_v10 = vld [vmem:[#allocation3 + $0x5a0] sm:$0xff] }
 0x510   :  { %2017 = vmatpush1.bf16.msra.mxu0 %v1267_v13  ;;  %2525 = vmatpush3.bf16.msra.mxu1 %v1325_v14  ;;  %v1584_v13 = vld [vmem:[#allocation3 + $0xca8] sm:$0xff]  ;;  %v1358_v14 = vld [vmem:[#allocation3 + $0x598] sm:$0xff] }
 0x511   :  { %2018 = vmatprep.subr.bf16.mxu0 %v1275_v19  ;;  %2526 = vmatprep.subr.bf16.mxu1 %v1388_v20  ;;  %v1528_v19 = vld [vmem:[#allocation3 + $0xae8] sm:$0xff]  ;;  %v1366_v20 = vld [vmem:[#allocation3 + $0x5d8] sm:$0xff] }
 0x514   :  { %2019 = vmatpush1.bf16.msra.mxu0 %v1274_v21  ;;  %2527 = vmatpush3.bf16.msra.mxu1 %v1332_v16  ;;  %v1591_v21 = vld [vmem:[#allocation3 + $0xce0] sm:$0xff]  ;;  %v1365_v16 = vld [vmem:[#allocation3 + $0x5d0] sm:$0xff] }
 0x515   :  { %2020 = vmatprep.subr.bf16.mxu0 %v1282_v22  ;;  %2528 = vmatprep.subr.bf16.mxu1 %v1395_v23  ;;  %v1535_v22 = vld [vmem:[#allocation3 + $0xb20] sm:$0xff]  ;;  %v1373_v23 = vld [vmem:[#allocation3 + $0x610] sm:$0xff] }
 0x518   :  { %2021 = vmatpush1.bf16.msra.mxu0 %v1281_v24  ;;  %2529 = vmatpush3.bf16.msra.mxu1 %v1339_v25  ;;  %v1598_v24 = vld [vmem:[#allocation3 + $0xd18] sm:$0xff]  ;;  %v1372_v25 = vld [vmem:[#allocation3 + $0x608] sm:$0xff] }
 0x519   :  { %2022 = vmatprep.subr.bf16.mxu0 %v1289_v26  ;;  %2530 = vmatprep.subr.bf16.mxu1 %v1402_v27  ;;  %v1542_v26 = vld [vmem:[#allocation3 + $0xb58] sm:$0xff]  ;;  %v1380_v27 = vld [vmem:[#allocation3 + $0x648] sm:$0xff] }
 0x51c   :  { %2023 = vmatpush1.bf16.msra.mxu0 %v1288_v28  ;;  %2531 = vmatpush3.bf16.msra.mxu1 %v1346_v29  ;;  %v1605_v28 = vld [vmem:[#allocation3 + $0xd50] sm:$0xff]  ;;  %v1379_v29 = vld [vmem:[#allocation3 + $0x640] sm:$0xff] }
 0x51d   :  { %2033 = vmatprep.subr.bf16.mxu0 %v1296_v30  ;;  %2538 = vmatprep.subr.bf16.mxu1 %v1465_v32  ;;  %v1549_v30 = vld [vmem:[#allocation3 + $0xb90] sm:$0xff]  ;;  %v1387_v32 = vld [vmem:[#allocation3 + $0x680] sm:$0xff] }
 0x51f   :  { %2025 = vmatmul.mubr.bf16.vlgmr.msra.gmra.mrb[16].mxu0 %v3070_v52  ;;  %2229 = vmatmul.mubr.bf16.vlgmr.msra.gmra.mrb[24].mxu1 %v3087_v34  ;;  %v1423_v52 = vld [vmem:[#allocation3 + $0x7a0] sm:$0xff] }
 0x520   :  { %2034 = vmatpush1.bf16.msra.mxu0 %v1295_v15  ;;  %2539 = vmatpush3.bf16.msra.mxu1 %v1409_v59  ;;  %v1612_v15 = vld [vmem:[#allocation3 + $0xd88] sm:$0xff]  ;;  %v1386_v59 = vld [vmem:[#allocation3 + $0x678] sm:$0xff] }
 0x521   :  { %2035 = vmatprep.subr.bf16.mxu0 %v1303_v18  ;;  %2540 = vmatprep.subr.bf16.mxu1 %v1472_v33  ;;  %v1556_v18 = vld [vmem:[#allocation3 + $0xbc8] sm:$0xff]  ;;  %v1394_v33 = vld [vmem:[#allocation3 + $0x6b8] sm:$0xff] }
 0x522   :  { %2065 = vmatprep.mubr.bf16.mxu0 %v3089_v36  ;;  %2268 = vmatprep.mubr.bf16.mxu1 %v3093_v38  ;;  %v1323_v36 = vld [vmem:[#allocation3 + $0x480] sm:$0xff] }
 0x524   :  { %2036 = vmatpush1.bf16.msra.mxu0 %v1302_v35  ;;  %2541 = vmatpush3.bf16.msra.mxu1 %v1416_v40  ;;  %v1619_v35 = vld [vmem:[#allocation3 + $0xdc0] sm:$0xff]  ;;  %v1393_v40 = vld [vmem:[#allocation3 + $0x6b0] sm:$0xff] }
 0x525   :  { %2037 = vmatprep.subr.bf16.mxu0 %v1310_v41  ;;  %2542 = vmatprep.subr.bf16.mxu1 %v1479_v42  ;;  %v1563_v41 = vld [vmem:[#allocation3 + $0xc00] sm:$0xff]  ;;  %v1401_v42 = vld [vmem:[#allocation3 + $0x6f0] sm:$0xff] }
 0x528   :  { %2038 = vmatpush1.bf16.msra.mxu0 %v1309_v43  ;;  %2543 = vmatpush3.bf16.msra.mxu1 %v1423_v52  ;;  %v1626_v43 = vld [vmem:[#allocation3 + $0xdf8] sm:$0xff]  ;;  %v1400_v52 = vld [vmem:[#allocation3 + $0x6e8] sm:$0xff] }
 0x529   :  { %2039 = vmatprep.subr.bf16.mxu0 %v1317_v44  ;;  %2544 = vmatprep.subr.bf16.mxu1 %v1486_v45  ;;  %v1570_v44 = vld [vmem:[#allocation3 + $0xc38] sm:$0xff]  ;;  %v1408_v45 = vld [vmem:[#allocation3 + $0x728] sm:$0xff] }
 0x52c   :  { %2040 = vmatpush1.bf16.msra.mxu0 %v1316_v46  ;;  %2545 = vmatpush3.bf16.msra.mxu1 %v1430_v47  ;;  %v1407_v46 = vld [vmem:[#allocation3 + $0x720] sm:$0xff] }
 0x52d   :  { %2041 = vmatprep.subr.bf16.mxu0 %v1324_v48  ;;  %2546 = vmatprep.subr.bf16.mxu1 %v1493_v49  ;;  %v1415_v47 = vld [vmem:[#allocation3 + $0x760] sm:$0xff]  ;;  %v1414_v48 = vld [vmem:[#allocation3 + $0x758] sm:$0xff] }
 0x52e   :  { %v1422_v49 = vld [vmem:[#allocation3 + $0x798] sm:$0xff] }
 0x530   :  { %2042 = vmatpush1.bf16.msra.mxu0 %v1323_v36  ;;  %2547 = vmatpush3.bf16.msra.mxu1 %v1437_v50  ;;  %v1421_v36 = vld [vmem:[#allocation3 + $0x790] sm:$0xff] }
 0x531   :  { %2043 = vmatprep.subr.bf16.mxu0 %v1331_v60  ;;  %2548 = vmatprep.subr.bf16.mxu1 %v1500_v31  ;;  %v1429_v50 = vld [vmem:[#allocation3 + $0x7d0] sm:$0xff]  ;;  %v1428_v60 = vld [vmem:[#allocation3 + $0x7c8] sm:$0xff] }
 0x532   :  { %v1436_v31 = vld [vmem:[#allocation3 + $0x808] sm:$0xff] }
 0x534   :  { %2044 = vmatpush1.bf16.msra.mxu0 %v1330_v61  ;;  %2549 = vmatpush3.bf16.msra.mxu1 %v1444_v62  ;;  %v1435_v61 = vld [vmem:[#allocation3 + $0x800] sm:$0xff]  ;;  %v1442_v62 = vld [vmem:[#allocation3 + $0x838] sm:$0xff] }
 0x535   :  { %2045 = vmatprep.subr.bf16.mxu0 %v1338_v63  ;;  %2550 = vmatprep.subr.bf16.mxu1 %v1507_v17  ;;  %v1450_v63 = vld [vmem:[#allocation3 + $0x878] sm:$0xff]  ;;  %v1457_v17 = vld [vmem:[#allocation3 + $0x8b0] sm:$0xff] }
 0x538   :  { %2046 = vmatpush1.bf16.msra.mxu0 %v1337_v0  ;;  %2551 = vmatpush3.bf16.msra.mxu1 %v1451_v1  ;;  %v1456_v0 = vld [vmem:[#allocation3 + $0x8a8] sm:$0xff] }
 0x539   :  { %2047 = vmatprep.subr.bf16.mxu0 %v1345_v2  ;;  %2552 = vmatprep.subr.bf16.mxu1 %v1514_v3  ;;  %v1464_v1 = vld [vmem:[#allocation3 + $0x8e8] sm:$0xff]  ;;  %v1463_v2 = vld [vmem:[#allocation3 + $0x8e0] sm:$0xff] }
 0x53a   :  { %v1471_v3 = vld [vmem:[#allocation3 + $0x920] sm:$0xff] }
 0x53c   :  { %2048 = vmatpush1.bf16.msra.mxu0 %v1344_v4  ;;  %2553 = vmatpush3.bf16.msra.mxu1 %v1458_v5  ;;  %v1470_v4 = vld [vmem:[#allocation3 + $0x918] sm:$0xff] }
 0x53d   :  { %2049 = vmatprep.subr.bf16.mxu0 %v1352_v6  ;;  %2560 = vmatprep.subr.bf16.mxu1 %v1577_v7  ;;  %v1478_v5 = vld [vmem:[#allocation3 + $0x958] sm:$0xff]  ;;  %v1477_v6 = vld [vmem:[#allocation3 + $0x950] sm:$0xff] }
 0x53e   :  { %v1485_v7 = vld [vmem:[#allocation3 + $0x990] sm:$0xff] }
 0x53f   :  { %2269 = vmatmul.mubr.bf16.vlgmr.msra.gmra.mrb[28].mxu1 %v3091_v37 }
 0x540   :  { %2050 = vmatpush1.bf16.msra.mxu0 %v1351_v8  ;;  %2561 = vmatpush3.bf16.msra.mxu1 %v1521_v9  ;;  %v1484_v8 = vld [vmem:[#allocation3 + $0x988] sm:$0xff] }
 0x541   :  { %2051 = vmatprep.subr.bf16.mxu0 %v1359_v10  ;;  %2562 = vmatprep.subr.bf16.mxu1 %v1584_v13  ;;  %v1492_v9 = vld [vmem:[#allocation3 + $0x9c8] sm:$0xff]  ;;  %v1491_v10 = vld [vmem:[#allocation3 + $0x9c0] sm:$0xff] }
 0x542   :  { %2308 = vmatprep.mubr.bf16.mxu1 %v3103_v56  ;;  %v1499_v13 = vld [vmem:[#allocation3 + $0xa00] sm:$0xff] }
 0x544   :  { %2052 = vmatpush1.bf16.msra.mxu0 %v1358_v14  ;;  %2563 = vmatpush3.bf16.msra.mxu1 %v1528_v19  ;;  %v1498_v14 = vld [vmem:[#allocation3 + $0x9f8] sm:$0xff] }
 0x545   :  { %2053 = vmatprep.subr.bf16.mxu0 %v1366_v20  ;;  %2564 = vmatprep.subr.bf16.mxu1 %v1591_v21  ;;  %v1506_v19 = vld [vmem:[#allocation3 + $0xa38] sm:$0xff]  ;;  %v1505_v20 = vld [vmem:[#allocation3 + $0xa30] sm:$0xff] }
 0x546   :  { %v1513_v21 = vld [vmem:[#allocation3 + $0xa70] sm:$0xff] }
 0x548   :  { %2054 = vmatpush1.bf16.msra.mxu0 %v1365_v16  ;;  %2565 = vmatpush3.bf16.msra.mxu1 %v1535_v22  ;;  %v1512_v16 = vld [vmem:[#allocation3 + $0xa68] sm:$0xff] }
 0x549   :  { %2055 = vmatprep.subr.bf16.mxu0 %v1373_v23  ;;  %2566 = vmatprep.subr.bf16.mxu1 %v1598_v24  ;;  %v1520_v22 = vld [vmem:[#allocation3 + $0xaa8] sm:$0xff]  ;;  %v1519_v23 = vld [vmem:[#allocation3 + $0xaa0] sm:$0xff] }
 0x54a   :  { %v1527_v24 = vld [vmem:[#allocation3 + $0xae0] sm:$0xff] }
 0x54c   :  { %2056 = vmatpush1.bf16.msra.mxu0 %v1372_v25  ;;  %2567 = vmatpush3.bf16.msra.mxu1 %v1542_v26  ;;  %v1526_v25 = vld [vmem:[#allocation3 + $0xad8] sm:$0xff] }
 0x54d   :  { %2057 = vmatprep.subr.bf16.mxu0 %v1380_v27  ;;  %2568 = vmatprep.subr.bf16.mxu1 %v1605_v28  ;;  %v1534_v26 = vld [vmem:[#allocation3 + $0xb18] sm:$0xff]  ;;  %v1533_v27 = vld [vmem:[#allocation3 + $0xb10] sm:$0xff] }
 0x54e   :  { %v1541_v28 = vld [vmem:[#allocation3 + $0xb50] sm:$0xff] }
 0x550   :  { %2058 = vmatpush1.bf16.msra.mxu0 %v1379_v29  ;;  %2569 = vmatpush3.bf16.msra.mxu1 %v1549_v30  ;;  %v1540_v29 = vld [vmem:[#allocation3 + $0xb48] sm:$0xff] }
 0x551   :  { %2059 = vmatprep.subr.bf16.mxu0 %v1387_v32  ;;  %2570 = vmatprep.subr.bf16.mxu1 %v1612_v15  ;;  %v1548_v30 = vld [vmem:[#allocation3 + $0xb88] sm:$0xff]  ;;  %v1547_v15 = vld [vmem:[#allocation3 + $0xb80] sm:$0xff] }
 0x552   :  { %v3136_v32 = vld [vmem:[#allocation11] sm:$0xff] }
 0x554   :  { %2060 = vmatpush1.bf16.msra.mxu0 %v1386_v59  ;;  %2571 = vmatpush3.bf16.msra.mxu1 %v1556_v18  ;;  %v1640_v59 = vrot.slane %v3136_v32, %v3029_v55  ;;  %v1636_v18 = vrot.slane %v3136_v32, %v3032_v57 }
 0x555   :  { %2061 = vmatprep.subr.bf16.mxu0 %v1394_v33  ;;  %2572 = vmatprep.subr.bf16.mxu1 %v1619_v35  ;;  %v1644_v33 = vrot.slane %v3136_v32, %v3035_v58  ;;  %v1554_v35 = vld [vmem:[#allocation3 + $0xbb8] sm:$0xff] }
 0x558   :  { %2062 = vmatpush1.bf16.msra.mxu0 %v1393_v40  ;;  %2573 = vmatpush3.bf16.msra.mxu1 %v1563_v41 }
 0x559   :  { %2063 = vmatprep.subr.bf16.mxu0 %v1401_v42  ;;  %2574 = vmatprep.subr.bf16.mxu1 %v1626_v43  ;;  %v1562_v42 = vld [vmem:[#allocation3 + $0xbf8] sm:$0xff] }
 0x55c   :  { %2064 = vmatpush1.bf16.msra.mxu0 %v1400_v52  ;;  %2575 = vmatpush3.bf16.msra.mxu1 %v1570_v44 }
 0x55d   :  { %2074 = vmatprep.subr.bf16.mxu0 %v1408_v45 }
 0x55f   :  { %2066 = vmatmul.mubr.bf16.vlgmr.msra.gmra.mrb[16].mxu0 %v3087_v34  ;;  %2309 = vmatmul.mubr.bf16.vlgmr.msra.gmra.mrb[32].mxu1 %v3101_v51  ;;  %v1443_v34 = vld [vmem:[#allocation3 + $0x840] sm:$0xff] }
 0x560   :  { %2075 = vmatpush1.bf16.msra.mxu0 %v1407_v46  ;;  %2106 = vmatprep.mubr.bf16.mxu0 %v3093_v38  ;;  %v1449_v38 = vld [vmem:[#allocation3 + $0x870] sm:$0xff] }
 0x561   :  { %2076 = vmatprep.subr.bf16.mxu0 %v1415_v47 }
 0x564   :  { %2077 = vmatpush1.bf16.msra.mxu0 %v1414_v48  ;;  %v1561_v48 = vld [vmem:[#allocation3 + $0xbf0] sm:$0xff] }
 0x565   :  { %2078 = vmatprep.subr.bf16.mxu0 %v1422_v49 }
 0x568   :  { %2079 = vmatpush1.bf16.msra.mxu0 %v1421_v36 }
 0x569   :  { %2080 = vmatprep.subr.bf16.mxu0 %v1429_v50 }
 0x56c   :  { %2081 = vmatpush1.bf16.msra.mxu0 %v1428_v60 }
 0x56d   :  { %2082 = vmatprep.subr.bf16.mxu0 %v1436_v31  ;;  %v1569_v31 = vld [vmem:[#allocation3 + $0xc30] sm:$0xff] }
 0x570   :  { %2083 = vmatpush1.bf16.msra.mxu0 %v1435_v61  ;;  %v1568_v61 = vld [vmem:[#allocation3 + $0xc28] sm:$0xff] }
 0x571   :  { %2084 = vmatprep.subr.bf16.mxu0 %v1443_v34  ;;  %v1576_v34 = vld [vmem:[#allocation3 + $0xc68] sm:$0xff] }
 0x574   :  { %2085 = vmatpush1.bf16.msra.mxu0 %v1442_v62  ;;  %v1575_v62 = vld [vmem:[#allocation3 + $0xc60] sm:$0xff] }
 0x575   :  { %2086 = vmatprep.subr.bf16.mxu0 %v1450_v63  ;;  %v1583_v63 = vld [vmem:[#allocation3 + $0xca0] sm:$0xff] }
 0x578   :  { %2087 = vmatpush1.bf16.msra.mxu0 %v1449_v38 }
 0x579   :  { %2088 = vmatprep.subr.bf16.mxu0 %v1457_v17  ;;  %v1582_v17 = vld [vmem:[#allocation3 + $0xc98] sm:$0xff] }
 0x57c   :  { %2089 = vmatpush1.bf16.msra.mxu0 %v1456_v0 }
 0x57d   :  { %2090 = vmatprep.subr.bf16.mxu0 %v1464_v1 }
 0x580   :  { %2091 = vmatpush1.bf16.msra.mxu0 %v1463_v2  ;;  %v1590_v2 = vld [vmem:[#allocation3 + $0xcd8] sm:$0xff] }
 0x581   :  { %2092 = vmatprep.subr.bf16.mxu0 %v1471_v3 }
 0x584   :  { %2093 = vmatpush1.bf16.msra.mxu0 %v1470_v4 }
 0x585   :  { %2094 = vmatprep.subr.bf16.mxu0 %v1478_v5 }
 0x588   :  { %2095 = vmatpush1.bf16.msra.mxu0 %v1477_v6 }
 0x589   :  { %2096 = vmatprep.subr.bf16.mxu0 %v1485_v7 }
 0x58c   :  { %2097 = vmatpush1.bf16.msra.mxu0 %v1484_v8  ;;  %v1589_v8 = vld [vmem:[#allocation3 + $0xcd0] sm:$0xff] }
 0x58d   :  { %2098 = vmatprep.subr.bf16.mxu0 %v1492_v9  ;;  %v1597_v9 = vld [vmem:[#allocation3 + $0xd10] sm:$0xff] }
 0x590   :  { %2099 = vmatpush1.bf16.msra.mxu0 %v1491_v10  ;;  %v2905_v10 = vmov 1983009808  }
 0x591   :  { %2100 = vmatprep.subr.bf16.mxu0 %v1499_v13  ;;  %v2368_v13 = vunpack.c.l.s4 %v2905_v10 }
 0x594   :  { %2101 = vmatpush1.bf16.msra.mxu0 %v1498_v14  ;;  %v1596_v14 = vld [vmem:[#allocation3 + $0xd08] sm:$0xff] }
 0x595   :  { %2102 = vmatprep.subr.bf16.mxu0 %v1506_v19  ;;  %v1604_v19 = vld [vmem:[#allocation3 + $0xd48] sm:$0xff] }
 0x598   :  { %2103 = vmatpush1.bf16.msra.mxu0 %v1505_v20  ;;  %v2369_v20 = vunpack.c.0.s8 %v2368_v13 }
 0x599   :  { %2104 = vmatprep.subr.bf16.mxu0 %v1513_v21  ;;  %v1603_v21 = vld [vmem:[#allocation3 + $0xd40] sm:$0xff] }
 0x59c   :  { %2105 = vmatpush1.bf16.msra.mxu0 %v1512_v16 }
 0x59d   :  { %2115 = vmatprep.subr.bf16.mxu0 %v1520_v22  ;;  %v1611_v22 = vld [vmem:[#allocation3 + $0xd80] sm:$0xff] }
 0x59f   :  { %2107 = vmatmul.mubr.bf16.vlgmr.msra.gmra.mrb[16].mxu0 %v3091_v37  ;;  %v1555_v37 = vld [vmem:[#allocation3 + $0xbc0] sm:$0xff] }
 0x5a0   :  { %2116 = vmatpush1.bf16.msra.mxu0 %v1519_v23  ;;  %2147 = vmatprep.mubr.bf16.mxu0 %v3103_v56  ;;  %v1632_v56 = vrot.slane %v3136_v32, %v3026_v54 }
 0x5a1   :  { %2117 = vmatprep.subr.bf16.mxu0 %v1527_v24  ;;  %v3147_v24 = vsub.s32 %v2369_v20, %v3023_v53 }
 0x5a4   :  { %2118 = vmatpush1.bf16.msra.mxu0 %v1526_v25 }
 0x5a5   :  { %2119 = vmatprep.subr.bf16.mxu0 %v1534_v26 }
 0x5a8   :  { %2120 = vmatpush1.bf16.msra.mxu0 %v1533_v27  ;;  %v1610_v27 = vld [vmem:[#allocation3 + $0xd78] sm:$0xff] }
 0x5a9   :  { %2121 = vmatprep.subr.bf16.mxu0 %v1541_v28 }
 0x5ac   :  { %2122 = vmatpush1.bf16.msra.mxu0 %v1540_v29  ;;  %v1618_v29 = vld [vmem:[#allocation3 + $0xdb8] sm:$0xff] }
 0x5ad   :  { %2123 = vmatprep.subr.bf16.mxu0 %v1548_v30 }
 0x5b0   :  { %2124 = vmatpush1.bf16.msra.mxu0 %v1547_v15 }
 0x5b1   :  { %2125 = vmatprep.subr.bf16.mxu0 %v1555_v37 }
 0x5b2   :  { %v1821_v40 = vpop.f32.mrb[12].mxu0  ;;  %v1985_v41 = vpop.f32.mrb[16].mxu1 }
 0x5b3   :  { %v2592_v43 = vadd.f32 %v1821_v40, %v1632_v56  ;;  %v2594_v52 = vadd.f32 %v1985_v41, %v1640_v59  ;;  %v1823_v44 = vpop.f32.mrb[13].mxu0  ;;  %v1987_v45 = vpop.f32.mrb[17].mxu1  ;;  %v1625_v41 = vld [vmem:[#allocation3 + $0xdf0] sm:$0xff] }
 0x5b4   :  { %v2593_v54 = vadd.f32 %v1823_v44, %v1636_v18  ;;  %v2595_v46 = vadd.f32 %v1987_v45, %v1644_v33  ;;  %v1825_v47 = vpop.f32.mrb[14].mxu0  ;;  %v1989_v55 = vpop.f32.mrb[18].mxu1  ;;  %2126 = vmatpush1.bf16.msra.mxu0 %v1554_v35  ;;  %v1617_v35 = vld [vmem:[#allocation3 + $0xdb0] sm:$0xff] }
 0x5b5   :  { %v2485_v49 = vmul.f32 -1.442695, %v2592_v43  ;;  %v2487_v57 = vmul.f32 -1.442695, %v2594_v52  ;;  %v1826_v36 = vpop.f32.mrb[15].mxu0  ;;  %v1990_v50 = vpop.f32.mrb[19].mxu1  ;;  %2127 = vmatprep.subr.bf16.mxu0 %v1562_v42  ;;  %v1656_v52 = vrot.slane %v3136_v32, %v817_v39 }
 0x5b6   :  { %v2486_v58 = vmul.f32 -1.442695, %v2593_v54  ;;  %v2488_v60 = vmul.f32 -1.442695, %v2595_v46  ;;  %v1624_v43 = vld [vmem:[#allocation3 + $0xde8] sm:$0xff] }
 0x5b7   :  { %2732 = vpow2.f32 %v2485_v49 }
 0x5b8   :  { %2734 = vpow2.f32 %v2487_v57  ;;  %2128 = vmatpush1.bf16.msra.mxu0 %v1561_v48 }
 0x5b9   :  { %2736 = vpow2.f32 %v2486_v58  ;;  %2129 = vmatprep.subr.bf16.mxu0 %v1569_v31 }
 0x5ba   :  { %2738 = vpow2.f32 %v2488_v60 }
 0x5bc   :  { %2130 = vmatpush1.bf16.msra.mxu0 %v1568_v61 }
 0x5bd   :  { %2131 = vmatprep.subr.bf16.mxu0 %v1576_v34 }
 0x5c0   :  { %2132 = vmatpush1.bf16.msra.mxu0 %v1575_v62 }
 0x5c1   :  { %v2733_v38 = vpop.eup %2732  ;;  %2133 = vmatprep.subr.bf16.mxu0 %v1583_v63 }
 0x5c2   :  { %v2735_v0 = vpop.eup %2734  ;;  %v2337_v1 = vadd.f32 1.0, %v2733_v38  ;;  %v1648_v38 = vrot.slane %v3136_v32, %v809_v11 }
 0x5c3   :  { %v2737_v3 = vpop.eup %2736  ;;  %v2339_v4 = vadd.f32 1.0, %v2735_v0 }
 0x5c4   :  { %v2739_v5 = vpop.eup %2738  ;;  %2740 = vrcp.f32 %v2337_v1  ;;  %v2338_v6 = vadd.f32 1.0, %v2737_v3  ;;  %2134 = vmatpush1.bf16.msra.mxu0 %v1582_v17  ;;  %v1652_v17 = vrot.slane %v3136_v32, %v813_v12 }
 0x5c5   :  { %2742 = vrcp.f32 %v2339_v4  ;;  %v2340_v7 = vadd.f32 1.0, %v2739_v5  ;;  %2135 = vmatprep.subr.bf16.mxu0 %v1590_v2 }
 0x5c6   :  { %2744 = vrcp.f32 %v2338_v6 }
 0x5c7   :  { %2746 = vrcp.f32 %v2340_v7 }
 0x5c8   :  { %2136 = vmatpush1.bf16.msra.mxu0 %v1589_v8 }
 0x5c9   :  { %2137 = vmatprep.subr.bf16.mxu0 %v1597_v9 }
 0x5cc   :  { %2138 = vmatpush1.bf16.msra.mxu0 %v1596_v14 }
 0x5cd   :  { %2139 = vmatprep.subr.bf16.mxu0 %v1604_v19 }
 0x5ce   :  { %v2741_v16 = vpop.eup %2740 }
 0x5cf   :  { %v2743_v23 = vpop.eup %2742 }
 0x5d0   :  { %v2745_v25 = vpop.eup %2744  ;;  %2140 = vmatpush1.bf16.msra.mxu0 %v1603_v21 }
 0x5d1   :  { %v2747_v26 = vpop.eup %2746  ;;  %2141 = vmatprep.subr.bf16.mxu0 %v1611_v22  ;;  %v2365_v28 = vcombine.low %v2741_v16, %v2745_v25 }
 0x5d2   :  { %v2510_v30 = vpop.f32.mrb[20].mxu1  ;;  %v2366_v15 = vcombine.low %v2743_v23, %v2747_v26 }
 0x5d3   :  { %v2511_v37 = vpop.f32.mrb[21].mxu1  ;;  %v2373_v56 = vrot.slane %v2365_v28, %v3147_v24 }
 0x5d4   :  { %2142 = vmatpush1.bf16.msra.mxu0 %v1610_v27  ;;  %v2512_v59 = vadd.f32 %v2511_v37, %v2510_v30  ;;  %v2513_v18 = vpop.f32.mrb[22].mxu1  ;;  %v2380_v33 = vrot.slane %v2366_v15, %v3147_v24 }
 0x5d5   :  { %2143 = vmatprep.subr.bf16.mxu0 %v1618_v29  ;;  %v2514_v40 = vpop.f32.mrb[23].mxu1 }
 0x5d6   :  { %v2381_v42 = vcombine.low %v2373_v56, %v2380_v33  ;;  %v2191_v44 = vadd.f32 %v2512_v59, %v1656_v52 }
 0x5d8   :  { %2144 = vmatpush1.bf16.msra.mxu0 %v1617_v35  ;;  %2400 = vst [vmem:[#allocation13] sm:$0xff] %v2381_v42 }
 0x5d9   :  { %2145 = vmatprep.subr.bf16.mxu0 %v1625_v41 }
 0x5dc   :  { %2146 = vmatpush1.bf16.msra.mxu0 %v1624_v43 }
 0x5df   :  { %2148 = vmatmul.mubr.bf16.vlgmr.msra.gmra.mrb[16].mxu0 %v3101_v51 }
 0x5f2   :  { %v2532_v45 = vpop.f32.mrb[24].mxu1 }
 0x5f3   :  { %v2533_v54 = vpop.f32.mrb[25].mxu1 }
 0x5f4   :  { %v2534_v46 = vadd.f32 %v2533_v54, %v2532_v45  ;;  %v2535_v47 = vpop.f32.mrb[26].mxu1 }
 0x5f5   :  { %v2536_v55 = vpop.f32.mrb[27].mxu1 }
 0x5f6   :  { %v2231_v48 = vadd.f32 %v2534_v46, %v2191_v44 }
 0x612   :  { %v2554_v49 = vpop.f32.mrb[28].mxu1 }
 0x613   :  { %v2555_v57 = vpop.f32.mrb[29].mxu1 }
 0x614   :  { %v2556_v36 = vadd.f32 %v2555_v57, %v2554_v49  ;;  %v2557_v50 = vpop.f32.mrb[30].mxu1 }
 0x615   :  { %v2558_v58 = vpop.f32.mrb[31].mxu1 }
 0x616   :  { %v2271_v60 = vadd.f32 %v2556_v36, %v2231_v48 }
 0x632   :  { %v2576_v31 = vpop.f32.mrb[32].mxu1 }
 0x633   :  { %v2577_v61 = vpop.f32.mrb[33].mxu1 }
 0x634   :  { %v2578_v51 = vadd.f32 %v2577_v61, %v2576_v31  ;;  %v2579_v34 = vpop.f32.mrb[34].mxu1 }
 0x635   :  { %v2580_v62 = vpop.f32.mrb[35].mxu1 }
 0x636   :  { %v2311_v63 = vadd.f32 %v2578_v51, %v2271_v60 }
 0x638   :  { %v2491_v39 = vmul.f32 -1.442695, %v2311_v63 }
 0x63a   :  { %2748 = vpow2.f32 %v2491_v39 }
 0x644   :  { %v2749_v8 = vpop.eup %2748 }
 0x645   :  { %v2343_v9 = vadd.f32 1.0, %v2749_v8 }
 0x6b2   :  { %v2149_v0 = vpop.f32.mrb[16].mxu0 }
 0x6b3   :  { %v2596_v1 = vadd.f32 %v2149_v0, %v1648_v38  ;;  %v2151_v2 = vpop.f32.mrb[17].mxu0 }
 0x6b4   :  { %v2597_v3 = vadd.f32 %v2151_v2, %v1652_v17  ;;  %v2153_v4 = vpop.f32.mrb[18].mxu0 }
 0x6b5   :  { %v2489_v5 = vmul.f32 -1.442695, %v2596_v1  ;;  %v2154_v6 = vpop.f32.mrb[19].mxu0 }
 0x6b6   :  { %v2490_v7 = vmul.f32 -1.442695, %v2597_v3 }
 0x6b7   :  { %2750 = vpow2.f32 %v2489_v5 }
 0x6b8   :  { %2752 = vpow2.f32 %v2490_v7 }
 0x6b9   :  { %2754 = vrcp.f32 %v2343_v9 }
 0x6c1   :  { %v2751_v10 = vpop.eup %2750 }
 0x6c2   :  { %v2753_v13 = vpop.eup %2752  ;;  %v2341_v11 = vadd.f32 1.0, %v2751_v10 }
 0x6c3   :  { %v2342_v53 = vadd.f32 1.0, %v2753_v13  ;;  %v2755_v12 = vpop.eup %2754 }
 0x6c4   :  { %2756 = vrcp.f32 %v2341_v11  ;;  %v2396_v21 = vrot.slane %v2755_v12, %v3147_v24 }
 0x6c5   :  { %2758 = vrcp.f32 %v2342_v53 }
 0x6ce   :  { %v2757_v32 = vpop.eup %2756 }
 0x6cf   :  { %v2759_v14 = vpop.eup %2758 }
 0x6d0   :  { %v2382_v19 = vcombine.low %v2757_v32, %v2759_v14 }
 0x6d2   :  { %v2389_v20 = vrot.slane %v2382_v19, %v3147_v24 }
 0x6d4   :  { %v2397_v16 = vcombine.low %v2389_v20, %v2396_v21 }
 0x6d6   :  { %2401 = vst [vmem:[#allocation13 + $0x8] sm:$0x3f] %v2397_v16 }
 0x6d7   :  { %2859 = shalt.err (!%p2856_p8)
}
 0x6d8   :  { %s2860_s14 = scalar_lea.hbm %s3183_s8, 224 }
 0x6d9   :  { %p2861_p9 = scmp.ne.s32.totalorder %s3183_s8, %s2860_s14  ;;  %p2864_p10 = scmp.lt.u32.totalorder %s2860_s14, %s3183_s8 }
 0x6db   :  { %p2866_p11 = pnand %p2864_p10, %p2861_p9 }
 0x6dd   :  { %2869 = shalt.err (!%p2866_p11)
}
 0x6de   :  { %2411 = dma.vmem_to_hbm [thread:$0]  %s2409_s9, 224, %s3183_s8, [#allocation7]  }
 0x6df   :  { %2880 = dma.done.wait [#allocation7], 224  }
 0x6e0   :  { %2881 = vsyncadd [#allocation7], 4294967072 }
 0x6e1   :  { %2415 = vsyncpa [#allocation6], 1 }
 0x6e2   :  { %2416 = vsyncpa [#allocation9], 1 }
 0x6e3   :  { %2417 = vsyncpa [#allocation12], 1 }
 0x6e4   :  { %2418 = vsyncpa [#allocation7], 1 }
 0x6e5   :  { %2419 = vsyncmov [#allocation4] }
 0x6e8   :  { %s2420_s19 = vpop.sfrf %2419 }
 0x6e9   :  { %p2492_p12 = scmp.ne.s32.totalorder %s2420_s19, 0 }
 0x6eb   :  { %2424 = shalt.err (%p2492_p12)  }
 0x6ec   :  { %2426 = vsyncmov [#allocation4 + $0x1] }
 0x6ef   :  { %s2427_s2 = vpop.sfrf %2426 }
 0x6f0   :  { %p2493_p13 = scmp.ne.s32.totalorder %s2427_s2, 0 }
 0x6f2   :  { %2431 = shalt.err (%p2493_p13)  }

</bundles_post_ra>
